<compile_context>
chip_gen: v6e
topology: v6e:2x2x1
jax: 0.10.0
libtpu: 0.0.40
codegen_flags: <defaults>
</compile_context>

<pallas_src>
import functools

import jax
import jax.numpy as jnp
from jax.experimental import pallas as pl
from jax.experimental.pallas import tpu as pltpu


# ----------------------------------------------------------------------------- kernel

def _fused_forward_kernel(masks_ref, x_ref, h0_ref,
                          w1_ref, b1_ref, w2_ref, b2_ref,
                          wfea_ref, bfea_ref, wgh_ref, wch_ref,
                          wo_ref, bo_ref,
                          out_ref, hid_ref,
                          *, H, W, n_loop, ch_hidden):
    """Whole forward for one lane-batched block of images.

    Activations are (C, N) f32 values with N = B_blk * H * W pixels in the lane axis.
    masks_ref is (9, N): per-tap validity masks (kills horizontal / vertical wrap of
    the lane roll at image borders and at image-to-image seams).
    """
    N = x_ref.shape[-1]
    masks = masks_ref[...]                                   # (9, N) f32

    # flattened-pixel shift of each 3x3 tap, tap-major order matching the weights
    offsets = [dy * W + dx for dy in (-1, 0, 1) for dx in (-1, 0, 1)]

    def tap_stack(act):
        """(C, N) f32 -> (9*C, N) bf16 im2col tap stack (rolled + edge-masked)."""
        parts = []
        for t, s in enumerate(offsets):
            tap = act if s == 0 else pltpu.roll(act, shift=(-s) % N, axis=1)
            if s != 0:                                       # center tap mask is all-ones
                tap = tap * masks[t:t + 1, :]
            parts.append(tap)
        return jnp.concatenate(parts, axis=0).astype(jnp.bfloat16)

    def conv3x3(act, w_ref, bias):
        """3x3 'same' conv as a single MXU matmul: (Cout, 9*Cin) @ (9*Cin, N)."""
        return jnp.dot(w_ref[...], tap_stack(act),
                       preferred_element_type=jnp.float32) + bias

    ch = ch_hidden

    # ---- encoder: 2 x (conv3x3 + ReLU)  (simplified UNetModule stand-in)
    x = x_ref[...].astype(jnp.float32)
    e1 = jnp.maximum(conv3x3(x, w1_ref, b1_ref[...]), 0.0)
    fea = jnp.maximum(conv3x3(e1, w2_ref, b2_ref[...]), 0.0)

    # fea contribution to the (u|r) gates and to the candidate: one fused conv with
    # 3*ch_hidden outputs, hoisted out of the GRU loop (fea is loop-invariant).
    fea_part = conv3x3(fea, wfea_ref, bfea_ref[...])          # (3*Ch, N)
    gate_fea = fea_part[:2 * ch]                              # u|r fea part
    cand_fea = fea_part[2 * ch:]                              # candidate fea part

    # ---- ConvGRU loop (n_loop is small, default 2 -> static unroll is fine; for
    # larger n_loop switch to lax.fori_loop(..., unroll=True) to bound live ranges).
    h = h0_ref[...].astype(jnp.float32)
    for _ in range(n_loop):
        g = jax.nn.sigmoid(gate_fea +
                           jnp.dot(wgh_ref[...], tap_stack(h),
                                   preferred_element_type=jnp.float32))
        u = g[:ch]                                            # update gate
        r = g[ch:]                                            # reset gate
        c = jnp.tanh(cand_fea +
                     jnp.dot(wch_ref[...], tap_stack(r * h),
                             preferred_element_type=jnp.float32))
        # TODO(synk): ConvGRU blend convention h' = h*(1-u) + c*u (verify vs. reference)
        h = h * (1.0 - u) + c * u

    hid_ref[...] = h.astype(hid_ref.dtype)

    # output head: 1x1 conv == channel matmul (Cout padded to 8 rows), then tanh
    out = jnp.tanh(jnp.dot(wo_ref[...], h.astype(jnp.bfloat16),
                           preferred_element_type=jnp.float32) + bo_ref[...])
    out_ref[...] = out.astype(out_ref.dtype)


# ----------------------------------------------------------------------------- wrapper

def _round_up(x, m):
    return (x + m - 1) // m * m


def _im2col_w(w, cin_pad=None):
    """(Cout, Cin, 3, 3) PyTorch conv weight -> (Cout, 9*Cin) bf16 im2col matrix.

    Column layout is tap-major ((ky*3+kx)*Cin + cin), matching tap_stack() above.
    """
    cout, cin = w.shape[:2]
    if cin_pad is not None and cin_pad != cin:
        w = jnp.pad(w, ((0, 0), (0, cin_pad - cin), (0, 0), (0, 0)))
        cin = cin_pad
    return jnp.transpose(w, (0, 2, 3, 1)).reshape(cout, 9 * cin).astype(jnp.bfloat16)


def _prep_b(b):
    return b.reshape(-1, 1).astype(jnp.float32)


def _pick_lane_batch(B, HW):
    """Widest image block (<=2048 lanes) that keeps >=2 grid steps when B allows."""
    best = 1
    for d in range(1, B + 1):
        if B % d != 0 or d * HW > 2048:
            continue
        if B < 2 or B // d >= 2:
            best = d
    return best


def _tap_masks(H, W, b_blk, dtype):
    """(9, b_blk*H*W) validity masks for the 9 rolled taps (zero-padding semantics)."""
    HW = H * W
    yy = jnp.arange(HW, dtype=jnp.int32) // W
    xx = jnp.arange(HW, dtype=jnp.int32) % W
    rows = []
    for dy in (-1, 0, 1):
        for dx in (-1, 0, 1):
            m = jnp.ones((HW,), jnp.bool_)
            if dy == -1:
                m = m & (yy > 0)
            if dy == 1:
                m = m & (yy < H - 1)
            if dx == -1:
                m = m & (xx > 0)
            if dx == 1:
                m = m & (xx < W - 1)
            rows.append(m)
    masks = jnp.stack(rows).astype(dtype)                     # (9, HW)
    return jnp.tile(masks, (1, b_blk))                        # (9, b_blk*HW)


def lightness_adjust_forward(params, x_nchw, hidden_nchw=None, n_loop=2):
    """Matches lightnessAdjustModule.forward: returns (output, hidden), both NCHW."""
    B, Cin, H, W = x_nchw.shape
    HW = H * W
    enc, gru, head = params["encoder"], params["gru"], params["out"]
    Cb = enc["w1"].shape[0]
    Ch = gru["wc_h"].shape[0]
    nc = head["w"].shape[0]
    dt = x_nchw.dtype
    assert Cb % 8 == 0 and Ch % 8 == 0, "ch_base / ch_hidden assumed multiples of 8"

    # Lane batching: B_blk images per grid step, pixels-in-lanes layout (C, B_blk*HW).
    B_blk = _pick_lane_batch(B, HW)
    G = B // B_blk
    N = B_blk * HW

    # --- activations: pad ch_in to 8 sublanes, pack B_blk images along lanes
    Cin_p = _round_up(Cin, 8)
    x = x_nchw.astype(dt).reshape(B, Cin, HW)
    if Cin_p != Cin:
        x = jnp.pad(x, ((0, 0), (0, Cin_p - Cin), (0, 0)))
    x = x.reshape(G, B_blk, Cin_p, HW).transpose(0, 2, 1, 3).reshape(G, Cin_p, N)

    if hidden_nchw is None:
        h0 = jnp.zeros((G, Ch, N), dt)
    else:
        h0 = hidden_nchw.astype(dt).reshape(B, Ch, HW)
        h0 = h0.reshape(G, B_blk, Ch, HW).transpose(0, 2, 1, 3).reshape(G, Ch, N)

    masks = _tap_masks(H, W, B_blk, jnp.float32)               # (9, N)

    # --- weights: im2col (Cout, 9*Cin) bf16; fea-side gate/candidate fused on Cout
    w1, b1 = _im2col_w(enc["w1"], cin_pad=Cin_p), _prep_b(enc["b1"])
    w2, b2 = _im2col_w(enc["w2"]), _prep_b(enc["b2"])
    wfea = jnp.concatenate([_im2col_w(gru["wg_f"]), _im2col_w(gru["wc_f"])], axis=0)
    bfea = jnp.concatenate([_prep_b(gru["bg"]), _prep_b(gru["bc"])], axis=0)
    wgh = _im2col_w(gru["wg_h"])
    wch = _im2col_w(gru["wc_h"])

    nc_p = _round_up(nc, 8)                                    # pad head Cout to 8 rows
    wo, bo = head["w"], head["b"]
    if nc_p != nc:
        wo = jnp.pad(wo, ((0, nc_p - nc), (0, 0)))
        bo = jnp.pad(bo, ((0, nc_p - nc),))
    wo = wo.astype(jnp.bfloat16)
    bo = _prep_b(bo)

    kern = functools.partial(_fused_forward_kernel, H=H, W=W,
                             n_loop=n_loop, ch_hidden=Ch)

    def full(a):
        zeros = (0,) * a.ndim
        return pl.BlockSpec(a.shape, lambda g: zeros)

    def per_block(c):
        return pl.BlockSpec((None, c, N), lambda g: (g, 0, 0))

    out, hid = pl.pallas_call(
        kern,
        out_shape=(jax.ShapeDtypeStruct((G, nc_p, N), dt),
                   jax.ShapeDtypeStruct((G, Ch, N), dt)),
        grid=(G,),
        in_specs=[
            full(masks), per_block(Cin_p), per_block(Ch),
            full(w1), full(b1), full(w2), full(b2),
            full(wfea), full(bfea), full(wgh), full(wch),
            full(wo), full(bo),
        ],
        out_specs=(per_block(nc_p), per_block(Ch)),
        compiler_params=pltpu.CompilerParams(
            dimension_semantics=("parallel",)),                # batch blocks shard across TCs
    )(masks, x, h0, w1, b1, w2, b2, wfea, bfea, wgh, wch, wo, bo)

    # --- unpack lane batching and strip channel padding
    out = out.reshape(G, nc_p, B_blk, HW).transpose(0, 2, 1, 3)
    out = out.reshape(B, nc_p, H, W)[:, :nc]
    hid = hid.reshape(G, Ch, B_blk, HW).transpose(0, 2, 1, 3).reshape(B, Ch, H, W)
    return out, hid


# ----------------------------------------------------------------------------- params

def init_params(key, n_class, ch_in, ch_base, ch_hidden):
    ks = jax.random.split(key, 7)

    def conv_w(k, cout, cin):
        return (0.1 * jax.random.normal(k, (cout, cin, 3, 3))).astype(jnp.float32)

    def bias(c):
        return jnp.full((c,), 0.01, jnp.float32)

    return {
        "encoder": {
            "w1": conv_w(ks[0], ch_base, ch_in), "b1": bias(ch_base),
            "w2": conv_w(ks[1], ch_base, ch_base), "b2": bias(ch_base),
        },
        "gru": {
            # update (u) + reset (r) gates fused along Cout, each weight split into a
            # fea part and a hidden part (== one conv over cat(fea, h)).
            "wg_f": conv_w(ks[2], 2 * ch_hidden, ch_base),
            "wg_h": conv_w(ks[3], 2 * ch_hidden, ch_hidden),
            "bg": bias(2 * ch_hidden),
            "wc_f": conv_w(ks[4], ch_hidden, ch_base),
            "wc_h": conv_w(ks[5], ch_hidden, ch_hidden),
            "bc": bias(ch_hidden),
        },
        "out": {
            "w": (0.1 * jax.random.normal(ks[6], (n_class, ch_hidden))).astype(jnp.float32),
            "b": bias(n_class),
        },
    }


if __name__ == "__main__":
    n_class, ch_in, ch_base, ch_hidden, n_loop = 3, 3, 8, 8, 2
    B, H, W = 4, 16, 16   # B=4 -> 2 lane-batched blocks of 512 pixels, grid=(2,)

    key = jax.random.PRNGKey(0)
    k_param, k_x = jax.random.split(key)
    params = init_params(k_param, n_class, ch_in, ch_base, ch_hidden)
    x = jax.random.normal(k_x, (B, ch_in, H, W), jnp.float32)   # PyTorch NCHW input

    output, hidden = lightness_adjust_forward(params, x, hidden_nchw=None, n_loop=n_loop)
    jax.block_until_ready((output, hidden))

    assert output.shape == (B, n_class, H, W)
    assert hidden.shape == (B, ch_hidden, H, W)
    assert bool(jnp.all(jnp.isfinite(output))) and bool(jnp.all(jnp.isfinite(hidden)))
    print("KERNEL_OK")
</pallas_src>

<mosaic_0001>
module attributes {stable_mosaic.version = 11 : i64} {
  func.func @_fused_forward_kernel(%arg0: i32, %arg1: memref<9x512xf32, #tpu.memory_space<vmem>>, %arg2: memref<1x8x512xf32, #tpu.memory_space<vmem>>, %arg3: memref<1x8x512xf32, #tpu.memory_space<vmem>>, %arg4: memref<8x72xbf16, #tpu.memory_space<vmem>>, %arg5: memref<8x1xf32, #tpu.memory_space<vmem>>, %arg6: memref<8x72xbf16, #tpu.memory_space<vmem>>, %arg7: memref<8x1xf32, #tpu.memory_space<vmem>>, %arg8: memref<24x72xbf16, #tpu.memory_space<vmem>>, %arg9: memref<24x1xf32, #tpu.memory_space<vmem>>, %arg10: memref<16x72xbf16, #tpu.memory_space<vmem>>, %arg11: memref<8x72xbf16, #tpu.memory_space<vmem>>, %arg12: memref<8x8xbf16, #tpu.memory_space<vmem>>, %arg13: memref<8x1xf32, #tpu.memory_space<vmem>>, %arg14: memref<1x8x512xf32, #tpu.memory_space<vmem>>, %arg15: memref<1x8x512xf32, #tpu.memory_space<vmem>>) attributes {dimension_semantics = [#tpu.dimension_semantics<parallel>], iteration_bounds = array<i64: 2>, scalar_prefetch = 0 : i64, scratch_operands = 0 : i64, tpu.core_type = #tpu.core_type<tc>, window_params = [{pipeline_mode = #tpu.pipeline_mode<synchronous>, transform_indices = @transform_0, window_bounds = array<i64: 9, 512>}, {transform_indices = @transform_1, window_bounds = array<i64: 1, 8, 512>}, {transform_indices = @transform_2, window_bounds = array<i64: 1, 8, 512>}, {pipeline_mode = #tpu.pipeline_mode<synchronous>, transform_indices = @transform_3, window_bounds = array<i64: 8, 72>}, {pipeline_mode = #tpu.pipeline_mode<synchronous>, transform_indices = @transform_4, window_bounds = array<i64: 8, 1>}, {pipeline_mode = #tpu.pipeline_mode<synchronous>, transform_indices = @transform_5, window_bounds = array<i64: 8, 72>}, {pipeline_mode = #tpu.pipeline_mode<synchronous>, transform_indices = @transform_6, window_bounds = array<i64: 8, 1>}, {pipeline_mode = #tpu.pipeline_mode<synchronous>, transform_indices = @transform_7, window_bounds = array<i64: 24, 72>}, {pipeline_mode = #tpu.pipeline_mode<synchronous>, transform_indices = @transform_8, window_bounds = array<i64: 24, 1>}, {pipeline_mode = #tpu.pipeline_mode<synchronous>, transform_indices = @transform_9, window_bounds = array<i64: 16, 72>}, {pipeline_mode = #tpu.pipeline_mode<synchronous>, transform_indices = @transform_10, window_bounds = array<i64: 8, 72>}, {pipeline_mode = #tpu.pipeline_mode<synchronous>, transform_indices = @transform_11, window_bounds = array<i64: 8, 8>}, {pipeline_mode = #tpu.pipeline_mode<synchronous>, transform_indices = @transform_12, window_bounds = array<i64: 8, 1>}, {transform_indices = @transform_13, window_bounds = array<i64: 1, 8, 512>}, {transform_indices = @transform_14, window_bounds = array<i64: 1, 8, 512>}]} {
    %c0 = arith.constant 0 : index
    %c0_0 = arith.constant 0 : index
    %0 = vector.load %arg1[%c0, %c0_0] : memref<9x512xf32, #tpu.memory_space<vmem>>, vector<9x512xf32>
    %c0_1 = arith.constant 0 : index
    %c0_2 = arith.constant 0 : index
    %c0_3 = arith.constant 0 : index
    %1 = vector.load %arg2[%c0_1, %c0_2, %c0_3] : memref<1x8x512xf32, #tpu.memory_space<vmem>>, vector<1x8x512xf32>
    %2 = vector.shape_cast %1 : vector<1x8x512xf32> to vector<8x512xf32>
    %c0_4 = arith.constant 0 : index
    %c0_5 = arith.constant 0 : index
    %3 = vector.load %arg5[%c0_4, %c0_5] : memref<8x1xf32, #tpu.memory_space<vmem>>, vector<8x1xf32>
    %c0_6 = arith.constant 0 : index
    %c0_7 = arith.constant 0 : index
    %4 = vector.load %arg4[%c0_6, %c0_7] : memref<8x72xbf16, #tpu.memory_space<vmem>>, vector<8x72xbf16>
    %c17_i32 = arith.constant 17 : i32
    %5 = tpu.dynamic_rotate %2 by %c17_i32 dim 1 : vector<8x512xf32>, i32 -> vector<8x512xf32>
    %6 = vector.extract_strided_slice %0 {offsets = [0, 0], sizes = [1, 512], strides = [1, 1]} : vector<9x512xf32> to vector<1x512xf32>
    %7 = vector.broadcast %6 : vector<1x512xf32> to vector<8x512xf32>
    %8 = arith.mulf %5, %7 : vector<8x512xf32>
    %c16_i32 = arith.constant 16 : i32
    %9 = tpu.dynamic_rotate %2 by %c16_i32 dim 1 : vector<8x512xf32>, i32 -> vector<8x512xf32>
    %10 = vector.extract_strided_slice %0 {offsets = [1, 0], sizes = [1, 512], strides = [1, 1]} : vector<9x512xf32> to vector<1x512xf32>
    %11 = vector.broadcast %10 : vector<1x512xf32> to vector<8x512xf32>
    %12 = arith.mulf %9, %11 : vector<8x512xf32>
    %c15_i32 = arith.constant 15 : i32
    %13 = tpu.dynamic_rotate %2 by %c15_i32 dim 1 : vector<8x512xf32>, i32 -> vector<8x512xf32>
    %14 = vector.extract_strided_slice %0 {offsets = [2, 0], sizes = [1, 512], strides = [1, 1]} : vector<9x512xf32> to vector<1x512xf32>
    %15 = vector.broadcast %14 : vector<1x512xf32> to vector<8x512xf32>
    %16 = arith.mulf %13, %15 : vector<8x512xf32>
    %c1_i32 = arith.constant 1 : i32
    %17 = tpu.dynamic_rotate %2 by %c1_i32 dim 1 : vector<8x512xf32>, i32 -> vector<8x512xf32>
    %18 = vector.extract_strided_slice %0 {offsets = [3, 0], sizes = [1, 512], strides = [1, 1]} : vector<9x512xf32> to vector<1x512xf32>
    %19 = vector.broadcast %18 : vector<1x512xf32> to vector<8x512xf32>
    %20 = arith.mulf %17, %19 : vector<8x512xf32>
    %c511_i32 = arith.constant 511 : i32
    %21 = tpu.dynamic_rotate %2 by %c511_i32 dim 1 : vector<8x512xf32>, i32 -> vector<8x512xf32>
    %22 = vector.extract_strided_slice %0 {offsets = [5, 0], sizes = [1, 512], strides = [1, 1]} : vector<9x512xf32> to vector<1x512xf32>
    %23 = vector.broadcast %22 : vector<1x512xf32> to vector<8x512xf32>
    %24 = arith.mulf %21, %23 : vector<8x512xf32>
    %c497_i32 = arith.constant 497 : i32
    %25 = tpu.dynamic_rotate %2 by %c497_i32 dim 1 : vector<8x512xf32>, i32 -> vector<8x512xf32>
    %26 = vector.extract_strided_slice %0 {offsets = [6, 0], sizes = [1, 512], strides = [1, 1]} : vector<9x512xf32> to vector<1x512xf32>
    %27 = vector.broadcast %26 : vector<1x512xf32> to vector<8x512xf32>
    %28 = arith.mulf %25, %27 : vector<8x512xf32>
    %c496_i32 = arith.constant 496 : i32
    %29 = tpu.dynamic_rotate %2 by %c496_i32 dim 1 : vector<8x512xf32>, i32 -> vector<8x512xf32>
    %30 = vector.extract_strided_slice %0 {offsets = [7, 0], sizes = [1, 512], strides = [1, 1]} : vector<9x512xf32> to vector<1x512xf32>
    %31 = vector.broadcast %30 : vector<1x512xf32> to vector<8x512xf32>
    %32 = arith.mulf %29, %31 : vector<8x512xf32>
    %c495_i32 = arith.constant 495 : i32
    %33 = tpu.dynamic_rotate %2 by %c495_i32 dim 1 : vector<8x512xf32>, i32 -> vector<8x512xf32>
    %34 = vector.extract_strided_slice %0 {offsets = [8, 0], sizes = [1, 512], strides = [1, 1]} : vector<9x512xf32> to vector<1x512xf32>
    %35 = vector.broadcast %34 : vector<1x512xf32> to vector<8x512xf32>
    %36 = arith.mulf %33, %35 : vector<8x512xf32>
    %37 = tpu.concatenate %8, %12, %16, %20, %2, %24, %28, %32, %36 in 0 : vector<8x512xf32>, vector<8x512xf32>, vector<8x512xf32>, vector<8x512xf32>, vector<8x512xf32>, vector<8x512xf32>, vector<8x512xf32>, vector<8x512xf32>, vector<8x512xf32> -> vector<72x512xf32>
    %38 = arith.truncf %37 : vector<72x512xf32> to vector<72x512xbf16>
    %cst = arith.constant dense<0.000000e+00> : vector<8x512xf32>
    %39 = tpu.matmul %4, %38, %cst {dimension_numbers = #tpu.dot_dimension_numbers<[1], [0], [0], [1], [0, 0, 1, 1], [], []>} : vector<8x72xbf16>, vector<72x512xbf16>, vector<8x512xf32> -> vector<8x512xf32>
    %40 = vector.broadcast %3 : vector<8x1xf32> to vector<8x512xf32>
    %41 = arith.addf %39, %40 : vector<8x512xf32>
    %cst_8 = arith.constant 0.000000e+00 : f32
    %42 = vector.broadcast %cst_8 : f32 to vector<8x512xf32>
    %43 = arith.maximumf %41, %42 : vector<8x512xf32>
    %c0_9 = arith.constant 0 : index
    %c0_10 = arith.constant 0 : index
    %44 = vector.load %arg7[%c0_9, %c0_10] : memref<8x1xf32, #tpu.memory_space<vmem>>, vector<8x1xf32>
    %c0_11 = arith.constant 0 : index
    %c0_12 = arith.constant 0 : index
    %45 = vector.load %arg6[%c0_11, %c0_12] : memref<8x72xbf16, #tpu.memory_space<vmem>>, vector<8x72xbf16>
    %c17_i32_13 = arith.constant 17 : i32
    %46 = tpu.dynamic_rotate %43 by %c17_i32_13 dim 1 : vector<8x512xf32>, i32 -> vector<8x512xf32>
    %47 = vector.extract_strided_slice %0 {offsets = [0, 0], sizes = [1, 512], strides = [1, 1]} : vector<9x512xf32> to vector<1x512xf32>
    %48 = vector.broadcast %47 : vector<1x512xf32> to vector<8x512xf32>
    %49 = arith.mulf %46, %48 : vector<8x512xf32>
    %c16_i32_14 = arith.constant 16 : i32
    %50 = tpu.dynamic_rotate %43 by %c16_i32_14 dim 1 : vector<8x512xf32>, i32 -> vector<8x512xf32>
    %51 = vector.extract_strided_slice %0 {offsets = [1, 0], sizes = [1, 512], strides = [1, 1]} : vector<9x512xf32> to vector<1x512xf32>
    %52 = vector.broadcast %51 : vector<1x512xf32> to vector<8x512xf32>
    %53 = arith.mulf %50, %52 : vector<8x512xf32>
    %c15_i32_15 = arith.constant 15 : i32
    %54 = tpu.dynamic_rotate %43 by %c15_i32_15 dim 1 : vector<8x512xf32>, i32 -> vector<8x512xf32>
    %55 = vector.extract_strided_slice %0 {offsets = [2, 0], sizes = [1, 512], strides = [1, 1]} : vector<9x512xf32> to vector<1x512xf32>
    %56 = vector.broadcast %55 : vector<1x512xf32> to vector<8x512xf32>
    %57 = arith.mulf %54, %56 : vector<8x512xf32>
    %c1_i32_16 = arith.constant 1 : i32
    %58 = tpu.dynamic_rotate %43 by %c1_i32_16 dim 1 : vector<8x512xf32>, i32 -> vector<8x512xf32>
    %59 = vector.extract_strided_slice %0 {offsets = [3, 0], sizes = [1, 512], strides = [1, 1]} : vector<9x512xf32> to vector<1x512xf32>
    %60 = vector.broadcast %59 : vector<1x512xf32> to vector<8x512xf32>
    %61 = arith.mulf %58, %60 : vector<8x512xf32>
    %c511_i32_17 = arith.constant 511 : i32
    %62 = tpu.dynamic_rotate %43 by %c511_i32_17 dim 1 : vector<8x512xf32>, i32 -> vector<8x512xf32>
    %63 = vector.extract_strided_slice %0 {offsets = [5, 0], sizes = [1, 512], strides = [1, 1]} : vector<9x512xf32> to vector<1x512xf32>
    %64 = vector.broadcast %63 : vector<1x512xf32> to vector<8x512xf32>
    %65 = arith.mulf %62, %64 : vector<8x512xf32>
    %c497_i32_18 = arith.constant 497 : i32
    %66 = tpu.dynamic_rotate %43 by %c497_i32_18 dim 1 : vector<8x512xf32>, i32 -> vector<8x512xf32>
    %67 = vector.extract_strided_slice %0 {offsets = [6, 0], sizes = [1, 512], strides = [1, 1]} : vector<9x512xf32> to vector<1x512xf32>
    %68 = vector.broadcast %67 : vector<1x512xf32> to vector<8x512xf32>
    %69 = arith.mulf %66, %68 : vector<8x512xf32>
    %c496_i32_19 = arith.constant 496 : i32
    %70 = tpu.dynamic_rotate %43 by %c496_i32_19 dim 1 : vector<8x512xf32>, i32 -> vector<8x512xf32>
    %71 = vector.extract_strided_slice %0 {offsets = [7, 0], sizes = [1, 512], strides = [1, 1]} : vector<9x512xf32> to vector<1x512xf32>
    %72 = vector.broadcast %71 : vector<1x512xf32> to vector<8x512xf32>
    %73 = arith.mulf %70, %72 : vector<8x512xf32>
    %c495_i32_20 = arith.constant 495 : i32
    %74 = tpu.dynamic_rotate %43 by %c495_i32_20 dim 1 : vector<8x512xf32>, i32 -> vector<8x512xf32>
    %75 = vector.extract_strided_slice %0 {offsets = [8, 0], sizes = [1, 512], strides = [1, 1]} : vector<9x512xf32> to vector<1x512xf32>
    %76 = vector.broadcast %75 : vector<1x512xf32> to vector<8x512xf32>
    %77 = arith.mulf %74, %76 : vector<8x512xf32>
    %78 = tpu.concatenate %49, %53, %57, %61, %43, %65, %69, %73, %77 in 0 : vector<8x512xf32>, vector<8x512xf32>, vector<8x512xf32>, vector<8x512xf32>, vector<8x512xf32>, vector<8x512xf32>, vector<8x512xf32>, vector<8x512xf32>, vector<8x512xf32> -> vector<72x512xf32>
    %79 = arith.truncf %78 : vector<72x512xf32> to vector<72x512xbf16>
    %cst_21 = arith.constant dense<0.000000e+00> : vector<8x512xf32>
    %80 = tpu.matmul %45, %79, %cst_21 {dimension_numbers = #tpu.dot_dimension_numbers<[1], [0], [0], [1], [0, 0, 1, 1], [], []>} : vector<8x72xbf16>, vector<72x512xbf16>, vector<8x512xf32> -> vector<8x512xf32>
    %81 = vector.broadcast %44 : vector<8x1xf32> to vector<8x512xf32>
    %82 = arith.addf %80, %81 : vector<8x512xf32>
    %cst_22 = arith.constant 0.000000e+00 : f32
    %83 = vector.broadcast %cst_22 : f32 to vector<8x512xf32>
    %84 = arith.maximumf %82, %83 : vector<8x512xf32>
    %c0_23 = arith.constant 0 : index
    %c0_24 = arith.constant 0 : index
    %85 = vector.load %arg9[%c0_23, %c0_24] : memref<24x1xf32, #tpu.memory_space<vmem>>, vector<24x1xf32>
    %c0_25 = arith.constant 0 : index
    %c0_26 = arith.constant 0 : index
    %86 = vector.load %arg8[%c0_25, %c0_26] : memref<24x72xbf16, #tpu.memory_space<vmem>>, vector<24x72xbf16>
    %c17_i32_27 = arith.constant 17 : i32
    %87 = tpu.dynamic_rotate %84 by %c17_i32_27 dim 1 : vector<8x512xf32>, i32 -> vector<8x512xf32>
    %88 = vector.extract_strided_slice %0 {offsets = [0, 0], sizes = [1, 512], strides = [1, 1]} : vector<9x512xf32> to vector<1x512xf32>
    %89 = vector.broadcast %88 : vector<1x512xf32> to vector<8x512xf32>
    %90 = arith.mulf %87, %89 : vector<8x512xf32>
    %c16_i32_28 = arith.constant 16 : i32
    %91 = tpu.dynamic_rotate %84 by %c16_i32_28 dim 1 : vector<8x512xf32>, i32 -> vector<8x512xf32>
    %92 = vector.extract_strided_slice %0 {offsets = [1, 0], sizes = [1, 512], strides = [1, 1]} : vector<9x512xf32> to vector<1x512xf32>
    %93 = vector.broadcast %92 : vector<1x512xf32> to vector<8x512xf32>
    %94 = arith.mulf %91, %93 : vector<8x512xf32>
    %c15_i32_29 = arith.constant 15 : i32
    %95 = tpu.dynamic_rotate %84 by %c15_i32_29 dim 1 : vector<8x512xf32>, i32 -> vector<8x512xf32>
    %96 = vector.extract_strided_slice %0 {offsets = [2, 0], sizes = [1, 512], strides = [1, 1]} : vector<9x512xf32> to vector<1x512xf32>
    %97 = vector.broadcast %96 : vector<1x512xf32> to vector<8x512xf32>
    %98 = arith.mulf %95, %97 : vector<8x512xf32>
    %c1_i32_30 = arith.constant 1 : i32
    %99 = tpu.dynamic_rotate %84 by %c1_i32_30 dim 1 : vector<8x512xf32>, i32 -> vector<8x512xf32>
    %100 = vector.extract_strided_slice %0 {offsets = [3, 0], sizes = [1, 512], strides = [1, 1]} : vector<9x512xf32> to vector<1x512xf32>
    %101 = vector.broadcast %100 : vector<1x512xf32> to vector<8x512xf32>
    %102 = arith.mulf %99, %101 : vector<8x512xf32>
    %c511_i32_31 = arith.constant 511 : i32
    %103 = tpu.dynamic_rotate %84 by %c511_i32_31 dim 1 : vector<8x512xf32>, i32 -> vector<8x512xf32>
    %104 = vector.extract_strided_slice %0 {offsets = [5, 0], sizes = [1, 512], strides = [1, 1]} : vector<9x512xf32> to vector<1x512xf32>
    %105 = vector.broadcast %104 : vector<1x512xf32> to vector<8x512xf32>
    %106 = arith.mulf %103, %105 : vector<8x512xf32>
    %c497_i32_32 = arith.constant 497 : i32
    %107 = tpu.dynamic_rotate %84 by %c497_i32_32 dim 1 : vector<8x512xf32>, i32 -> vector<8x512xf32>
    %108 = vector.extract_strided_slice %0 {offsets = [6, 0], sizes = [1, 512], strides = [1, 1]} : vector<9x512xf32> to vector<1x512xf32>
    %109 = vector.broadcast %108 : vector<1x512xf32> to vector<8x512xf32>
    %110 = arith.mulf %107, %109 : vector<8x512xf32>
    %c496_i32_33 = arith.constant 496 : i32
    %111 = tpu.dynamic_rotate %84 by %c496_i32_33 dim 1 : vector<8x512xf32>, i32 -> vector<8x512xf32>
    %112 = vector.extract_strided_slice %0 {offsets = [7, 0], sizes = [1, 512], strides = [1, 1]} : vector<9x512xf32> to vector<1x512xf32>
    %113 = vector.broadcast %112 : vector<1x512xf32> to vector<8x512xf32>
    %114 = arith.mulf %111, %113 : vector<8x512xf32>
    %c495_i32_34 = arith.constant 495 : i32
    %115 = tpu.dynamic_rotate %84 by %c495_i32_34 dim 1 : vector<8x512xf32>, i32 -> vector<8x512xf32>
    %116 = vector.extract_strided_slice %0 {offsets = [8, 0], sizes = [1, 512], strides = [1, 1]} : vector<9x512xf32> to vector<1x512xf32>
    %117 = vector.broadcast %116 : vector<1x512xf32> to vector<8x512xf32>
    %118 = arith.mulf %115, %117 : vector<8x512xf32>
    %119 = tpu.concatenate %90, %94, %98, %102, %84, %106, %110, %114, %118 in 0 : vector<8x512xf32>, vector<8x512xf32>, vector<8x512xf32>, vector<8x512xf32>, vector<8x512xf32>, vector<8x512xf32>, vector<8x512xf32>, vector<8x512xf32>, vector<8x512xf32> -> vector<72x512xf32>
    %120 = arith.truncf %119 : vector<72x512xf32> to vector<72x512xbf16>
    %cst_35 = arith.constant dense<0.000000e+00> : vector<24x512xf32>
    %121 = tpu.matmul %86, %120, %cst_35 {dimension_numbers = #tpu.dot_dimension_numbers<[1], [0], [0], [1], [0, 0, 1, 1], [], []>} : vector<24x72xbf16>, vector<72x512xbf16>, vector<24x512xf32> -> vector<24x512xf32>
    %122 = vector.broadcast %85 : vector<24x1xf32> to vector<24x512xf32>
    %123 = arith.addf %121, %122 : vector<24x512xf32>
    %124 = vector.extract_strided_slice %123 {offsets = [0, 0], sizes = [16, 512], strides = [1, 1]} : vector<24x512xf32> to vector<16x512xf32>
    %125 = vector.extract_strided_slice %123 {offsets = [16, 0], sizes = [8, 512], strides = [1, 1]} : vector<24x512xf32> to vector<8x512xf32>
    %c0_36 = arith.constant 0 : index
    %c0_37 = arith.constant 0 : index
    %c0_38 = arith.constant 0 : index
    %126 = vector.load %arg3[%c0_36, %c0_37, %c0_38] : memref<1x8x512xf32, #tpu.memory_space<vmem>>, vector<1x8x512xf32>
    %127 = vector.shape_cast %126 : vector<1x8x512xf32> to vector<8x512xf32>
    %c0_39 = arith.constant 0 : index
    %c0_40 = arith.constant 0 : index
    %128 = vector.load %arg10[%c0_39, %c0_40] : memref<16x72xbf16, #tpu.memory_space<vmem>>, vector<16x72xbf16>
    %c17_i32_41 = arith.constant 17 : i32
    %129 = tpu.dynamic_rotate %127 by %c17_i32_41 dim 1 : vector<8x512xf32>, i32 -> vector<8x512xf32>
    %130 = vector.extract_strided_slice %0 {offsets = [0, 0], sizes = [1, 512], strides = [1, 1]} : vector<9x512xf32> to vector<1x512xf32>
    %131 = vector.broadcast %130 : vector<1x512xf32> to vector<8x512xf32>
    %132 = arith.mulf %129, %131 : vector<8x512xf32>
    %c16_i32_42 = arith.constant 16 : i32
    %133 = tpu.dynamic_rotate %127 by %c16_i32_42 dim 1 : vector<8x512xf32>, i32 -> vector<8x512xf32>
    %134 = vector.extract_strided_slice %0 {offsets = [1, 0], sizes = [1, 512], strides = [1, 1]} : vector<9x512xf32> to vector<1x512xf32>
    %135 = vector.broadcast %134 : vector<1x512xf32> to vector<8x512xf32>
    %136 = arith.mulf %133, %135 : vector<8x512xf32>
    %c15_i32_43 = arith.constant 15 : i32
    %137 = tpu.dynamic_rotate %127 by %c15_i32_43 dim 1 : vector<8x512xf32>, i32 -> vector<8x512xf32>
    %138 = vector.extract_strided_slice %0 {offsets = [2, 0], sizes = [1, 512], strides = [1, 1]} : vector<9x512xf32> to vector<1x512xf32>
    %139 = vector.broadcast %138 : vector<1x512xf32> to vector<8x512xf32>
    %140 = arith.mulf %137, %139 : vector<8x512xf32>
    %c1_i32_44 = arith.constant 1 : i32
    %141 = tpu.dynamic_rotate %127 by %c1_i32_44 dim 1 : vector<8x512xf32>, i32 -> vector<8x512xf32>
    %142 = vector.extract_strided_slice %0 {offsets = [3, 0], sizes = [1, 512], strides = [1, 1]} : vector<9x512xf32> to vector<1x512xf32>
    %143 = vector.broadcast %142 : vector<1x512xf32> to vector<8x512xf32>
    %144 = arith.mulf %141, %143 : vector<8x512xf32>
    %c511_i32_45 = arith.constant 511 : i32
    %145 = tpu.dynamic_rotate %127 by %c511_i32_45 dim 1 : vector<8x512xf32>, i32 -> vector<8x512xf32>
    %146 = vector.extract_strided_slice %0 {offsets = [5, 0], sizes = [1, 512], strides = [1, 1]} : vector<9x512xf32> to vector<1x512xf32>
    %147 = vector.broadcast %146 : vector<1x512xf32> to vector<8x512xf32>
    %148 = arith.mulf %145, %147 : vector<8x512xf32>
    %c497_i32_46 = arith.constant 497 : i32
    %149 = tpu.dynamic_rotate %127 by %c497_i32_46 dim 1 : vector<8x512xf32>, i32 -> vector<8x512xf32>
    %150 = vector.extract_strided_slice %0 {offsets = [6, 0], sizes = [1, 512], strides = [1, 1]} : vector<9x512xf32> to vector<1x512xf32>
    %151 = vector.broadcast %150 : vector<1x512xf32> to vector<8x512xf32>
    %152 = arith.mulf %149, %151 : vector<8x512xf32>
    %c496_i32_47 = arith.constant 496 : i32
    %153 = tpu.dynamic_rotate %127 by %c496_i32_47 dim 1 : vector<8x512xf32>, i32 -> vector<8x512xf32>
    %154 = vector.extract_strided_slice %0 {offsets = [7, 0], sizes = [1, 512], strides = [1, 1]} : vector<9x512xf32> to vector<1x512xf32>
    %155 = vector.broadcast %154 : vector<1x512xf32> to vector<8x512xf32>
    %156 = arith.mulf %153, %155 : vector<8x512xf32>
    %c495_i32_48 = arith.constant 495 : i32
    %157 = tpu.dynamic_rotate %127 by %c495_i32_48 dim 1 : vector<8x512xf32>, i32 -> vector<8x512xf32>
    %158 = vector.extract_strided_slice %0 {offsets = [8, 0], sizes = [1, 512], strides = [1, 1]} : vector<9x512xf32> to vector<1x512xf32>
    %159 = vector.broadcast %158 : vector<1x512xf32> to vector<8x512xf32>
    %160 = arith.mulf %157, %159 : vector<8x512xf32>
    %161 = tpu.concatenate %132, %136, %140, %144, %127, %148, %152, %156, %160 in 0 : vector<8x512xf32>, vector<8x512xf32>, vector<8x512xf32>, vector<8x512xf32>, vector<8x512xf32>, vector<8x512xf32>, vector<8x512xf32>, vector<8x512xf32>, vector<8x512xf32> -> vector<72x512xf32>
    %162 = arith.truncf %161 : vector<72x512xf32> to vector<72x512xbf16>
    %cst_49 = arith.constant dense<0.000000e+00> : vector<16x512xf32>
    %163 = tpu.matmul %128, %162, %cst_49 {dimension_numbers = #tpu.dot_dimension_numbers<[1], [0], [0], [1], [0, 0, 1, 1], [], []>} : vector<16x72xbf16>, vector<72x512xbf16>, vector<16x512xf32> -> vector<16x512xf32>
    %164 = arith.addf %124, %163 : vector<16x512xf32>
    %165 = arith.negf %164 : vector<16x512xf32>
    %166 = math.exp %165 : vector<16x512xf32>
    %cst_50 = arith.constant 1.000000e+00 : f32
    %167 = vector.broadcast %cst_50 : f32 to vector<16x512xf32>
    %168 = arith.addf %167, %166 : vector<16x512xf32>
    %169 = arith.divf %167, %168 : vector<16x512xf32>
    %170 = vector.extract_strided_slice %169 {offsets = [0, 0], sizes = [8, 512], strides = [1, 1]} : vector<16x512xf32> to vector<8x512xf32>
    %171 = vector.extract_strided_slice %169 {offsets = [8, 0], sizes = [8, 512], strides = [1, 1]} : vector<16x512xf32> to vector<8x512xf32>
    %c0_51 = arith.constant 0 : index
    %c0_52 = arith.constant 0 : index
    %172 = vector.load %arg11[%c0_51, %c0_52] : memref<8x72xbf16, #tpu.memory_space<vmem>>, vector<8x72xbf16>
    %173 = arith.mulf %171, %127 : vector<8x512xf32>
    %c17_i32_53 = arith.constant 17 : i32
    %174 = tpu.dynamic_rotate %173 by %c17_i32_53 dim 1 : vector<8x512xf32>, i32 -> vector<8x512xf32>
    %175 = vector.extract_strided_slice %0 {offsets = [0, 0], sizes = [1, 512], strides = [1, 1]} : vector<9x512xf32> to vector<1x512xf32>
    %176 = vector.broadcast %175 : vector<1x512xf32> to vector<8x512xf32>
    %177 = arith.mulf %174, %176 : vector<8x512xf32>
    %c16_i32_54 = arith.constant 16 : i32
    %178 = tpu.dynamic_rotate %173 by %c16_i32_54 dim 1 : vector<8x512xf32>, i32 -> vector<8x512xf32>
    %179 = vector.extract_strided_slice %0 {offsets = [1, 0], sizes = [1, 512], strides = [1, 1]} : vector<9x512xf32> to vector<1x512xf32>
    %180 = vector.broadcast %179 : vector<1x512xf32> to vector<8x512xf32>
    %181 = arith.mulf %178, %180 : vector<8x512xf32>
    %c15_i32_55 = arith.constant 15 : i32
    %182 = tpu.dynamic_rotate %173 by %c15_i32_55 dim 1 : vector<8x512xf32>, i32 -> vector<8x512xf32>
    %183 = vector.extract_strided_slice %0 {offsets = [2, 0], sizes = [1, 512], strides = [1, 1]} : vector<9x512xf32> to vector<1x512xf32>
    %184 = vector.broadcast %183 : vector<1x512xf32> to vector<8x512xf32>
    %185 = arith.mulf %182, %184 : vector<8x512xf32>
    %c1_i32_56 = arith.constant 1 : i32
    %186 = tpu.dynamic_rotate %173 by %c1_i32_56 dim 1 : vector<8x512xf32>, i32 -> vector<8x512xf32>
    %187 = vector.extract_strided_slice %0 {offsets = [3, 0], sizes = [1, 512], strides = [1, 1]} : vector<9x512xf32> to vector<1x512xf32>
    %188 = vector.broadcast %187 : vector<1x512xf32> to vector<8x512xf32>
    %189 = arith.mulf %186, %188 : vector<8x512xf32>
    %c511_i32_57 = arith.constant 511 : i32
    %190 = tpu.dynamic_rotate %173 by %c511_i32_57 dim 1 : vector<8x512xf32>, i32 -> vector<8x512xf32>
    %191 = vector.extract_strided_slice %0 {offsets = [5, 0], sizes = [1, 512], strides = [1, 1]} : vector<9x512xf32> to vector<1x512xf32>
    %192 = vector.broadcast %191 : vector<1x512xf32> to vector<8x512xf32>
    %193 = arith.mulf %190, %192 : vector<8x512xf32>
    %c497_i32_58 = arith.constant 497 : i32
    %194 = tpu.dynamic_rotate %173 by %c497_i32_58 dim 1 : vector<8x512xf32>, i32 -> vector<8x512xf32>
    %195 = vector.extract_strided_slice %0 {offsets = [6, 0], sizes = [1, 512], strides = [1, 1]} : vector<9x512xf32> to vector<1x512xf32>
    %196 = vector.broadcast %195 : vector<1x512xf32> to vector<8x512xf32>
    %197 = arith.mulf %194, %196 : vector<8x512xf32>
    %c496_i32_59 = arith.constant 496 : i32
    %198 = tpu.dynamic_rotate %173 by %c496_i32_59 dim 1 : vector<8x512xf32>, i32 -> vector<8x512xf32>
    %199 = vector.extract_strided_slice %0 {offsets = [7, 0], sizes = [1, 512], strides = [1, 1]} : vector<9x512xf32> to vector<1x512xf32>
    %200 = vector.broadcast %199 : vector<1x512xf32> to vector<8x512xf32>
    %201 = arith.mulf %198, %200 : vector<8x512xf32>
    %c495_i32_60 = arith.constant 495 : i32
    %202 = tpu.dynamic_rotate %173 by %c495_i32_60 dim 1 : vector<8x512xf32>, i32 -> vector<8x512xf32>
    %203 = vector.extract_strided_slice %0 {offsets = [8, 0], sizes = [1, 512], strides = [1, 1]} : vector<9x512xf32> to vector<1x512xf32>
    %204 = vector.broadcast %203 : vector<1x512xf32> to vector<8x512xf32>
    %205 = arith.mulf %202, %204 : vector<8x512xf32>
    %206 = tpu.concatenate %177, %181, %185, %189, %173, %193, %197, %201, %205 in 0 : vector<8x512xf32>, vector<8x512xf32>, vector<8x512xf32>, vector<8x512xf32>, vector<8x512xf32>, vector<8x512xf32>, vector<8x512xf32>, vector<8x512xf32>, vector<8x512xf32> -> vector<72x512xf32>
    %207 = arith.truncf %206 : vector<72x512xf32> to vector<72x512xbf16>
    %cst_61 = arith.constant dense<0.000000e+00> : vector<8x512xf32>
    %208 = tpu.matmul %172, %207, %cst_61 {dimension_numbers = #tpu.dot_dimension_numbers<[1], [0], [0], [1], [0, 0, 1, 1], [], []>} : vector<8x72xbf16>, vector<72x512xbf16>, vector<8x512xf32> -> vector<8x512xf32>
    %209 = arith.addf %125, %208 : vector<8x512xf32>
    %210 = math.tanh %209 : vector<8x512xf32>
    %cst_62 = arith.constant 1.000000e+00 : f32
    %211 = vector.broadcast %cst_62 : f32 to vector<8x512xf32>
    %212 = arith.subf %211, %170 : vector<8x512xf32>
    %213 = arith.mulf %127, %212 : vector<8x512xf32>
    %214 = arith.mulf %210, %170 : vector<8x512xf32>
    %215 = arith.addf %213, %214 : vector<8x512xf32>
    %c0_63 = arith.constant 0 : index
    %c0_64 = arith.constant 0 : index
    %216 = vector.load %arg10[%c0_63, %c0_64] : memref<16x72xbf16, #tpu.memory_space<vmem>>, vector<16x72xbf16>
    %c17_i32_65 = arith.constant 17 : i32
    %217 = tpu.dynamic_rotate %215 by %c17_i32_65 dim 1 : vector<8x512xf32>, i32 -> vector<8x512xf32>
    %218 = vector.extract_strided_slice %0 {offsets = [0, 0], sizes = [1, 512], strides = [1, 1]} : vector<9x512xf32> to vector<1x512xf32>
    %219 = vector.broadcast %218 : vector<1x512xf32> to vector<8x512xf32>
    %220 = arith.mulf %217, %219 : vector<8x512xf32>
    %c16_i32_66 = arith.constant 16 : i32
    %221 = tpu.dynamic_rotate %215 by %c16_i32_66 dim 1 : vector<8x512xf32>, i32 -> vector<8x512xf32>
    %222 = vector.extract_strided_slice %0 {offsets = [1, 0], sizes = [1, 512], strides = [1, 1]} : vector<9x512xf32> to vector<1x512xf32>
    %223 = vector.broadcast %222 : vector<1x512xf32> to vector<8x512xf32>
    %224 = arith.mulf %221, %223 : vector<8x512xf32>
    %c15_i32_67 = arith.constant 15 : i32
    %225 = tpu.dynamic_rotate %215 by %c15_i32_67 dim 1 : vector<8x512xf32>, i32 -> vector<8x512xf32>
    %226 = vector.extract_strided_slice %0 {offsets = [2, 0], sizes = [1, 512], strides = [1, 1]} : vector<9x512xf32> to vector<1x512xf32>
    %227 = vector.broadcast %226 : vector<1x512xf32> to vector<8x512xf32>
    %228 = arith.mulf %225, %227 : vector<8x512xf32>
    %c1_i32_68 = arith.constant 1 : i32
    %229 = tpu.dynamic_rotate %215 by %c1_i32_68 dim 1 : vector<8x512xf32>, i32 -> vector<8x512xf32>
    %230 = vector.extract_strided_slice %0 {offsets = [3, 0], sizes = [1, 512], strides = [1, 1]} : vector<9x512xf32> to vector<1x512xf32>
    %231 = vector.broadcast %230 : vector<1x512xf32> to vector<8x512xf32>
    %232 = arith.mulf %229, %231 : vector<8x512xf32>
    %c511_i32_69 = arith.constant 511 : i32
    %233 = tpu.dynamic_rotate %215 by %c511_i32_69 dim 1 : vector<8x512xf32>, i32 -> vector<8x512xf32>
    %234 = vector.extract_strided_slice %0 {offsets = [5, 0], sizes = [1, 512], strides = [1, 1]} : vector<9x512xf32> to vector<1x512xf32>
    %235 = vector.broadcast %234 : vector<1x512xf32> to vector<8x512xf32>
    %236 = arith.mulf %233, %235 : vector<8x512xf32>
    %c497_i32_70 = arith.constant 497 : i32
    %237 = tpu.dynamic_rotate %215 by %c497_i32_70 dim 1 : vector<8x512xf32>, i32 -> vector<8x512xf32>
    %238 = vector.extract_strided_slice %0 {offsets = [6, 0], sizes = [1, 512], strides = [1, 1]} : vector<9x512xf32> to vector<1x512xf32>
    %239 = vector.broadcast %238 : vector<1x512xf32> to vector<8x512xf32>
    %240 = arith.mulf %237, %239 : vector<8x512xf32>
    %c496_i32_71 = arith.constant 496 : i32
    %241 = tpu.dynamic_rotate %215 by %c496_i32_71 dim 1 : vector<8x512xf32>, i32 -> vector<8x512xf32>
    %242 = vector.extract_strided_slice %0 {offsets = [7, 0], sizes = [1, 512], strides = [1, 1]} : vector<9x512xf32> to vector<1x512xf32>
    %243 = vector.broadcast %242 : vector<1x512xf32> to vector<8x512xf32>
    %244 = arith.mulf %241, %243 : vector<8x512xf32>
    %c495_i32_72 = arith.constant 495 : i32
    %245 = tpu.dynamic_rotate %215 by %c495_i32_72 dim 1 : vector<8x512xf32>, i32 -> vector<8x512xf32>
    %246 = vector.extract_strided_slice %0 {offsets = [8, 0], sizes = [1, 512], strides = [1, 1]} : vector<9x512xf32> to vector<1x512xf32>
    %247 = vector.broadcast %246 : vector<1x512xf32> to vector<8x512xf32>
    %248 = arith.mulf %245, %247 : vector<8x512xf32>
    %249 = tpu.concatenate %220, %224, %228, %232, %215, %236, %240, %244, %248 in 0 : vector<8x512xf32>, vector<8x512xf32>, vector<8x512xf32>, vector<8x512xf32>, vector<8x512xf32>, vector<8x512xf32>, vector<8x512xf32>, vector<8x512xf32>, vector<8x512xf32> -> vector<72x512xf32>
    %250 = arith.truncf %249 : vector<72x512xf32> to vector<72x512xbf16>
    %cst_73 = arith.constant dense<0.000000e+00> : vector<16x512xf32>
    %251 = tpu.matmul %216, %250, %cst_73 {dimension_numbers = #tpu.dot_dimension_numbers<[1], [0], [0], [1], [0, 0, 1, 1], [], []>} : vector<16x72xbf16>, vector<72x512xbf16>, vector<16x512xf32> -> vector<16x512xf32>
    %252 = arith.addf %124, %251 : vector<16x512xf32>
    %253 = arith.negf %252 : vector<16x512xf32>
    %254 = math.exp %253 : vector<16x512xf32>
    %cst_74 = arith.constant 1.000000e+00 : f32
    %255 = vector.broadcast %cst_74 : f32 to vector<16x512xf32>
    %256 = arith.addf %255, %254 : vector<16x512xf32>
    %257 = arith.divf %255, %256 : vector<16x512xf32>
    %258 = vector.extract_strided_slice %257 {offsets = [0, 0], sizes = [8, 512], strides = [1, 1]} : vector<16x512xf32> to vector<8x512xf32>
    %259 = vector.extract_strided_slice %257 {offsets = [8, 0], sizes = [8, 512], strides = [1, 1]} : vector<16x512xf32> to vector<8x512xf32>
    %c0_75 = arith.constant 0 : index
    %c0_76 = arith.constant 0 : index
    %260 = vector.load %arg11[%c0_75, %c0_76] : memref<8x72xbf16, #tpu.memory_space<vmem>>, vector<8x72xbf16>
    %261 = arith.mulf %259, %215 : vector<8x512xf32>
    %c17_i32_77 = arith.constant 17 : i32
    %262 = tpu.dynamic_rotate %261 by %c17_i32_77 dim 1 : vector<8x512xf32>, i32 -> vector<8x512xf32>
    %263 = vector.extract_strided_slice %0 {offsets = [0, 0], sizes = [1, 512], strides = [1, 1]} : vector<9x512xf32> to vector<1x512xf32>
    %264 = vector.broadcast %263 : vector<1x512xf32> to vector<8x512xf32>
    %265 = arith.mulf %262, %264 : vector<8x512xf32>
    %c16_i32_78 = arith.constant 16 : i32
    %266 = tpu.dynamic_rotate %261 by %c16_i32_78 dim 1 : vector<8x512xf32>, i32 -> vector<8x512xf32>
    %267 = vector.extract_strided_slice %0 {offsets = [1, 0], sizes = [1, 512], strides = [1, 1]} : vector<9x512xf32> to vector<1x512xf32>
    %268 = vector.broadcast %267 : vector<1x512xf32> to vector<8x512xf32>
    %269 = arith.mulf %266, %268 : vector<8x512xf32>
    %c15_i32_79 = arith.constant 15 : i32
    %270 = tpu.dynamic_rotate %261 by %c15_i32_79 dim 1 : vector<8x512xf32>, i32 -> vector<8x512xf32>
    %271 = vector.extract_strided_slice %0 {offsets = [2, 0], sizes = [1, 512], strides = [1, 1]} : vector<9x512xf32> to vector<1x512xf32>
    %272 = vector.broadcast %271 : vector<1x512xf32> to vector<8x512xf32>
    %273 = arith.mulf %270, %272 : vector<8x512xf32>
    %c1_i32_80 = arith.constant 1 : i32
    %274 = tpu.dynamic_rotate %261 by %c1_i32_80 dim 1 : vector<8x512xf32>, i32 -> vector<8x512xf32>
    %275 = vector.extract_strided_slice %0 {offsets = [3, 0], sizes = [1, 512], strides = [1, 1]} : vector<9x512xf32> to vector<1x512xf32>
    %276 = vector.broadcast %275 : vector<1x512xf32> to vector<8x512xf32>
    %277 = arith.mulf %274, %276 : vector<8x512xf32>
    %c511_i32_81 = arith.constant 511 : i32
    %278 = tpu.dynamic_rotate %261 by %c511_i32_81 dim 1 : vector<8x512xf32>, i32 -> vector<8x512xf32>
    %279 = vector.extract_strided_slice %0 {offsets = [5, 0], sizes = [1, 512], strides = [1, 1]} : vector<9x512xf32> to vector<1x512xf32>
    %280 = vector.broadcast %279 : vector<1x512xf32> to vector<8x512xf32>
    %281 = arith.mulf %278, %280 : vector<8x512xf32>
    %c497_i32_82 = arith.constant 497 : i32
    %282 = tpu.dynamic_rotate %261 by %c497_i32_82 dim 1 : vector<8x512xf32>, i32 -> vector<8x512xf32>
    %283 = vector.extract_strided_slice %0 {offsets = [6, 0], sizes = [1, 512], strides = [1, 1]} : vector<9x512xf32> to vector<1x512xf32>
    %284 = vector.broadcast %283 : vector<1x512xf32> to vector<8x512xf32>
    %285 = arith.mulf %282, %284 : vector<8x512xf32>
    %c496_i32_83 = arith.constant 496 : i32
    %286 = tpu.dynamic_rotate %261 by %c496_i32_83 dim 1 : vector<8x512xf32>, i32 -> vector<8x512xf32>
    %287 = vector.extract_strided_slice %0 {offsets = [7, 0], sizes = [1, 512], strides = [1, 1]} : vector<9x512xf32> to vector<1x512xf32>
    %288 = vector.broadcast %287 : vector<1x512xf32> to vector<8x512xf32>
    %289 = arith.mulf %286, %288 : vector<8x512xf32>
    %c495_i32_84 = arith.constant 495 : i32
    %290 = tpu.dynamic_rotate %261 by %c495_i32_84 dim 1 : vector<8x512xf32>, i32 -> vector<8x512xf32>
    %291 = vector.extract_strided_slice %0 {offsets = [8, 0], sizes = [1, 512], strides = [1, 1]} : vector<9x512xf32> to vector<1x512xf32>
    %292 = vector.broadcast %291 : vector<1x512xf32> to vector<8x512xf32>
    %293 = arith.mulf %290, %292 : vector<8x512xf32>
    %294 = tpu.concatenate %265, %269, %273, %277, %261, %281, %285, %289, %293 in 0 : vector<8x512xf32>, vector<8x512xf32>, vector<8x512xf32>, vector<8x512xf32>, vector<8x512xf32>, vector<8x512xf32>, vector<8x512xf32>, vector<8x512xf32>, vector<8x512xf32> -> vector<72x512xf32>
    %295 = arith.truncf %294 : vector<72x512xf32> to vector<72x512xbf16>
    %cst_85 = arith.constant dense<0.000000e+00> : vector<8x512xf32>
    %296 = tpu.matmul %260, %295, %cst_85 {dimension_numbers = #tpu.dot_dimension_numbers<[1], [0], [0], [1], [0, 0, 1, 1], [], []>} : vector<8x72xbf16>, vector<72x512xbf16>, vector<8x512xf32> -> vector<8x512xf32>
    %297 = arith.addf %125, %296 : vector<8x512xf32>
    %298 = math.tanh %297 : vector<8x512xf32>
    %cst_86 = arith.constant 1.000000e+00 : f32
    %299 = vector.broadcast %cst_86 : f32 to vector<8x512xf32>
    %300 = arith.subf %299, %258 : vector<8x512xf32>
    %301 = arith.mulf %215, %300 : vector<8x512xf32>
    %302 = arith.mulf %298, %258 : vector<8x512xf32>
    %303 = arith.addf %301, %302 : vector<8x512xf32>
    %c0_87 = arith.constant 0 : index
    %c0_88 = arith.constant 0 : index
    %c0_89 = arith.constant 0 : index
    %304 = vector.load %arg15[%c0_87, %c0_88, %c0_89] : memref<1x8x512xf32, #tpu.memory_space<vmem>>, vector<1x8x512xf32>
    %305 = vector.shape_cast %304 : vector<1x8x512xf32> to vector<8x512xf32>
    %306 = vector.shape_cast %303 : vector<8x512xf32> to vector<1x8x512xf32>
    tpu.vector_store %arg15[%c0_87, %c0_88, %c0_89], %306 {strides = array<i32>} : memref<1x8x512xf32, #tpu.memory_space<vmem>>, vector<1x8x512xf32>,
    %c0_90 = arith.constant 0 : index
    %c0_91 = arith.constant 0 : index
    %307 = vector.load %arg12[%c0_90, %c0_91] : memref<8x8xbf16, #tpu.memory_space<vmem>>, vector<8x8xbf16>
    %308 = arith.truncf %303 : vector<8x512xf32> to vector<8x512xbf16>
    %cst_92 = arith.constant dense<0.000000e+00> : vector<8x512xf32>
    %309 = tpu.matmul %307, %308, %cst_92 {dimension_numbers = #tpu.dot_dimension_numbers<[1], [0], [0], [1], [0, 0, 1, 1], [], []>} : vector<8x8xbf16>, vector<8x512xbf16>, vector<8x512xf32> -> vector<8x512xf32>
    %c0_93 = arith.constant 0 : index
    %c0_94 = arith.constant 0 : index
    %310 = vector.load %arg13[%c0_93, %c0_94] : memref<8x1xf32, #tpu.memory_space<vmem>>, vector<8x1xf32>
    %311 = vector.broadcast %310 : vector<8x1xf32> to vector<8x512xf32>
    %312 = arith.addf %309, %311 : vector<8x512xf32>
    %313 = math.tanh %312 : vector<8x512xf32>
    %c0_95 = arith.constant 0 : index
    %c0_96 = arith.constant 0 : index
    %c0_97 = arith.constant 0 : index
    %314 = vector.load %arg14[%c0_95, %c0_96, %c0_97] : memref<1x8x512xf32, #tpu.memory_space<vmem>>, vector<1x8x512xf32>
    %315 = vector.shape_cast %314 : vector<1x8x512xf32> to vector<8x512xf32>
    %316 = vector.shape_cast %313 : vector<8x512xf32> to vector<1x8x512xf32>
    tpu.vector_store %arg14[%c0_95, %c0_96, %c0_97], %316 {strides = array<i32>} : memref<1x8x512xf32, #tpu.memory_space<vmem>>, vector<1x8x512xf32>,
    return
  }
  func.func @transform_0(%arg0: i32) -> (i32, i32) {
    %c0_i32 = arith.constant 0 : i32
    %c0_i32_0 = arith.constant 0 : i32
    %c0_i32_1 = arith.constant 0 : i32
    return %c0_i32, %c0_i32_0 : i32, i32
  }
  func.func @transform_1(%arg0: i32) -> (i32, i32, i32) {
    %c0_i32 = arith.constant 0 : i32
    %c0_i32_0 = arith.constant 0 : i32
    %c0_i32_1 = arith.constant 0 : i32
    return %arg0, %c0_i32, %c0_i32_0 : i32, i32, i32
  }
  func.func @transform_2(%arg0: i32) -> (i32, i32, i32) {
    %c0_i32 = arith.constant 0 : i32
    %c0_i32_0 = arith.constant 0 : i32
    %c0_i32_1 = arith.constant 0 : i32
    return %arg0, %c0_i32, %c0_i32_0 : i32, i32, i32
  }
  func.func @transform_3(%arg0: i32) -> (i32, i32) {
    %c0_i32 = arith.constant 0 : i32
    %c0_i32_0 = arith.constant 0 : i32
    %c0_i32_1 = arith.constant 0 : i32
    return %c0_i32, %c0_i32_0 : i32, i32
  }
  func.func @transform_4(%arg0: i32) -> (i32, i32) {
    %c0_i32 = arith.constant 0 : i32
    %c0_i32_0 = arith.constant 0 : i32
    %c0_i32_1 = arith.constant 0 : i32
    return %c0_i32, %c0_i32_0 : i32, i32
  }
  func.func @transform_5(%arg0: i32) -> (i32, i32) {
    %c0_i32 = arith.constant 0 : i32
    %c0_i32_0 = arith.constant 0 : i32
    %c0_i32_1 = arith.constant 0 : i32
    return %c0_i32, %c0_i32_0 : i32, i32
  }
  func.func @transform_6(%arg0: i32) -> (i32, i32) {
    %c0_i32 = arith.constant 0 : i32
    %c0_i32_0 = arith.constant 0 : i32
    %c0_i32_1 = arith.constant 0 : i32
    return %c0_i32, %c0_i32_0 : i32, i32
  }
  func.func @transform_7(%arg0: i32) -> (i32, i32) {
    %c0_i32 = arith.constant 0 : i32
    %c0_i32_0 = arith.constant 0 : i32
    %c0_i32_1 = arith.constant 0 : i32
    return %c0_i32, %c0_i32_0 : i32, i32
  }
  func.func @transform_8(%arg0: i32) -> (i32, i32) {
    %c0_i32 = arith.constant 0 : i32
    %c0_i32_0 = arith.constant 0 : i32
    %c0_i32_1 = arith.constant 0 : i32
    return %c0_i32, %c0_i32_0 : i32, i32
  }
  func.func @transform_9(%arg0: i32) -> (i32, i32) {
    %c0_i32 = arith.constant 0 : i32
    %c0_i32_0 = arith.constant 0 : i32
    %c0_i32_1 = arith.constant 0 : i32
    return %c0_i32, %c0_i32_0 : i32, i32
  }
  func.func @transform_10(%arg0: i32) -> (i32, i32) {
    %c0_i32 = arith.constant 0 : i32
    %c0_i32_0 = arith.constant 0 : i32
    %c0_i32_1 = arith.constant 0 : i32
    return %c0_i32, %c0_i32_0 : i32, i32
  }
  func.func @transform_11(%arg0: i32) -> (i32, i32) {
    %c0_i32 = arith.constant 0 : i32
    %c0_i32_0 = arith.constant 0 : i32
    %c0_i32_1 = arith.constant 0 : i32
    return %c0_i32, %c0_i32_0 : i32, i32
  }
  func.func @transform_12(%arg0: i32) -> (i32, i32) {
    %c0_i32 = arith.constant 0 : i32
    %c0_i32_0 = arith.constant 0 : i32
    %c0_i32_1 = arith.constant 0 : i32
    return %c0_i32, %c0_i32_0 : i32, i32
  }
  func.func @transform_13(%arg0: i32) -> (i32, i32, i32) {
    %c0_i32 = arith.constant 0 : i32
    %c0_i32_0 = arith.constant 0 : i32
    %c0_i32_1 = arith.constant 0 : i32
    return %arg0, %c0_i32, %c0_i32_0 : i32, i32, i32
  }
  func.func @transform_14(%arg0: i32) -> (i32, i32, i32) {
    %c0_i32 = arith.constant 0 : i32
    %c0_i32_0 = arith.constant 0 : i32
    %c0_i32_1 = arith.constant 0 : i32
    return %arg0, %c0_i32, %c0_i32_0 : i32, i32, i32
  }
}

</mosaic_0001>

<bundles_post_ra>
// kernel: tpu_custom_call.1
= control target key start
LH: loop header
LB: loop body
LE: loop exit
PB: predicated region body
PF: predicated region fallthrough
CT: control target
= control target key end

     0   :  { %s5433_s0 = inlined_call_operand.hbm [shape: f32[9,512], index: 0, kind: input, shape index: {}]   ;;  %s5434_s1 = inlined_call_operand.hbm [shape: f32[2,8,512], index: 1, kind: input, shape index: {}]   ;;  %s5435_s2 = inlined_call_operand.hbm [shape: f32[2,8,512], index: 2, kind: input, shape index: {}]   ;;  %s5436_s3 = inlined_call_operand.vmem [shape: bf16[8,72], index: 3, kind: input, shape index: {}]   ;;  %s5437_s4 = inlined_call_operand.vmem [shape: f32[8,1], index: 4, kind: input, shape index: {}]   ;;  %s5438_s5 = inlined_call_operand.vmem [shape: bf16[8,72], index: 5, kind: input, shape index: {}]   ;;  %s5439_s6 = inlined_call_operand.vmem [shape: f32[8,1], index: 6, kind: input, shape index: {}]   ;;  %s5440_s7 = inlined_call_operand.vmem [shape: bf16[24,72], index: 7, kind: input, shape index: {}]   ;;  %s5441_s8 = inlined_call_operand.vmem [shape: f32[24,1], index: 8, kind: input, shape index: {}]   ;;  %s5442_s9 = inlined_call_operand.vmem [shape: bf16[16,72], index: 9, kind: input, shape index: {}]   ;;  %s5443_s10 = inlined_call_operand.vmem [shape: bf16[8,72], index: 10, kind: input, shape index: {}]   ;;  %s5444_s11 = inlined_call_operand.vmem [shape: bf16[8,8], index: 11, kind: input, shape index: {}]   ;;  %s5445_s12 = inlined_call_operand.vmem [shape: f32[8,1], index: 12, kind: input, shape index: {}]   ;;  %s5446_s13 = inlined_call_operand.hbm [shape: f32[2,8,512], index: 13, kind: output, shape index: {0}]   ;;  %s5447_s14 = inlined_call_operand.hbm [shape: f32[2,8,512], index: 14, kind: output, shape index: {1}]  }
   0x1   :  { %5510 = sst [smem:[#allocation43_spill]] %s5434_s1 }
   0x2   :  { %5511 = sst [smem:[#allocation44_spill]] %s5444_s11 }
   0x3   :  { %5512 = sst [smem:[#allocation45_spill]] %s5446_s13 }
   0x4   :  { %5513 = sst [smem:[#allocation46_spill]] %s5447_s14 }
   0x5   :  { %20 = vsyncpa [#allocation3], 0 }
   0x6   :  { %21 = vsyncpa [#allocation6], 0 }
   0x7   :  { %23 = vsyncpa [#allocation6 + $0x1], 0 }
   0x8   :  { %24 = vsyncpa [#allocation4], 0 }
   0x9   :  { %26 = vsyncpa [#allocation4 + $0x1], 0 }
   0xa   :  { %27 = vsyncpa [#allocation10], 0 }
   0xb   :  { %29 = vsyncpa [#allocation10 + $0x1], 0  ;;  %s3499_s29 = smov 0   ;;  %s3501_s30 = smov 0  }
   0xc   :  { %s3503_s15 = smov 0   ;;  %s3505_s16 = smov 0  }
   0xd LB: > { %5514 = sst [smem:[#allocation15_spill]] %s3394_s29  ;;  %s3520_s17 = sadd.s32 1, %s3406_s16   ;;  %s3406_s16 = sphi %s3505_s16, %s5624_s16   ;;  %s3402_s15 = sphi %s3503_s15, %s5626_s15   ;;  %s3398_s30 = sphi %s3501_s30, %s5628_s30   ;;  %s3394_s29 = sphi %s3499_s29, %s5627_s29  }
   0xe   : > { %5515 = sst [smem:[#allocation16_spill]] %s3402_s15  ;;  %s63_s18 = sadd.s32 1, %s3402_s15 }
   0xf   : > { %5516 = sst [smem:[#allocation17_spill]] %s3406_s16  ;;  %s60_s19 = ssub.s32 %s3406_s16, %s3520_s17 }
  0x10   : > { %5517 = sst [smem:[#allocation18_spill]] %s3520_s17  ;;  %p5453_p0 = scmp.ne.s32.totalorder %s3402_s15, %s3398_s30 }
  0x11   : > { %p61_p1 = scmp.eq.s32.totalorder %s60_s19, 0  ;;  %p71_p2 = scmp.eq.s32.totalorder %s3406_s16, 0 }
  0x12   : > { %p3074_p4 = scmp.lt.s32.totalorder %s3406_s16, 2  ;;  %s431_s21 = sand.u32 1, %s3406_s16  }
  0x13   : > { %s3531_s20 = scalar_select %p61_p1, %s3402_s15, %s63_s18  }
  0x14   : > { %p72_p5 = por %p71_p2, %p5453_p0  ;;  %s433_s22 = sand.u32 1, %s3402_s15  }
  0x15   : > { %5518 = sst [smem:[#allocation19_spill]] %s3531_s20  ;;  %s3538_s23 = sshll.u32 %s433_s22, 5 }
  0x16   : > { %s5448_s24 = sshll.u32 %s3406_s16, 9  ;;  %s5519_s1 = sld [smem:[#allocation43_spill]] }
  0x17   : > { %s435_s28 = scalar_lea.vmem [#allocation5], %s3538_s23  ;;  %p3549_p6 = pnand %p3074_p4, %p72_p5 }
  0x18   : > { %s443_s18 = sshll.u32 %s435_s28, 4  ;;  %s3553_s22 = scalar_lea.sflag [#allocation6], %s431_s21  ;;  %s444_s18 = int_to_ptr.vmem [resolvable:$true] %s443_s18 }
  0x19   : > { %p3228_p8 = pneg %p3549_p6 }
  0x1c   : > { %s3546_s27 = scalar_lea.hbm %s5519_s1, %s5448_s24  ;;  %s3231_s28 = scalar_lea.hbm %s5519_s1, 1024 }
  0x1d   : > { %s3226_s20 = scalar_lea.hbm %s3546_s27, 512  ;;  %p3232_p11 = scmp.lt.s32.totalorder %s3546_s27, %s5519_s1 }
  0x1e   : > { %p3227_p7 = scmp.ne.s32.totalorder %s3546_s27, %s3226_s20  ;;  %p3233_p12 = scmp.lt.s32.totalorder %s3231_s28, %s3226_s20 }
  0x20   : > { %p3229_p9 = pnand %p3228_p8, %p3227_p7  ;;  %p3234_p13 = por %p3233_p12, %p3232_p11 }
  0x22   : > { %p3230_p10 = pneg %p3229_p9 }
  0x24   : > { %p3235_p1 = pnand %p3234_p13, %p3230_p10 }
  0x26   : > { %3238 = shalt.err (!%p3235_p1)
}
  0x27   : > { %s3239_s21 = scalar_lea.vmem %s444_s18, 512  ;;  %s3408_s13 = smov [#allocation5]  }
  0x28   : > { %p3240_p2 = scmp.ne.s32.totalorder %s444_s18, %s3239_s21  ;;  %s3244_s14 = sshll.u32 %s3408_s13, 4  ;;  %s3245_s14 = int_to_ptr.vmem [resolvable:$false] %s3244_s14 }
  0x29   : > { %s3246_s25 = scalar_lea.vmem %s3245_s14, 1024  ;;  %p3247_p7 = scmp.lt.s32.totalorder %s444_s18, %s3245_s14 }
  0x2a   : > { %p3242_p4 = pnand %p3240_p2, %p3228_p8  ;;  %p3248_p9 = scmp.lt.s32.totalorder %s3246_s25, %s3239_s21 }
  0x2c   : > { %p3243_p5 = pneg %p3242_p4  ;;  %p3249_p3 = por %p3248_p9, %p3247_p7 }
  0x2e   : > { %p3250_p0 = pnand %p3249_p3, %p3243_p5 }
  0x30   : > { %3253 = shalt.err (!%p3250_p0)
}
  0x31   : > { %3062 = dma.hbm_to_vmem [thread:$0]  (!%p3549_p6), %s3546_s27, 512, %s444_s18, %s3553_s22  }
  0x32   : > { %s3577_s13 = sadd.s32 4294967295, %s3406_s16   ;;  %s2958_s14 = sadd.s32 4294967294, %s3406_s16  }
  0x33   : > { %p76_p0 = scmp.ne.s32.totalorder %s3398_s30, %s3394_s29  ;;  %p5457_p3 = scmp.eq.s32.totalorder %s3577_s13, 0 }
  0x34   : > { %p336_p10 = scmp.eq.s32.totalorder %s3577_s13, 1  ;;  %p342_p11 = scmp.eq.s32.totalorder %s2958_s14, 1 }
  0x35   : > { %p3586_p12 = por %p5457_p3, %p76_p0  ;;  %p2959_p13 = scmp.ge.s32.totalorder %s3406_s16, 1 }
  0x36   : > { %p5522_p1 = scmp.ne.s32.totalorder %s3402_s15, %s3398_s30  ;;  %p3598_p4 = por %p342_p11, %p76_p0 }
  0x37   : > { %s5521_s17 = scalar_select %p3586_p12, 1, 0 }
  0x38   : > { %p3594_p2 = por %p336_p10, %p5522_p1  ;;  %p375_p5 = scmp.lt.s32.totalorder %s3406_s16, 3 }
  0x39   : > { %s5524_s24 = scalar_select %p3598_p4, 1, 0 }
  0x3a   : > { %s5523_s20 = scalar_select %p3594_p2, 1, 0 }
  0x3b   : > { %5525 = sst [smem:[#allocation20_spill]] %s5524_s24  ;;  %p3603_p7 = pnand %p2959_p13, %p375_p5 }
  0x3c   : > { %s3409_s18 = smov [#allocation2]   ;;  %s5527_s28 = sshll.u32 %s3406_s16, 9 }
  0x3d   : > { %s5526_s27 = scalar_select %p3603_p7, 1, 0 }
  0x3e   : > { %s387_s26 = sshll.u32 %s3409_s18, 4  ;;  %s3612_s14 = scalar_lea.hbm %s5435_s2, %s5527_s28  ;;  %s3617_s26 = int_to_ptr.vmem [resolvable:$true] %s387_s26 }
  0x3f   : > { %p3055_p9 = pneg %p3603_p7  ;;  %s454_s1 = scalar_lea.vmem [#allocation7], %s3538_s23 }
  0x40   : > { %s462_s15 = sshll.u32 %s454_s1, 4  ;;  %s3254_s18 = scalar_lea.hbm %s3612_s14, 512  ;;  %s463_s15 = int_to_ptr.vmem [resolvable:$true] %s462_s15 }
  0x41   : > { %p3621_p0 = pnand %p3055_p9, %p5457_p3  ;;  %p3255_p10 = scmp.ne.s32.totalorder %s3612_s14, %s3254_s18 }
  0x42   : > { %s3259_s25 = scalar_lea.hbm %s5435_s2, 1024  ;;  %p3260_p1 = scmp.lt.s32.totalorder %s3612_s14, %s5435_s2 }
  0x43   : > { %s5528_s24 = scalar_select %p3621_p0, 1, 0 }
  0x44   : > { %p3257_p11 = pnand %p3255_p10, %p3228_p8  ;;  %p3261_p5 = scmp.lt.s32.totalorder %s3259_s25, %s3254_s18 }
  0x46   : > { %p3258_p13 = pneg %p3257_p11  ;;  %p3262_p4 = por %p3261_p5, %p3260_p1 }
  0x48   : > { %p3263_p9 = pnand %p3262_p4, %p3258_p13 }
  0x4a   : > { %3266 = shalt.err (!%p3263_p9)
}
  0x4b   : > { %s3267_s16 = scalar_lea.vmem %s463_s15, 512  ;;  %s3410_s29 = smov [#allocation7]  }
  0x4c   : > { %p3268_p3 = scmp.ne.s32.totalorder %s463_s15, %s3267_s16  ;;  %s3272_s11 = sshll.u32 %s3410_s29, 4  ;;  %s3273_s11 = int_to_ptr.vmem [resolvable:$false] %s3272_s11 }
  0x4d   : > { %s3274_s28 = scalar_lea.vmem %s3273_s11, 1024  ;;  %p3275_p11 = scmp.lt.s32.totalorder %s463_s15, %s3273_s11 }
  0x4e   : > { %p3270_p2 = pnand %p3268_p3, %p3228_p8  ;;  %p3276_p12 = scmp.lt.s32.totalorder %s3274_s28, %s3267_s16 }
  0x50   : > { %p3271_p10 = pneg %p3270_p2  ;;  %p3277_p7 = por %p3276_p12, %p3275_p11 }
  0x52   : > { %p3278_p0 = pnand %p3277_p7, %p3271_p10 }
  0x54   : > { %3281 = shalt.err (!%p3278_p0)
}
  0x55   : > { %3065 = dma.hbm_to_vmem [thread:$0]  (!%p3549_p6), %s3612_s14, 512, %s463_s15, %s3553_s22  }
  0x56   : > { %p5529_p8 = scmp.ne.s32.totalorder %s5528_s24, 0  ;;  %s3293_s18 = scalar_lea.vmem %s3617_s26, 1024 }
  0x57   : > { %p3294_p2 = scmp.ne.s32.totalorder %s3617_s26, %s3293_s18  ;;  %p3301_p1 = scmp.lt.s32.totalorder %s3617_s26, %s3617_s26 }
  0x58   : > { %p3284_p3 = pneg %p5529_p8  ;;  %p3302_p12 = scmp.lt.s32.totalorder %s3293_s18, %s3293_s18 }
  0x5a   : > { %p3296_p4 = pnand %p3294_p2, %p3284_p3  ;;  %p3303_p7 = por %p3302_p12, %p3301_p1 }
  0x5c   : > { %p3297_p13 = pneg %p3296_p4 }
  0x5e   : > { %p3304_p0 = pnand %p3303_p7, %p3297_p13 }
  0x60   : > { %3307 = shalt.err (!%p3304_p0)
}
  0x61   : > { %s3411_s11 = smov 512   ;;  %s3412_s29 = smov 32  }
  0x62   : > { %3058 = dma.hbm_to_vmem [thread:$0]  (!%p5529_p8), %s5433_s0, 1024, %s3617_s26, [#allocation3], %s3411_s11, %s3411_s11, %s3412_s29  }
  0x63   : > { %p5530_p6 = scmp.ne.s32.totalorder %s5526_s27, 0 }
  0x65   : > { %471 = sbr.rel (%p5530_p6) target bundleno = 2764 (0xacc), region = 72 }
  0x6a   : > { %p5531_p5 = scmp.eq.s32.totalorder %s3577_s13, 0 }
  0x6c   : > { %3377 = dma.done.wait (%p5531_p5), [#allocation3], 1024   ;;  %p5532_p9 = pmov %p5531_p5 }
  0x6d   : > { %s477_s15 = sand.u32 1, %s3577_s13   ;;  %s3664_s22 = sand.u32 1, %s3398_s30  }
  0x6e   : > { %3379 = vsyncadd (%p5532_p9), [#allocation3], 4294966272  ;;  %s3667_s24 = sshll.u32 %s3664_s22, 5  ;;  %s478_s26 = scalar_lea.sflag [#allocation6], %s477_s15 }
  0x6f   : > { %s481_s14 = scalar_lea.vmem [#allocation5], %s3667_s24  ;;  %p5533_p10 = scmp.ne.s32.totalorder %s5521_s17, 0 }
  0x71   : > { %3381 = dma.done.wait (%p5533_p10), %s478_s26, 1024  }
  0x72   : > { %3383 = vsyncadd (%p5533_p10), %s478_s26, 4294966272  ;;  %v3674_v0 = vld [vmem:[%s481_s14 + $0x10] sm:$0xff]  ;;  %v3676_v1 = vld [vmem:[%s481_s14] sm:$0xff]  ;;  %s3413_s27 = smov 111   ;;  %s3414_s17 = smov 113   ;;  %v5463_v4 = vmov 0   ;;  %v568_v6 = vlaneseq }
  0x73   : > { %797 = vrot.lane.b32.xlu1 %v3674_v0, %s3413_s27  ;;  %793 = vrot.lane.b32.xlu0 %v3676_v1, %s3413_s27  ;;  %v3682_v2 = vld [vmem:[%s481_s14 + $0x18] sm:$0xff]  ;;  %v3684_v3 = vld [vmem:[%s481_s14 + $0x8] sm:$0xff]  ;;  %s3415_s21 = smov 112   ;;  %s3416_s25 = smov 127   ;;  %v3760_v12 = vld [vmem:[#allocation2 + $0x20] ss:$0 sm:$0xff] }
  0x74   : > { %s3417_s23 = smov 15   ;;  %s3418_s1 = smov 1   ;;  %900 = vmatprep.mubr.bf16.mxu0 %v5463_v4  ;;  %941 = vmatprep.mubr.bf16.mxu1 %v5463_v4  ;;  %v558_v5 = vld [vmem:[%s5437_s4] sm:$0xff]  ;;  %v3753_v7 = vand.u32 127, %v568_v6  ;;  %v3756_v10 = vld [vmem:[#allocation2 + $0x28] ss:$0 sm:$0xff] }
  0x75   : > { %s3419_s28 = smov 17   ;;  %3121 = vset.pattern.permute.xlu0 %v5463_v4  ;;  %3122 = vset.pattern.permute.xlu1 %v5463_v4  ;;  %s3421_s18 = smov 16   ;;  %v3758_v11 = vld [vmem:[#allocation2 + $0x38] ss:$0 sm:$0xff]  ;;  %v3762_v13 = vld [vmem:[#allocation2 + $0x30] ss:$0 sm:$0xff] }
  0x76   : > { %vm801_vm0 = vcmp.lt.s32.totalorder %v3753_v7, 111  ;;  %vm855_vm1 = vcmask 1043456   ;;  %v3776_v30 = vshrl.u32 %v568_v6, 7  ;;  %v3782_v35 = vld [vmem:[#allocation2 + $0x18] sm:$0xff]  ;;  %v3784_v36 = vld [vmem:[#allocation2 + $0x8] sm:$0xff]  ;;  %v3788_v39 = vld [vmem:[#allocation2 + $0x10] sm:$0xff] }
  0x77   : > { %799 = vrot.lane.b32.xlu1 %v3682_v2, %s3413_s27  ;;  %795 = vrot.lane.b32.xlu0 %v3684_v3, %s3413_s27  ;;  %vm768_vm2 = vcmp.lt.s32.totalorder %v3753_v7, 112  ;;  %vm735_vm3 = vcmp.lt.s32.totalorder %v3753_v7, 113  ;;  %v3792_v40 = vld [vmem:[#allocation2] sm:$0xff]  ;;  %vm702_vm4 = vcmp.lt.s32.totalorder %v3753_v7, 127  ;;  %vm636_vm5 = vcmp.lt.s32.totalorder %v3753_v7, 15  ;;  %s4057_s14 = scalar_lea.vmem [#allocation7], %s3667_s24 }
  0x78   : > { %v775_v37 = vsub.s32 7, %v3776_v30  ;;  %v742_v38 = vsub.s32 6, %v3776_v30  ;;  %v709_v60 = vsub.s32 5, %v3776_v30  ;;  %vm669_vm6 = vcmp.lt.s32.totalorder %v3753_v7, 1  ;;  %s2796_s11 = scalar_lea.sflag [#allocation10], %s3664_s22  ;;  %p5616_p8 = scmp.ne.s32.totalorder %s5523_s20, 0 }
  0x79   : > { %vm570_vm7 = vcmp.lt.s32.totalorder %v3753_v7, 17  ;;  %vm603_vm8 = vcmp.lt.s32.totalorder %v3753_v7, 16  ;;  %vm851_vm9 = vcmask 588800   ;;  %vm2684_vm10 = vcmask 64512   ;;  %s3422_s16 = smov [#allocation9]  }
  0x7a   : > { %v3795_v41 = vrot.slane %v3782_v35, %v742_v38  ;;  %v3798_v42 = vrot.slane %v3784_v36, %v742_v38  ;;  %v3805_v47 = vrot.slane %v3788_v39, %v742_v38  ;;  %v3808_v48 = vrot.slane %v3792_v40, %v775_v37 }
  0x7b   : > { %729 = vrot.lane.b32.xlu1 %v3684_v3, %s3414_s17  ;;  %727 = vrot.lane.b32.xlu0 %v3676_v1, %s3414_s17  ;;  %v3813_v50 = vrot.slane %v3782_v35, %v775_v37  ;;  %v3816_v51 = vrot.slane %v3784_v36, %v775_v37  ;;  %v3819_v52 = vrot.slane %v3788_v39, %v775_v37 }
  0x7c   : > { %5534 = vst [vmem:[#allocation21_spill] sm:$0xff] %v3798_v42  ;;  %5535 = vst [vmem:[#allocation22_spill] sm:$0xff] %v3808_v48  ;;  %v3822_v53 = vrot.slane %v3792_v40, %v742_v38 }
  0x7d   : > { %5536 = vst [vmem:[#allocation23_spill] sm:$0xff] %v3816_v51 }
  0x7e   : > { %5537 = vst [vmem:[#allocation24_spill] sm:$0xff] %v3822_v53 }
  0x7f   : > { %733 = vrot.lane.b32.xlu1 %v3682_v2, %s3414_s17  ;;  %731 = vrot.lane.b32.xlu0 %v3674_v0, %s3414_s17 }
  0x83   : > { %762 = vrot.lane.b32.xlu1 %v3684_v3, %s3415_s21  ;;  %760 = vrot.lane.b32.xlu0 %v3676_v1, %s3415_s21 }
  0x87   : > { %766 = vrot.lane.b32.xlu1 %v3682_v2, %s3415_s21  ;;  %764 = vrot.lane.b32.xlu0 %v3674_v0, %s3415_s21 }
  0x8b   : > { %696 = vrot.lane.b32.xlu1 %v3684_v3, %s3416_s25  ;;  %694 = vrot.lane.b32.xlu0 %v3676_v1, %s3416_s25 }
  0x8f   : > { %700 = vrot.lane.b32.xlu1 %v3682_v2, %s3416_s25  ;;  %698 = vrot.lane.b32.xlu0 %v3674_v0, %s3416_s25 }
  0x93   : > { %630 = vrot.lane.b32.xlu1 %v3684_v3, %s3417_s23  ;;  %628 = vrot.lane.b32.xlu0 %v3676_v1, %s3417_s23 }
  0x97   : > { %634 = vrot.lane.b32.xlu1 %v3682_v2, %s3417_s23  ;;  %632 = vrot.lane.b32.xlu0 %v3674_v0, %s3417_s23 }
  0x9b   : > { %663 = vrot.lane.b32.xlu1 %v3684_v3, %s3418_s1  ;;  %661 = vrot.lane.b32.xlu0 %v3676_v1, %s3418_s1 }
  0x9f   : > { %667 = vrot.lane.b32.xlu1 %v3682_v2, %s3418_s1  ;;  %665 = vrot.lane.b32.xlu0 %v3674_v0, %s3418_s1 }
  0xa3   : > { %562 = vrot.lane.b32.xlu1 %v3684_v3, %s3419_s28  ;;  %560 = vrot.lane.b32.xlu0 %v3676_v1, %s3419_s28 }
  0xa7   : > { %566 = vrot.lane.b32.xlu1 %v3682_v2, %s3419_s28  ;;  %564 = vrot.lane.b32.xlu0 %v3674_v0, %s3419_s28 }
  0xab   : > { %597 = vrot.lane.b32.xlu1 %v3684_v3, %s3421_s18  ;;  %595 = vrot.lane.b32.xlu0 %v3676_v1, %s3421_s18 }
  0xaf   : > { %601 = vrot.lane.b32.xlu1 %v3682_v2, %s3421_s18  ;;  %599 = vrot.lane.b32.xlu0 %v3674_v0, %s3421_s18 }
  0xb3   : > { %848 = vperm.xlu0 %3121, %v558_v5  }
  0xe5   : > { %v798_v8 = vpop.permute.xlu1 %797  ;;  %v794_v9 = vpop.permute.xlu0 %793 }
  0xe9   : > { %v800_v14 = vpop.permute.xlu1 %799  ;;  %v796_v15 = vpop.permute.xlu0 %795 }
  0xea   : > { %v802_v16 = vsel %vm801_vm0, %v798_v8, %v800_v14  ;;  %v804_v17 = vsel %vm801_vm0, %v794_v9, %v796_v15  ;;  %v803_v18 = vsel %vm801_vm0, %v796_v15, %v798_v8  ;;  %v805_v19 = vsel %vm801_vm0, %v800_v14, %v794_v9 }
  0xeb   : > { %v823_v20 = vmul.f32 %v3756_v10, %v803_v18  ;;  %v825_v21 = vmul.f32 %v3758_v11, %v805_v19  ;;  %v822_v22 = vmul.f32 %v3760_v12, %v804_v17  ;;  %v824_v23 = vmul.f32 %v3762_v13, %v802_v16 }
  0xed   : > { %v730_v24 = vpop.permute.xlu1 %729  ;;  %v728_v25 = vpop.permute.xlu0 %727  ;;  %v843_v26 = vpack.c.bf16 %v823_v20, %v823_v20  ;;  %v845_v27 = vpack.c.bf16 %v825_v21, %v825_v21  ;;  %v842_v28 = vpack.c.bf16 %v822_v22, %v822_v22  ;;  %v844_v29 = vpack.c.bf16 %v824_v23, %v824_v23 }
  0xee   : > { %v738_v55 = vsel %vm735_vm3, %v728_v25, %v730_v24  ;;  %v3845_v21 = vrot.slane %v3792_v40, %v709_v60  ;;  %v3848_v23 = vrot.slane %v3782_v35, %v709_v60 }
  0xef   : > { %2978 = vmatprep.subr.msk.bf16.mxu0 %vm855_vm1, %v843_v26  ;;  %2980 = vmatprep.subr.msk.bf16.mxu1 %vm855_vm1, %v845_v27  ;;  %v857_v31 = vsel %vm855_vm1, %v842_v28, 0  ;;  %v863_v32 = vsel %vm855_vm1, %v844_v29, 0  ;;  %v756_v15 = vmul.f32 %v3822_v53, %v738_v55  ;;  %v3856_v26 = vrot.slane %v3788_v39, %v709_v60 }
  0xf0   : > { %875 = vmatpush1.bf16.msra.mxu0 %v857_v31  ;;  %916 = vmatpush1.bf16.msra.mxu1 %v863_v32  ;;  %v643_v55 = vsub.s32 2, %v3776_v30 }
  0xf1   : > { %v734_v33 = vpop.permute.xlu1 %733  ;;  %v732_v34 = vpop.permute.xlu0 %731 }
  0xf2   : > { %v739_v45 = vsel %vm735_vm3, %v734_v33, %v728_v25  ;;  %v737_v46 = vsel %vm735_vm3, %v730_v24, %v732_v34  ;;  %v736_v54 = vsel %vm735_vm3, %v732_v34, %v734_v33  ;;  %v3853_v25 = vrot.slane %v3784_v36, %v709_v60 }
  0xf3   : > { %v759_v56 = vmul.f32 %v3795_v41, %v739_v45  ;;  %v757_v57 = vmul.f32 %v3798_v42, %v737_v46  ;;  %v758_v6 = vmul.f32 %v3805_v47, %v736_v54  ;;  %v3891_v60 = vrot.slane %v3782_v35, %v643_v55 }
  0xf5   : > { %v763_v43 = vpop.permute.xlu1 %762  ;;  %v761_v44 = vpop.permute.xlu0 %760 }
  0xf6   : > { %v771_v49 = vsel %vm768_vm2, %v761_v44, %v763_v43 }
  0xf7   : > { %v789_v61 = vmul.f32 %v3808_v48, %v771_v49 }
  0xf9   : > { %v767_v58 = vpop.permute.xlu1 %766  ;;  %v765_v59 = vpop.permute.xlu0 %764  ;;  %v838_v22 = vpack.c.bf16 %v789_v61, %v756_v15 }
  0xfa   : > { %v772_v62 = vsel %vm768_vm2, %v767_v58, %v761_v44  ;;  %v769_v63 = vsel %vm768_vm2, %v765_v59, %v767_v58  ;;  %v770_v5 = vsel %vm768_vm2, %v763_v43, %v765_v59  ;;  %v3888_v59 = vrot.slane %v3788_v39, %v643_v55 }
  0xfb   : > { %v792_v8 = vmul.f32 %v3813_v50, %v772_v62  ;;  %v790_v9 = vmul.f32 %v3816_v51, %v770_v5  ;;  %v791_v14 = vmul.f32 %v3819_v52, %v769_v63 }
  0xfd   : > { %v697_v16 = vpop.permute.xlu1 %696  ;;  %v695_v17 = vpop.permute.xlu0 %694  ;;  %v839_v18 = vpack.c.bf16 %v790_v9, %v757_v57  ;;  %v841_v19 = vpack.c.bf16 %v792_v8, %v759_v56  ;;  %v840_v20 = vpack.c.bf16 %v791_v14, %v758_v6  ;;  %v676_v56 = vsub.s32 3, %v3776_v30 }
  0xfe   : > { %v705_v24 = vsel %vm702_vm4, %v695_v17, %v697_v16 }
  0xff   : > { %876 = vmatprep.subr.bf16.mxu0 %v839_v18  ;;  %917 = vmatprep.subr.bf16.mxu1 %v841_v19  ;;  %v723_v29 = vmul.f32 %v3845_v21, %v705_v24  ;;  %v3898_v6 = vrot.slane %v3792_v40, %v676_v56  ;;  %v3901_v8 = vrot.slane %v3788_v39, %v676_v56 }
 0x100   : > { %877 = vmatpush1.bf16.msra.mxu0 %v838_v22  ;;  %918 = vmatpush1.bf16.msra.mxu1 %v840_v20 }
 0x101   : > { %v701_v27 = vpop.permute.xlu1 %700  ;;  %v699_v28 = vpop.permute.xlu0 %698  ;;  %v834_v54 = vpack.c.bf16 %v723_v29, %v3676_v1 }
 0x102   : > { %v706_v31 = vsel %vm702_vm4, %v701_v27, %v695_v17  ;;  %v703_v32 = vsel %vm702_vm4, %v699_v28, %v701_v27  ;;  %v704_v33 = vsel %vm702_vm4, %v697_v16, %v699_v28  ;;  %v3908_v16 = vrot.slane %v3782_v35, %v676_v56 }
 0x103   : > { %v726_v34 = vmul.f32 %v3848_v23, %v706_v31  ;;  %v724_v37 = vmul.f32 %v3853_v25, %v704_v33  ;;  %v725_v38 = vmul.f32 %v3856_v26, %v703_v32 }
 0x105   : > { %v631_v43 = vpop.permute.xlu1 %630  ;;  %v629_v44 = vpop.permute.xlu0 %628  ;;  %v835_v45 = vpack.c.bf16 %v724_v37, %v3684_v3  ;;  %v837_v46 = vpack.c.bf16 %v726_v34, %v3682_v2  ;;  %v836_v49 = vpack.c.bf16 %v725_v38, %v3674_v0  ;;  %v3877_v2 = vrot.slane %v3784_v36, %v643_v55 }
 0x106   : > { %v3880_v0 = vrot.slane %v3784_v36, %v676_v56  ;;  %v639_v1 = vsel %vm636_vm5, %v629_v44, %v631_v43  ;;  %v3885_v3 = vrot.slane %v3792_v40, %v643_v55 }
 0x107   : > { %878 = vmatprep.subr.bf16.mxu0 %v835_v45  ;;  %919 = vmatprep.subr.bf16.mxu1 %v837_v46  ;;  %v658_v9 = vmul.f32 %v3877_v2, %v639_v1  ;;  %v577_v46 = vsub.s32 0, %v3776_v30 }
 0x108   : > { %879 = vmatpush1.bf16.msra.mxu0 %v834_v54  ;;  %920 = vmatpush1.bf16.msra.mxu1 %v836_v49  ;;  %v610_v49 = vsub.s32 1, %v3776_v30 }
 0x109   : > { %v635_v57 = vpop.permute.xlu1 %634  ;;  %v633_v58 = vpop.permute.xlu0 %632  ;;  %v3929_v56 = vrot.slane %v3784_v36, %v577_v46  ;;  %v3937_v1 = vrot.slane %v3792_v40, %v577_v46  ;;  %v3940_v30 = vrot.slane %v3788_v39, %v577_v46 }
 0x10a   : > { %v640_v63 = vsel %vm636_vm5, %v635_v57, %v629_v44  ;;  %v638_v14 = vsel %vm636_vm5, %v631_v43, %v633_v58  ;;  %v637_v17 = vsel %vm636_vm5, %v633_v58, %v635_v57  ;;  %v3932_v57 = vrot.slane %v3784_v36, %v610_v49 }
 0x10b   : > { %v657_v18 = vmul.f32 %v3885_v3, %v640_v63  ;;  %v659_v24 = vmul.f32 %v3888_v59, %v638_v14  ;;  %v660_v31 = vmul.f32 %v3891_v60, %v637_v17  ;;  %5538 = vst [vmem:[#allocation25_spill] sm:$0xff] %v3940_v30  ;;  %v3953_v14 = vrot.slane %v3788_v39, %v610_v49 }
 0x10d   : > { %v664_v61 = vpop.permute.xlu1 %663  ;;  %v662_v62 = vpop.permute.xlu0 %661 }
 0x10e   : > { %v672_v5 = vsel %vm669_vm6, %v662_v62, %v664_v61 }
 0x10f   : > { %v691_v15 = vmul.f32 %v3880_v0, %v672_v5 }
 0x111   : > { %v668_v19 = vpop.permute.xlu1 %667  ;;  %v666_v20 = vpop.permute.xlu0 %665  ;;  %v831_v22 = vpack.c.bf16 %v691_v15, %v658_v9  ;;  %v3950_v9 = vrot.slane %v3792_v40, %v610_v49 }
 0x112   : > { %v673_v27 = vsel %vm669_vm6, %v668_v19, %v662_v62  ;;  %v670_v28 = vsel %vm669_vm6, %v666_v20, %v668_v19  ;;  %v671_v29 = vsel %vm669_vm6, %v664_v61, %v666_v20  ;;  %v3943_v61 = vrot.slane %v3782_v35, %v577_v46 }
 0x113   : > { %v690_v32 = vmul.f32 %v3898_v6, %v673_v27  ;;  %v692_v33 = vmul.f32 %v3901_v8, %v671_v29  ;;  %v693_v34 = vmul.f32 %v3908_v16, %v670_v28  ;;  %880 = vmatprep.subr.bf16.mxu0 %v831_v22  ;;  %v3960_v19 = vrot.slane %v3782_v35, %v610_v49 }
 0x115   : > { %v563_v37 = vpop.permute.xlu1 %562  ;;  %v561_v38 = vpop.permute.xlu0 %560  ;;  %v830_v43 = vpack.c.bf16 %v690_v32, %v657_v18  ;;  %v833_v44 = vpack.c.bf16 %v693_v34, %v660_v31  ;;  %v832_v45 = vpack.c.bf16 %v692_v33, %v659_v24 }
 0x116   : > { %v573_v58 = vsel %vm570_vm7, %v561_v38, %v563_v37 }
 0x117   : > { %881 = vmatpush1.bf16.msra.mxu0 %v830_v43  ;;  %921 = vmatprep.subr.bf16.mxu1 %v833_v44  ;;  %v592_v15 = vmul.f32 %v3929_v56, %v573_v58  ;;  %v559_v44 = vld [vmem:[%s5436_s3] sm:$0xf] }
 0x118   : > { %922 = vmatpush1.bf16.msra.mxu1 %v832_v45 }
 0x119   : > { %v567_v54 = vpop.permute.xlu1 %566  ;;  %v565_v55 = vpop.permute.xlu0 %564 }
 0x11a   : > { %v574_v5 = vsel %vm570_vm7, %v567_v54, %v561_v38  ;;  %v572_v17 = vsel %vm570_vm7, %v563_v37, %v565_v55  ;;  %v571_v20 = vsel %vm570_vm7, %v565_v55, %v567_v54 }
 0x11b   : > { %v591_v22 = vmul.f32 %v3937_v1, %v574_v5  ;;  %v593_v39 = vmul.f32 %v3940_v30, %v572_v17  ;;  %v594_v31 = vmul.f32 %v3943_v61, %v571_v20 }
 0x11d   : > { %v598_v62 = vpop.permute.xlu1 %597  ;;  %v596_v63 = vpop.permute.xlu0 %595 }
 0x11e   : > { %v606_v36 = vsel %vm603_vm8, %v596_v63, %v598_v62 }
 0x11f   : > { %v625_v18 = vmul.f32 %v3932_v57, %v606_v36 }
 0x121   : > { %v602_v40 = vpop.permute.xlu1 %601  ;;  %v600_v24 = vpop.permute.xlu0 %599  ;;  %v827_v27 = vpack.c.bf16 %v625_v18, %v592_v15 }
 0x122   : > { %v607_v28 = vsel %vm603_vm8, %v602_v40, %v596_v63  ;;  %v604_v29 = vsel %vm603_vm8, %v600_v24, %v602_v40  ;;  %v605_v35 = vsel %vm603_vm8, %v598_v62, %v600_v24 }
 0x123   : > { %v624_v32 = vmul.f32 %v3950_v9, %v607_v28  ;;  %v626_v33 = vmul.f32 %v3953_v14, %v605_v35  ;;  %v627_v34 = vmul.f32 %v3960_v19, %v604_v29  ;;  %882 = vmatprep.subr.bf16.mxu0 %v827_v27  ;;  %v954_v27 = vld [vmem:[%s5439_s6] sm:$0xff]  ;;  %v4070_v29 = vld [vmem:[%s4057_s14 + $0x18] sm:$0xff]  ;;  %v4075_v35 = vld [vmem:[%s4057_s14 + $0x10] sm:$0xff] }
 0x124   : > { %v4065_v28 = vld [vmem:[%s4057_s14] sm:$0xff]  ;;  %5541 = vst [vmem:[#allocation28_spill] sm:$0xff] %v4070_v29  ;;  %5542 = vst [vmem:[#allocation29_spill] sm:$0xff] %v4075_v35 }
 0x125   : > { %v826_v37 = vpack.c.bf16 %v624_v32, %v591_v22  ;;  %v829_v38 = vpack.c.bf16 %v627_v34, %v594_v31  ;;  %v828_v43 = vpack.c.bf16 %v626_v33, %v593_v39  ;;  %v4060_v39 = vld [vmem:[%s4057_s14 + $0x8] sm:$0xff]  ;;  %5540 = vst [vmem:[#allocation27_spill] sm:$0xff] %v4065_v28 }
 0x126   : > { %5539 = vst [vmem:[#allocation26_spill] sm:$0xff] %v4060_v39 }
 0x127   : > { %883 = vmatpush1.bf16.msra.mxu0 %v826_v37  ;;  %923 = vmatprep.subr.bf16.mxu1 %v829_v38 }
 0x128   : > { %924 = vmatpush1.bf16.msra.mxu1 %v828_v43 }
 0x12a   : > { %2979 = vmatmul.mubr.msk.bf16.vlgmr.msra.gmra.mxu0 %vm851_vm9, %v559_v44 }
 0x12b   : > { %2981 = vmatmul.mubr.msk.bf16.vlgmr.msra.gmra.mxu1 %vm851_vm9, %v559_v44  ;;  %1156 = vmatprep.mubr.bf16.mxu0 %v5463_v4 }
 0x12c   : > { %1197 = vmatprep.mubr.bf16.mxu1 %v5463_v4 }
 0x12e   : > { %v849_v45 = vpop.permute.xlu0 %848 }
 0x1ea   : > { %v902_v46 = vpop.f32.mrf.mxu0 }
 0x1eb   : > { %v903_v49 = vadd.f32 %v902_v46, %v849_v45  ;;  %v943_v54 = vpop.f32.mrf.mxu1 }
 0x1ec   : > { %v944_v55 = vadd.f32 %v943_v54, %v849_v45  ;;  %v904_v58 = vpop.f32.mrf.mxu0 }
 0x1ed   : > { %v3983_v62 = vmax.f32 %v903_v49, 0.0  ;;  %v905_v63 = vadd.f32 %v904_v58, %v849_v45  ;;  %v945_v5 = vpop.f32.mrf.mxu1 }
 0x1ee   : > { %v3985_v36 = vmax.f32 %v944_v55, 0.0  ;;  %v906_v15 = vpop.f32.mrf.mxu0  ;;  %v946_v22 = vadd.f32 %v945_v5, %v849_v45 }
 0x1ef   : > { %v947_v17 = vpop.f32.mrf.mxu1  ;;  %1068 = vrot.lane.b32.xlu1 %v3983_v62, %s3413_s27  ;;  %v3991_v20 = vmax.f32 %v905_v63, 0.0 }
 0x1f0   : > { %1072 = vrot.lane.b32.xlu0 %v3985_v36, %s3413_s27  ;;  %v907_v18 = vpop.f32.mrf.mxu0  ;;  %v3997_v24 = vmax.f32 %v946_v22, 0.0 }
 0x1f1   : > { %v948_v40 = vpop.f32.mrf.mxu1 }
 0x1f3   : > { %1070 = vrot.lane.b32.xlu1 %v3991_v20, %s3413_s27 }
 0x1f4   : > { %1036 = vrot.lane.b32.xlu0 %v3983_v62, %s3414_s17 }
 0x1f7   : > { %1074 = vrot.lane.b32.xlu1 %v3997_v24, %s3413_s27 }
 0x1f8   : > { %1040 = vrot.lane.b32.xlu0 %v3985_v36, %s3414_s17 }
 0x1fb   : > { %1038 = vrot.lane.b32.xlu1 %v3991_v20, %s3414_s17 }
 0x1fc   : > { %1052 = vrot.lane.b32.xlu0 %v3983_v62, %s3415_s21 }
 0x1ff   : > { %1042 = vrot.lane.b32.xlu1 %v3997_v24, %s3414_s17 }
 0x200   : > { %1056 = vrot.lane.b32.xlu0 %v3985_v36, %s3415_s21 }
 0x203   : > { %1054 = vrot.lane.b32.xlu1 %v3991_v20, %s3415_s21 }
 0x204   : > { %1020 = vrot.lane.b32.xlu0 %v3983_v62, %s3416_s25 }
 0x207   : > { %1058 = vrot.lane.b32.xlu1 %v3997_v24, %s3415_s21 }
 0x208   : > { %1024 = vrot.lane.b32.xlu0 %v3985_v36, %s3416_s25 }
 0x20b   : > { %1022 = vrot.lane.b32.xlu1 %v3991_v20, %s3416_s25 }
 0x20c   : > { %988 = vrot.lane.b32.xlu0 %v3983_v62, %s3417_s23 }
 0x20f   : > { %1026 = vrot.lane.b32.xlu1 %v3997_v24, %s3416_s25 }
 0x210   : > { %992 = vrot.lane.b32.xlu0 %v3985_v36, %s3417_s23 }
 0x213   : > { %990 = vrot.lane.b32.xlu1 %v3991_v20, %s3417_s23 }
 0x214   : > { %1004 = vrot.lane.b32.xlu0 %v3983_v62, %s3418_s1 }
 0x217   : > { %994 = vrot.lane.b32.xlu1 %v3997_v24, %s3417_s23 }
 0x218   : > { %1008 = vrot.lane.b32.xlu0 %v3985_v36, %s3418_s1 }
 0x21b   : > { %1006 = vrot.lane.b32.xlu1 %v3991_v20, %s3418_s1 }
 0x21c   : > { %956 = vrot.lane.b32.xlu0 %v3983_v62, %s3419_s28 }
 0x21f   : > { %1010 = vrot.lane.b32.xlu1 %v3997_v24, %s3418_s1 }
 0x220   : > { %960 = vrot.lane.b32.xlu0 %v3985_v36, %s3419_s28 }
 0x223   : > { %958 = vrot.lane.b32.xlu1 %v3991_v20, %s3419_s28 }
 0x224   : > { %972 = vrot.lane.b32.xlu0 %v3983_v62, %s3421_s18 }
 0x227   : > { %962 = vrot.lane.b32.xlu1 %v3997_v24, %s3419_s28 }
 0x228   : > { %976 = vrot.lane.b32.xlu0 %v3985_v36, %s3421_s18 }
 0x22b   : > { %974 = vrot.lane.b32.xlu1 %v3991_v20, %s3421_s18 }
 0x22c   : > { %1106 = vperm.xlu0 %3121, %v954_v27  }
 0x22f   : > { %978 = vrot.lane.b32.xlu1 %v3997_v24, %s3421_s18 }
 0x230   : > { %1627 = vrot.lane.b32.xlu0 %v4060_v39, %s3413_s27 }
 0x233   : > { %1625 = vrot.lane.b32.xlu1 %v4065_v28, %s3413_s27 }
 0x234   : > { %1631 = vrot.lane.b32.xlu0 %v4070_v29, %s3413_s27 }
 0x237   : > { %1629 = vrot.lane.b32.xlu1 %v4075_v35, %s3413_s27 }
 0x238   : > { %1595 = vrot.lane.b32.xlu0 %v4060_v39, %s3414_s17 }
 0x23b   : > { %1593 = vrot.lane.b32.xlu1 %v4065_v28, %s3414_s17 }
 0x23c   : > { %1599 = vrot.lane.b32.xlu0 %v4070_v29, %s3414_s17 }
 0x23f   : > { %1597 = vrot.lane.b32.xlu1 %v4075_v35, %s3414_s17 }
 0x240   : > { %1611 = vrot.lane.b32.xlu0 %v4060_v39, %s3415_s21 }
 0x243   : > { %1609 = vrot.lane.b32.xlu1 %v4065_v28, %s3415_s21 }
 0x244   : > { %1615 = vrot.lane.b32.xlu0 %v4070_v29, %s3415_s21 }
 0x247   : > { %1613 = vrot.lane.b32.xlu1 %v4075_v35, %s3415_s21 }
 0x248   : > { %1579 = vrot.lane.b32.xlu0 %v4060_v39, %s3416_s25 }
 0x24b   : > { %1577 = vrot.lane.b32.xlu1 %v4065_v28, %s3416_s25 }
 0x24c   : > { %1583 = vrot.lane.b32.xlu0 %v4070_v29, %s3416_s25 }
 0x24f   : > { %1581 = vrot.lane.b32.xlu1 %v4075_v35, %s3416_s25 }
 0x250   : > { %1547 = vrot.lane.b32.xlu0 %v4060_v39, %s3417_s23 }
 0x253   : > { %1545 = vrot.lane.b32.xlu1 %v4065_v28, %s3417_s23 }
 0x254   : > { %1551 = vrot.lane.b32.xlu0 %v4070_v29, %s3417_s23 }
 0x257   : > { %1549 = vrot.lane.b32.xlu1 %v4075_v35, %s3417_s23 }
 0x258   : > { %1563 = vrot.lane.b32.xlu0 %v4060_v39, %s3418_s1 }
 0x25b   : > { %1561 = vrot.lane.b32.xlu1 %v4065_v28, %s3418_s1 }
 0x261   : > { %v1069_v31 = vpop.permute.xlu1 %1068 }
 0x262   : > { %v1073_v32 = vpop.permute.xlu0 %1072 }
 0x265   : > { %v1071_v33 = vpop.permute.xlu1 %1070 }
 0x266   : > { %v1077_v34 = vsel %vm801_vm0, %v1071_v33, %v1073_v32  ;;  %v1078_v37 = vsel %vm801_vm0, %v1069_v31, %v1071_v33  ;;  %v1037_v38 = vpop.permute.xlu0 %1036 }
 0x267   : > { %v1080_v43 = vmul.f32 %v3760_v12, %v1078_v37  ;;  %v1081_v44 = vmul.f32 %v3756_v10, %v1077_v34 }
 0x269   : > { %v1100_v45 = vpack.c.bf16 %v1080_v43, %v1080_v43  ;;  %v1101_v46 = vpack.c.bf16 %v1081_v44, %v1081_v44  ;;  %v1075_v49 = vpop.permute.xlu1 %1074 }
 0x26a   : > { %v1076_v54 = vsel %vm801_vm0, %v1073_v32, %v1075_v49  ;;  %v1079_v55 = vsel %vm801_vm0, %v1075_v49, %v1069_v31  ;;  %v1041_v58 = vpop.permute.xlu0 %1040 }
 0x26b   : > { %v1082_v63 = vmul.f32 %v3762_v13, %v1076_v54  ;;  %v1083_v5 = vmul.f32 %v3758_v11, %v1079_v55  ;;  %2982 = vmatprep.subr.msk.bf16.mxu0 %vm855_vm1, %v1101_v46  ;;  %v1113_v15 = vsel %vm855_vm1, %v1100_v45, 0 }
 0x26c   : > { %1131 = vmatpush1.bf16.msra.mxu0 %v1113_v15 }
 0x26d   : > { %v1102_v17 = vpack.c.bf16 %v1082_v63, %v1082_v63  ;;  %v1103_v18 = vpack.c.bf16 %v1083_v5, %v1083_v5  ;;  %v1039_v22 = vpop.permute.xlu1 %1038 }
 0x26e   : > { %v1053_v40 = vpop.permute.xlu0 %1052  ;;  %v1045_v33 = vsel %vm735_vm3, %v1039_v22, %v1041_v58  ;;  %v1046_v34 = vsel %vm735_vm3, %v1037_v38, %v1039_v22 }
 0x26f   : > { %2984 = vmatprep.subr.msk.bf16.mxu1 %vm855_vm1, %v1103_v18  ;;  %v1119_v27 = vsel %vm855_vm1, %v1102_v17, 0  ;;  %v1048_v46 = vmul.f32 %v1046_v34, %v3822_v53  ;;  %v1049_v49 = vmul.f32 %v1045_v33, %v3798_v42 }
 0x270   : > { %1172 = vmatpush1.bf16.msra.mxu1 %v1119_v27 }
 0x271   : > { %v1043_v31 = vpop.permute.xlu1 %1042 }
 0x272   : > { %v1057_v32 = vpop.permute.xlu0 %1056  ;;  %v1044_v63 = vsel %vm735_vm3, %v1041_v58, %v1043_v31  ;;  %v1047_v5 = vsel %vm735_vm3, %v1043_v31, %v1037_v38 }
 0x273   : > { %v1050_v34 = vmul.f32 %v1044_v63, %v3805_v47 }
 0x275   : > { %v1055_v37 = vpop.permute.xlu1 %1054 }
 0x276   : > { %v1061_v43 = vsel %vm768_vm2, %v1055_v37, %v1057_v32  ;;  %v1062_v44 = vsel %vm768_vm2, %v1053_v40, %v1055_v37  ;;  %v1021_v45 = vpop.permute.xlu0 %1020  ;;  %v1051_v37 = vmul.f32 %v1047_v5, %v3795_v41 }
 0x277   : > { %v1064_v54 = vmul.f32 %v1062_v44, %v3808_v48  ;;  %v1065_v55 = vmul.f32 %v1061_v43, %v3816_v51 }
 0x279   : > { %v1096_v15 = vpack.c.bf16 %v1064_v54, %v1048_v46  ;;  %v1059_v17 = vpop.permute.xlu1 %1058  ;;  %v1097_v18 = vpack.c.bf16 %v1065_v55, %v1049_v49 }
 0x27a   : > { %v1060_v22 = vsel %vm768_vm2, %v1057_v32, %v1059_v17  ;;  %v1063_v27 = vsel %vm768_vm2, %v1059_v17, %v1053_v40  ;;  %v1025_v33 = vpop.permute.xlu0 %1024 }
 0x27b   : > { %v1066_v43 = vmul.f32 %v1060_v22, %v3819_v52  ;;  %v1067_v58 = vmul.f32 %v1063_v27, %v3813_v50  ;;  %1132 = vmatprep.subr.bf16.mxu0 %v1097_v18 }
 0x27c   : > { %1133 = vmatpush1.bf16.msra.mxu0 %v1096_v15 }
 0x27d   : > { %v1098_v38 = vpack.c.bf16 %v1066_v43, %v1050_v34  ;;  %v1023_v31 = vpop.permute.xlu1 %1022  ;;  %v1099_v44 = vpack.c.bf16 %v1067_v58, %v1051_v37 }
 0x27e   : > { %v1029_v32 = vsel %vm702_vm4, %v1023_v31, %v1025_v33  ;;  %v1030_v40 = vsel %vm702_vm4, %v1021_v45, %v1023_v31  ;;  %v989_v46 = vpop.permute.xlu0 %988 }
 0x27f   : > { %v1032_v49 = vmul.f32 %v1030_v40, %v3845_v21  ;;  %v1033_v54 = vmul.f32 %v1029_v32, %v3853_v25  ;;  %1173 = vmatprep.subr.bf16.mxu1 %v1099_v44 }
 0x280   : > { %1174 = vmatpush1.bf16.msra.mxu1 %v1098_v38 }
 0x281   : > { %v1092_v55 = vpack.c.bf16 %v1032_v49, %v3983_v62  ;;  %v1027_v63 = vpop.permute.xlu1 %1026  ;;  %v1093_v5 = vpack.c.bf16 %v1033_v54, %v3991_v20 }
 0x282   : > { %v1028_v15 = vsel %vm702_vm4, %v1025_v33, %v1027_v63  ;;  %v1031_v17 = vsel %vm702_vm4, %v1027_v63, %v1021_v45  ;;  %v993_v18 = vpop.permute.xlu0 %992 }
 0x283   : > { %v1034_v22 = vmul.f32 %v1028_v15, %v3856_v26  ;;  %v1035_v27 = vmul.f32 %v1031_v17, %v3848_v23  ;;  %1134 = vmatprep.subr.bf16.mxu0 %v1093_v5 }
 0x284   : > { %1135 = vmatpush1.bf16.msra.mxu0 %v1092_v55 }
 0x285   : > { %v1094_v34 = vpack.c.bf16 %v1034_v22, %v3985_v36  ;;  %v991_v37 = vpop.permute.xlu1 %990  ;;  %v1095_v62 = vpack.c.bf16 %v1035_v27, %v3997_v24 }
 0x286   : > { %v1005_v43 = vpop.permute.xlu0 %1004  ;;  %v998_v45 = vsel %vm636_vm5, %v989_v46, %v991_v37  ;;  %v997_v49 = vsel %vm636_vm5, %v991_v37, %v993_v18 }
 0x287   : > { %1175 = vmatprep.subr.bf16.mxu1 %v1095_v62  ;;  %v1001_v44 = vmul.f32 %v998_v45, %v3877_v2 }
 0x288   : > { %1176 = vmatpush1.bf16.msra.mxu1 %v1094_v34 }
 0x289   : > { %v995_v20 = vpop.permute.xlu1 %994 }
 0x28a   : > { %v1009_v33 = vpop.permute.xlu0 %1008  ;;  %v996_v32 = vsel %vm636_vm5, %v993_v18, %v995_v20  ;;  %v999_v40 = vsel %vm636_vm5, %v995_v20, %v989_v46  ;;  %v1002_v18 = vmul.f32 %v997_v49, %v3888_v59 }
 0x28b   : > { %v1000_v22 = vmul.f32 %v999_v40, %v3885_v3  ;;  %v1003_v27 = vmul.f32 %v996_v32, %v3891_v60 }
 0x28d   : > { %v1007_v58 = vpop.permute.xlu1 %1006 }
 0x28e   : > { %v1014_v38 = vsel %vm669_vm6, %v1005_v43, %v1007_v58  ;;  %v957_v31 = vpop.permute.xlu0 %956  ;;  %v1013_v36 = vsel %vm669_vm6, %v1007_v58, %v1009_v33 }
 0x28f   : > { %v1017_v24 = vmul.f32 %v1014_v38, %v3880_v0  ;;  %v1018_v63 = vmul.f32 %v1013_v36, %v3901_v8 }
 0x291   : > { %v1011_v54 = vpop.permute.xlu1 %1010  ;;  %v1089_v55 = vpack.c.bf16 %v1017_v24, %v1001_v44  ;;  %v1090_v45 = vpack.c.bf16 %v1018_v63, %v1002_v18 }
 0x292   : > { %v1012_v5 = vsel %vm669_vm6, %v1009_v33, %v1011_v54  ;;  %v1015_v15 = vsel %vm669_vm6, %v1011_v54, %v1005_v43  ;;  %v961_v17 = vpop.permute.xlu0 %960 }
 0x293   : > { %v1016_v46 = vmul.f32 %v1015_v15, %v3898_v6  ;;  %v1019_v34 = vmul.f32 %v1012_v5, %v3908_v16  ;;  %1136 = vmatprep.subr.bf16.mxu0 %v1089_v55 }
 0x295   : > { %v1088_v37 = vpack.c.bf16 %v1016_v46, %v1000_v22  ;;  %v959_v62 = vpop.permute.xlu1 %958  ;;  %v1091_v20 = vpack.c.bf16 %v1019_v34, %v1003_v27 }
 0x296   : > { %v973_v33 = vpop.permute.xlu0 %972  ;;  %v966_v58 = vsel %vm570_vm7, %v957_v31, %v959_v62  ;;  %v965_v55 = vsel %vm570_vm7, %v959_v62, %v961_v17 }
 0x297   : > { %1137 = vmatpush1.bf16.msra.mxu0 %v1088_v37  ;;  %1177 = vmatprep.subr.bf16.mxu1 %v1091_v20  ;;  %v969_v24 = vmul.f32 %v966_v58, %v3929_v56 }
 0x298   : > { %1178 = vmatpush1.bf16.msra.mxu1 %v1090_v45  ;;  %v955_v45 = vld [vmem:[%s5438_s5] sm:$0xf] }
 0x299   : > { %v963_v43 = vpop.permute.xlu1 %962 }
 0x29a   : > { %v977_v44 = vpop.permute.xlu0 %976  ;;  %v964_v49 = vsel %vm570_vm7, %v961_v17, %v963_v43  ;;  %v967_v54 = vsel %vm570_vm7, %v963_v43, %v957_v31  ;;  %v970_v17 = vmul.f32 %v965_v55, %v3940_v30 }
 0x29b   : > { %v968_v46 = vmul.f32 %v967_v54, %v3937_v1  ;;  %v971_v34 = vmul.f32 %v964_v49, %v3943_v61 }
 0x29d   : > { %v975_v38 = vpop.permute.xlu1 %974 }
 0x29e   : > { %v982_v36 = vsel %vm603_vm8, %v973_v33, %v975_v38  ;;  %v981_v32 = vsel %vm603_vm8, %v975_v38, %v977_v44 }
 0x29f   : > { %v985_v40 = vmul.f32 %v982_v36, %v3932_v57  ;;  %v986_v15 = vmul.f32 %v981_v32, %v3953_v14 }
 0x2a1   : > { %v979_v63 = vpop.permute.xlu1 %978  ;;  %v1085_v5 = vpack.c.bf16 %v985_v40, %v969_v24  ;;  %v1086_v20 = vpack.c.bf16 %v986_v15, %v970_v17 }
 0x2a2   : > { %v980_v22 = vsel %vm603_vm8, %v977_v44, %v979_v63  ;;  %v983_v27 = vsel %vm603_vm8, %v979_v63, %v973_v33 }
 0x2a3   : > { %v984_v18 = vmul.f32 %v983_v27, %v3950_v9  ;;  %v987_v31 = vmul.f32 %v980_v22, %v3960_v19  ;;  %1138 = vmatprep.subr.bf16.mxu0 %v1085_v5 }
 0x2a5   : > { %v1084_v37 = vpack.c.bf16 %v984_v18, %v968_v46  ;;  %v1087_v62 = vpack.c.bf16 %v987_v31, %v971_v34  ;;  %v4290_v46 = vpop.permute.xlu1 %1625 }
 0x2a7   : > { %1139 = vmatpush1.bf16.msra.mxu0 %v1084_v37  ;;  %1179 = vmatprep.subr.bf16.mxu1 %v1087_v62  ;;  %v1107_v33 = vpop.permute.xlu0 %1106 }
 0x2a8   : > { %1180 = vmatpush1.bf16.msra.mxu1 %v1086_v20 }
 0x2a9   : > { %v4300_v18 = vpop.permute.xlu1 %1629 }
 0x2aa   : > { %2983 = vmatmul.mubr.msk.bf16.vlgmr.msra.gmra.mxu0 %vm851_vm9, %v955_v45 }
 0x2ab   : > { %2985 = vmatmul.mubr.msk.bf16.vlgmr.msra.gmra.mxu1 %vm851_vm9, %v955_v45  ;;  %1437 = vmatprep.mubr.bf16.mxu0 %v5463_v4  ;;  %v4292_v34 = vpop.permute.xlu0 %1627 }
 0x2ac   : > { %1488 = vmatprep.mubr.bf16.mxu1 %v5463_v4 }
 0x2ad   : > { %v4310_v17 = vpop.permute.xlu1 %1593 }
 0x2af   : > { %v4302_v31 = vpop.permute.xlu0 %1631 }
 0x2b1   : > { %v4320_v62 = vpop.permute.xlu1 %1597 }
 0x2b3   : > { %v4312_v37 = vpop.permute.xlu0 %1595 }
 0x2b5   : > { %v4330_v45 = vpop.permute.xlu1 %1609 }
 0x2b7   : > { %v4322_v20 = vpop.permute.xlu0 %1599 }
 0x36a   : > { %v1158_v43 = vpop.f32.mrf.mxu0 }
 0x36b   : > { %v1159_v58 = vadd.f32 %v1158_v43, %v1107_v33  ;;  %v1199_v38 = vpop.f32.mrf.mxu1  ;;  %v1211_v43 = vld [vmem:[%s5441_s8 + $0x8] sm:$0xff] }
 0x36c   : > { %v1160_v44 = vpop.f32.mrf.mxu0  ;;  %v1200_v24 = vadd.f32 %v1199_v38, %v1107_v33 }
 0x36d   : > { %v4228_v36 = vmax.f32 %v1159_v58, 0.0  ;;  %v1161_v32 = vadd.f32 %v1160_v44, %v1107_v33  ;;  %v1201_v40 = vpop.f32.mrf.mxu1  ;;  %v4341_v58 = vpop.permute.xlu1 %1613 }
 0x36e   : > { %v1162_v49 = vpop.f32.mrf.mxu0  ;;  %v1202_v55 = vadd.f32 %v1201_v40, %v1107_v33  ;;  %v4234_v15 = vmax.f32 %v1200_v24, 0.0  ;;  %v4332_v33 = vpop.permute.xlu0 %1611 }
 0x36f   : > { %v4230_v54 = vmax.f32 %v1161_v32, 0.0  ;;  %1328 = vrot.lane.b32.xlu1 %v4228_v36, %s3413_s27  ;;  %v1203_v63 = vpop.f32.mrf.mxu1 }
 0x370   : > { %v1163_v5 = vpop.f32.mrf.mxu0  ;;  %v4238_v27 = vmax.f32 %v1202_v55, 0.0 }
 0x371   : > { %1330 = vrot.lane.b32.xlu0 %v4230_v54, %s3413_s27  ;;  %v1204_v22 = vpop.f32.mrf.mxu1  ;;  %v4347_v44 = vpop.permute.xlu1 %1577 }
 0x372   : > { %v4345_v38 = vpop.permute.xlu0 %1615  ;;  %5543 = vst [vmem:[#allocation30_spill] sm:$0xff] %v4347_v44 }
 0x373   : > { %1332 = vrot.lane.b32.xlu1 %v4234_v15, %s3413_s27 }
 0x375   : > { %1334 = vrot.lane.b32.xlu0 %v4238_v27, %s3413_s27  ;;  %v4351_v32 = vpop.permute.xlu1 %1581 }
 0x376   : > { %v4349_v24 = vpop.permute.xlu0 %1579  ;;  %5545 = vst [vmem:[#allocation32_spill] sm:$0xff] %v4351_v32 }
 0x377   : > { %1296 = vrot.lane.b32.xlu1 %v4228_v36, %s3414_s17  ;;  %5544 = vst [vmem:[#allocation31_spill] sm:$0xff] %v4349_v24 }
 0x379   : > { %1298 = vrot.lane.b32.xlu0 %v4230_v54, %s3414_s17  ;;  %v4355_v49 = vpop.permute.xlu1 %1545 }
 0x37a   : > { %v4353_v40 = vpop.permute.xlu0 %1583  ;;  %5547 = vst [vmem:[#allocation34_spill] sm:$0xff] %v4355_v49 }
 0x37b   : > { %1300 = vrot.lane.b32.xlu1 %v4234_v15, %s3414_s17  ;;  %5546 = vst [vmem:[#allocation33_spill] sm:$0xff] %v4353_v40 }
 0x37d   : > { %1302 = vrot.lane.b32.xlu0 %v4238_v27, %s3414_s17  ;;  %v4359_v63 = vpop.permute.xlu1 %1549 }
 0x37e   : > { %v4357_v55 = vpop.permute.xlu0 %1547  ;;  %5549 = vst [vmem:[#allocation36_spill] sm:$0xff] %v4359_v63 }
 0x37f   : > { %1312 = vrot.lane.b32.xlu1 %v4228_v36, %s3415_s21  ;;  %5548 = vst [vmem:[#allocation35_spill] sm:$0xff] %v4357_v55 }
 0x381   : > { %1314 = vrot.lane.b32.xlu0 %v4230_v54, %s3415_s21  ;;  %v4363_v22 = vpop.permute.xlu1 %1561 }
 0x382   : > { %v4361_v5 = vpop.permute.xlu0 %1551  ;;  %5551 = vst [vmem:[#allocation38_spill] sm:$0xff] %v4363_v22 }
 0x383   : > { %1316 = vrot.lane.b32.xlu1 %v4234_v15, %s3415_s21  ;;  %5550 = vst [vmem:[#allocation37_spill] sm:$0xff] %v4361_v5 }
 0x385   : > { %1318 = vrot.lane.b32.xlu0 %v4238_v27, %s3415_s21 }
 0x386   : > { %v4365_v4 = vpop.permute.xlu0 %1563 }
 0x387   : > { %1280 = vrot.lane.b32.xlu1 %v4228_v36, %s3416_s25  ;;  %5552 = vst [vmem:[#allocation39_spill] sm:$0xff] %v4365_v4 }
 0x389   : > { %1282 = vrot.lane.b32.xlu0 %v4230_v54, %s3416_s25 }
 0x38b   : > { %1284 = vrot.lane.b32.xlu1 %v4234_v15, %s3416_s25 }
 0x38d   : > { %1286 = vrot.lane.b32.xlu0 %v4238_v27, %s3416_s25 }
 0x38f   : > { %1248 = vrot.lane.b32.xlu1 %v4228_v36, %s3417_s23 }
 0x391   : > { %1250 = vrot.lane.b32.xlu0 %v4230_v54, %s3417_s23 }
 0x393   : > { %1252 = vrot.lane.b32.xlu1 %v4234_v15, %s3417_s23 }
 0x395   : > { %1254 = vrot.lane.b32.xlu0 %v4238_v27, %s3417_s23 }
 0x397   : > { %1264 = vrot.lane.b32.xlu1 %v4228_v36, %s3418_s1 }
 0x399   : > { %1266 = vrot.lane.b32.xlu0 %v4230_v54, %s3418_s1 }
 0x39b   : > { %1268 = vrot.lane.b32.xlu1 %v4234_v15, %s3418_s1 }
 0x39d   : > { %1270 = vrot.lane.b32.xlu0 %v4238_v27, %s3418_s1 }
 0x39f   : > { %1216 = vrot.lane.b32.xlu1 %v4228_v36, %s3419_s28 }
 0x3a1   : > { %1218 = vrot.lane.b32.xlu0 %v4230_v54, %s3419_s28 }
 0x3a3   : > { %1220 = vrot.lane.b32.xlu1 %v4234_v15, %s3419_s28 }
 0x3a5   : > { %1222 = vrot.lane.b32.xlu0 %v4238_v27, %s3419_s28 }
 0x3a7   : > { %1232 = vrot.lane.b32.xlu1 %v4228_v36, %s3421_s18 }
 0x3a9   : > { %1234 = vrot.lane.b32.xlu0 %v4230_v54, %s3421_s18 }
 0x3ab   : > { %1236 = vrot.lane.b32.xlu1 %v4234_v15, %s3421_s18 }
 0x3ad   : > { %1238 = vrot.lane.b32.xlu0 %v4238_v27, %s3421_s18 }
 0x3af   : > { %1565 = vrot.lane.b32.xlu1 %v4075_v35, %s3418_s1 }
 0x3b1   : > { %1567 = vrot.lane.b32.xlu0 %v4070_v29, %s3418_s1 }
 0x3b3   : > { %1513 = vrot.lane.b32.xlu1 %v4065_v28, %s3419_s28 }
 0x3b5   : > { %1515 = vrot.lane.b32.xlu0 %v4060_v39, %s3419_s28 }
 0x3b7   : > { %1517 = vrot.lane.b32.xlu1 %v4075_v35, %s3419_s28 }
 0x3b9   : > { %1519 = vrot.lane.b32.xlu0 %v4070_v29, %s3419_s28 }
 0x3bb   : > { %1529 = vrot.lane.b32.xlu1 %v4065_v28, %s3421_s18 }
 0x3bd   : > { %1531 = vrot.lane.b32.xlu0 %v4060_v39, %s3421_s18 }
 0x3bf   : > { %1533 = vrot.lane.b32.xlu1 %v4075_v35, %s3421_s18 }
 0x3c1   : > { %1535 = vrot.lane.b32.xlu0 %v4070_v29, %s3421_s18 }
 0x3c3   : > { %1371 = vperm.xlu1 %3122, %v1211_v43  }
 0x3e1   : > { %v1329_v43 = vpop.permute.xlu1 %1328 }
 0x3e3   : > { %v1331_v35 = vpop.permute.xlu0 %1330 }
 0x3e4   : > { %v1338_v28 = vsel %vm801_vm0, %v1329_v43, %v1331_v35 }
 0x3e5   : > { %v1340_v29 = vmul.f32 %v3760_v12, %v1338_v28  ;;  %v1333_v39 = vpop.permute.xlu1 %1332 }
 0x3e6   : > { %v1337_v49 = vsel %vm801_vm0, %v1331_v35, %v1333_v39 }
 0x3e7   : > { %v1360_v55 = vpack.c.bf16 %v1340_v29, %v1340_v29  ;;  %v1341_v63 = vmul.f32 %v3756_v10, %v1337_v49  ;;  %v1335_v40 = vpop.permute.xlu0 %1334 }
 0x3e8   : > { %v1336_v5 = vsel %vm801_vm0, %v1333_v39, %v1335_v40  ;;  %v1339_v22 = vsel %vm801_vm0, %v1335_v40, %v1329_v43 }
 0x3e9   : > { %v1361_v4 = vpack.c.bf16 %v1341_v63, %v1341_v63  ;;  %v1342_v44 = vmul.f32 %v3762_v13, %v1336_v5  ;;  %v1343_v24 = vmul.f32 %v3758_v11, %v1339_v22  ;;  %v1297_v12 = vpop.permute.xlu1 %1296  ;;  %v1394_v10 = vsel %vm855_vm1, %v1360_v55, 0 }
 0x3eb   : > { %v1362_v28 = vpack.c.bf16 %v1342_v44, %v1342_v44  ;;  %v1363_v32 = vpack.c.bf16 %v1343_v24, %v1343_v24  ;;  %v1299_v30 = vpop.permute.xlu0 %1298  ;;  %2988 = vmatprep.subr.msk.bf16.mxu0 %vm855_vm1, %v1361_v4 }
 0x3ec   : > { %1412 = vmatpush1.bf16.msra.mxu0 %v1394_v10  ;;  %v1306_v4 = vsel %vm735_vm3, %v1297_v12, %v1299_v30 }
 0x3ed   : > { %2991 = vmatprep.subr.msk.bf16.mxu1 %vm855_vm1, %v1363_v32  ;;  %v1301_v39 = vpop.permute.xlu1 %1300  ;;  %v1400_v29 = vsel %vm855_vm1, %v1362_v28, 0  ;;  %v1308_v28 = vmul.f32 %v1306_v4, %v3822_v53 }
 0x3ee   : > { %1463 = vmatpush1.bf16.msra.mxu1 %v1400_v29  ;;  %v1305_v11 = vsel %vm735_vm3, %v1299_v30, %v1301_v39 }
 0x3ef   : > { %v1303_v35 = vpop.permute.xlu0 %1302  ;;  %v1309_v5 = vmul.f32 %v1305_v11, %v3798_v42 }
 0x3f0   : > { %v1304_v24 = vsel %vm735_vm3, %v1301_v39, %v1303_v35  ;;  %v1307_v49 = vsel %vm735_vm3, %v1303_v35, %v1297_v12 }
 0x3f1   : > { %v1313_v40 = vpop.permute.xlu1 %1312  ;;  %v1310_v30 = vmul.f32 %v1304_v24, %v3805_v47  ;;  %v1311_v39 = vmul.f32 %v1307_v49, %v3795_v41 }
 0x3f3   : > { %v1315_v13 = vpop.permute.xlu0 %1314 }
 0x3f4   : > { %v1322_v44 = vsel %vm768_vm2, %v1313_v40, %v1315_v13 }
 0x3f5   : > { %v1317_v32 = vpop.permute.xlu1 %1316  ;;  %v1324_v55 = vmul.f32 %v1322_v44, %v3808_v48 }
 0x3f6   : > { %v1321_v63 = vsel %vm768_vm2, %v1315_v13, %v1317_v32 }
 0x3f7   : > { %v1325_v22 = vmul.f32 %v1321_v63, %v3816_v51  ;;  %v1319_v43 = vpop.permute.xlu0 %1318  ;;  %v1356_v44 = vpack.c.bf16 %v1324_v55, %v1308_v28 }
 0x3f8   : > { %v1320_v10 = vsel %vm768_vm2, %v1317_v32, %v1319_v43  ;;  %v1323_v12 = vsel %vm768_vm2, %v1319_v43, %v1313_v40 }
 0x3f9   : > { %v1326_v29 = vmul.f32 %v1320_v10, %v3819_v52  ;;  %v1327_v35 = vmul.f32 %v1323_v12, %v3813_v50  ;;  %v1281_v13 = vpop.permute.xlu1 %1280  ;;  %v1357_v11 = vpack.c.bf16 %v1325_v22, %v1309_v5 }
 0x3fb   : > { %v1358_v63 = vpack.c.bf16 %v1326_v29, %v1310_v30  ;;  %v1283_v51 = vpop.permute.xlu0 %1282  ;;  %1413 = vmatprep.subr.bf16.mxu0 %v1357_v11  ;;  %v1359_v4 = vpack.c.bf16 %v1327_v35, %v1311_v39 }
 0x3fc   : > { %v1290_v24 = vsel %vm702_vm4, %v1281_v13, %v1283_v51  ;;  %1414 = vmatpush1.bf16.msra.mxu0 %v1356_v44 }
 0x3fd   : > { %1464 = vmatprep.subr.bf16.mxu1 %v1359_v4  ;;  %v1285_v32 = vpop.permute.xlu1 %1284  ;;  %v1292_v40 = vmul.f32 %v1290_v24, %v3845_v21 }
 0x3fe   : > { %v1289_v49 = vsel %vm702_vm4, %v1283_v51, %v1285_v32  ;;  %1465 = vmatpush1.bf16.msra.mxu1 %v1358_v63 }
 0x3ff   : > { %v1293_v43 = vmul.f32 %v1289_v49, %v3853_v25  ;;  %v1287_v5 = vpop.permute.xlu0 %1286  ;;  %v1352_v39 = vpack.c.bf16 %v1292_v40, %v4228_v36 }
 0x400   : > { %v1288_v55 = vsel %vm702_vm4, %v1285_v32, %v1287_v5  ;;  %v1291_v22 = vsel %vm702_vm4, %v1287_v5, %v1281_v13 }
 0x401   : > { %v1294_v28 = vmul.f32 %v1288_v55, %v3856_v26  ;;  %v1295_v30 = vmul.f32 %v1291_v22, %v3848_v23  ;;  %v1249_v10 = vpop.permute.xlu1 %1248  ;;  %v1353_v12 = vpack.c.bf16 %v1293_v43, %v4230_v54 }
 0x403   : > { %v1354_v51 = vpack.c.bf16 %v1294_v28, %v4234_v15  ;;  %v1251_v29 = vpop.permute.xlu0 %1250  ;;  %1415 = vmatprep.subr.bf16.mxu0 %v1353_v12  ;;  %v1355_v35 = vpack.c.bf16 %v1295_v30, %v4238_v27 }
 0x404   : > { %1416 = vmatpush1.bf16.msra.mxu0 %v1352_v39  ;;  %v1258_v63 = vsel %vm636_vm5, %v1249_v10, %v1251_v29 }
 0x405   : > { %1466 = vmatprep.subr.bf16.mxu1 %v1355_v35  ;;  %v1253_v11 = vpop.permute.xlu1 %1252  ;;  %v1261_v36 = vmul.f32 %v1258_v63, %v3877_v2 }
 0x406   : > { %1467 = vmatpush1.bf16.msra.mxu1 %v1354_v51  ;;  %v1257_v49 = vsel %vm636_vm5, %v1251_v29, %v1253_v11 }
 0x407   : > { %v1255_v13 = vpop.permute.xlu0 %1254  ;;  %v1262_v29 = vmul.f32 %v1257_v49, %v3888_v59 }
 0x408   : > { %v1256_v27 = vsel %vm636_vm5, %v1253_v11, %v1255_v13  ;;  %v1259_v32 = vsel %vm636_vm5, %v1255_v13, %v1249_v10 }
 0x409   : > { %v1265_v44 = vpop.permute.xlu1 %1264  ;;  %v1260_v30 = vmul.f32 %v1259_v32, %v3885_v3  ;;  %v1263_v10 = vmul.f32 %v1256_v27, %v3891_v60  ;;  %v4464_v32 = vld [vmem:[#allocation2 + $0x28] ss:$0 sm:$0xff] }
 0x40a   : > { %5554 = vst [vmem:[#allocation41_spill] sm:$0xff] %v4464_v32 }
 0x40b   : > { %v1267_v4 = vpop.permute.xlu0 %1266 }
 0x40c   : > { %v1274_v54 = vsel %vm669_vm6, %v1265_v44, %v1267_v4 }
 0x40d   : > { %v1277_v15 = vmul.f32 %v1274_v54, %v3880_v0  ;;  %v1269_v24 = vpop.permute.xlu1 %1268 }
 0x40e   : > { %v1273_v40 = vsel %vm669_vm6, %v1267_v4, %v1269_v24  ;;  %v1634_v4 = vsel %vm801_vm0, %v4292_v34, %v4300_v18 }
 0x40f   : > { %v1271_v43 = vpop.permute.xlu0 %1270  ;;  %v1349_v5 = vpack.c.bf16 %v1277_v15, %v1261_v36  ;;  %v1278_v55 = vmul.f32 %v1273_v40, %v3901_v8  ;;  %v1633_v36 = vsel %vm801_vm0, %v4300_v18, %v4302_v31  ;;  %v1638_v40 = vmul.f32 %v4464_v32, %v1634_v4 }
 0x410   : > { %v1272_v22 = vsel %vm669_vm6, %v1269_v24, %v1271_v43  ;;  %v1275_v28 = vsel %vm669_vm6, %v1271_v43, %v1265_v44  ;;  %v1635_v44 = vsel %vm801_vm0, %v4290_v46, %v4292_v34  ;;  %v4459_v24 = vld [vmem:[#allocation2 + $0x20] ss:$0 sm:$0xff]  ;;  %v4467_v34 = vld [vmem:[#allocation2 + $0x30] ss:$0 sm:$0xff]  ;;  %v1636_v18 = vsel %vm801_vm0, %v4302_v31, %v4290_v46 }
 0x411   : > { %v1276_v12 = vmul.f32 %v1275_v28, %v3898_v6  ;;  %v1279_v39 = vmul.f32 %v1272_v22, %v3908_v16  ;;  %1417 = vmatprep.subr.bf16.mxu0 %v1349_v5  ;;  %v1217_v51 = vpop.permute.xlu1 %1216  ;;  %v1350_v63 = vpack.c.bf16 %v1278_v55, %v1262_v29  ;;  %5553 = vst [vmem:[#allocation40_spill] sm:$0xff] %v4459_v24 }
 0x412   : > { %v4462_v27 = vmul.f32 %v4459_v24, %v1635_v44  ;;  %v4470_v49 = vmul.f32 %v4467_v34, %v1633_v36  ;;  %v1603_v55 = vsel %vm735_vm3, %v4310_v17, %v4312_v37  ;;  %v1602_v36 = vsel %vm735_vm3, %v4312_v37, %v4320_v62 }
 0x413   : > { %v1348_v35 = vpack.c.bf16 %v1276_v12, %v1260_v30  ;;  %v1219_v11 = vpop.permute.xlu0 %1218  ;;  %v1351_v13 = vpack.c.bf16 %v1279_v39, %v1263_v10  ;;  %v1658_v30 = vpack.c.bf16 %v1638_v40, %v1638_v40  ;;  %v4486_v12 = vld [vmem:[#allocation2 + $0x38] ss:$0 sm:$0xff] }
 0x414   : > { %v1226_v5 = vsel %vm570_vm7, %v1217_v51, %v1219_v11  ;;  %v1657_v28 = vpack.c.bf16 %v4462_v27, %v4462_v27  ;;  %5555 = vst [vmem:[#allocation42_spill] sm:$0xff] %v4486_v12  ;;  %v1640_v46 = vmul.f32 %v4486_v12, %v1636_v18  ;;  %v1619_v27 = vsel %vm768_vm2, %v4330_v45, %v4332_v33 }
 0x415   : > { %1418 = vmatpush1.bf16.msra.mxu0 %v1348_v35  ;;  %1468 = vmatprep.subr.bf16.mxu1 %v1351_v13  ;;  %v1221_v54 = vpop.permute.xlu1 %1220  ;;  %v1229_v39 = vmul.f32 %v1226_v5, %v3929_v56  ;;  %v4494_v13 = vmul.f32 %v1603_v55, %v3822_v53  ;;  %v5558_v53 = vld [vmem:[#allocation32_spill] sm:$0xff] }
 0x416   : > { %1469 = vmatpush1.bf16.msra.mxu1 %v1350_v63  ;;  %v1225_v40 = vsel %vm570_vm7, %v1219_v11, %v1221_v54 }
 0x417   : > { %v1223_v15 = vpop.permute.xlu0 %1222 }
 0x418   : > { %v1224_v63 = vsel %vm570_vm7, %v1221_v54, %v1223_v15  ;;  %v1227_v44 = vsel %vm570_vm7, %v1223_v15, %v1217_v51  ;;  %v1618_v51 = vsel %vm768_vm2, %v4332_v33, %v4341_v58  ;;  %v1601_v33 = vsel %vm735_vm3, %v4320_v62, %v4322_v20 }
 0x419   : > { %v1233_v43 = vpop.permute.xlu1 %1232 }
 0x41b   : > { %v1235_v22 = vpop.permute.xlu0 %1234 }
 0x41c   : > { %v1242_v10 = vsel %vm603_vm8, %v1233_v43, %v1235_v22 }
 0x41d   : > { %v1245_v29 = vmul.f32 %v1242_v10, %v3932_v57  ;;  %v1237_v35 = vpop.permute.xlu1 %1236  ;;  %v1231_v10 = vmul.f32 %v1224_v63, %v3943_v61 }
 0x41e   : > { %v1241_v4 = vsel %vm603_vm8, %v1235_v22, %v1237_v35  ;;  %v1228_v22 = vmul.f32 %v1227_v44, %v3937_v1  ;;  %v1621_v44 = vmul.f32 %v1619_v27, %v3808_v48  ;;  %v5559_v48 = vld [vmem:[#allocation31_spill] sm:$0xff] }
 0x41f   : > { %v1239_v18 = vpop.permute.xlu0 %1238  ;;  %v1345_v5 = vpack.c.bf16 %v1245_v29, %v1229_v39  ;;  %v1246_v15 = vmul.f32 %v1241_v4, %v3953_v14  ;;  %v1620_v29 = vsel %vm768_vm2, %v4345_v38, %v4330_v45  ;;  %v1617_v4 = vsel %vm768_vm2, %v4341_v58, %v4345_v38  ;;  %v3123_v45 = vld [vmem:[%s5440_s7] sm:$0xff]  }
 0x420   : > { %v1240_v37 = vsel %vm603_vm8, %v1237_v35, %v1239_v18  ;;  %v1243_v55 = vsel %vm603_vm8, %v1239_v18, %v1233_v43  ;;  %v1604_v43 = vsel %vm735_vm3, %v4322_v20, %v4310_v17  ;;  %v5556_v35 = vld [vmem:[#allocation25_spill] sm:$0xff]  ;;  %v1606_v17 = vmul.f32 %v1602_v36, %v3798_v42  ;;  %v5557_v20 = vld [vmem:[#allocation23_spill] sm:$0xff] }
 0x421   : > { %v1244_v11 = vmul.f32 %v1243_v55, %v3950_v9  ;;  %v1247_v54 = vmul.f32 %v1240_v37, %v3960_v19  ;;  %1419 = vmatprep.subr.bf16.mxu0 %v1345_v5  ;;  %v1566_v39 = vpop.permute.xlu1 %1565  ;;  %v1230_v63 = vmul.f32 %v1225_v40, %v5556_v35  ;;  %v1660_v37 = vpack.c.bf16 %v1640_v46, %v1640_v46 }
 0x422   : > { %v1622_v55 = vmul.f32 %v1618_v51, %v5557_v20  ;;  %v1608_v27 = vmul.f32 %v1604_v43, %v3795_v41  ;;  %v1624_v40 = vmul.f32 %v1620_v29, %v3813_v50  ;;  %v1586_v58 = vsel %vm702_vm4, %v5559_v48, %v5558_v53  ;;  %v5560_v51 = vld [vmem:[#allocation30_spill] sm:$0xff]  ;;  %v5562_v43 = vld [vmem:[#allocation35_spill] sm:$0xff] }
 0x423   : > { %v1344_v62 = vpack.c.bf16 %v1244_v11, %v1228_v22  ;;  %v1568_v18 = vpop.permute.xlu0 %1567  ;;  %v1347_v5 = vpack.c.bf16 %v1247_v54, %v1231_v10  ;;  %v1346_v31 = vpack.c.bf16 %v1246_v15, %v1230_v63  ;;  %v1607_v46 = vmul.f32 %v1601_v33, %v3805_v47  ;;  %v5561_v15 = vld [vmem:[#allocation33_spill] sm:$0xff] }
 0x424   : > { %v1623_v36 = vmul.f32 %v1617_v4, %v3819_v52  ;;  %v1588_v22 = vsel %vm702_vm4, %v5561_v15, %v5560_v51  ;;  %v1653_v10 = vpack.c.bf16 %v1621_v44, %v4494_v13  ;;  %v1587_v11 = vsel %vm702_vm4, %v5560_v51, %v5559_v48  ;;  %v5563_v13 = vld [vmem:[#allocation34_spill] sm:$0xff]  ;;  %v5564_v44 = vld [vmem:[#allocation39_spill] sm:$0xff] }
 0x425   : > { %1420 = vmatpush1.bf16.msra.mxu0 %v1344_v62  ;;  %1470 = vmatprep.subr.bf16.mxu1 %v1347_v5  ;;  %v4554_v38 = vpop.permute.xlu1 %1513  ;;  %v1670_v33 = vsel %vm855_vm1, %v1657_v28, 0  ;;  %v1555_v29 = vsel %vm636_vm5, %v5563_v13, %v5562_v43  ;;  %v1654_v48 = vpack.c.bf16 %v1622_v55, %v1606_v17  ;;  %v1592_v63 = vmul.f32 %v1588_v22, %v3848_v23  ;;  %v5565_v4 = vld [vmem:[#allocation38_spill] sm:$0xff] }
 0x426   : > { %1471 = vmatpush1.bf16.msra.mxu1 %v1346_v31  ;;  %2995 = vmatprep.subr.msk.bf16.mxu0 %vm855_vm1, %v1658_v30  ;;  %v1585_v31 = vsel %vm702_vm4, %v5558_v53, %v5561_v15  ;;  %v1590_v30 = vmul.f32 %v1586_v58, %v3853_v25  ;;  %v1571_v28 = vsel %vm669_vm6, %v5565_v4, %v5564_v44  ;;  %v5567_v15 = vld [vmem:[#allocation36_spill] sm:$0xff] }
 0x427   : > { %v4568_v54 = vpop.permute.xlu0 %1515  ;;  %2997 = vmatprep.subr.msk.bf16.mxu1 %vm855_vm1, %v1660_v37  ;;  %v5566_v62 = vpack.c.bf16 %v4470_v49, %v4470_v49  ;;  %v1656_v37 = vpack.c.bf16 %v1624_v40, %v1608_v27  ;;  %v1655_v58 = vpack.c.bf16 %v1623_v36, %v1607_v46  ;;  %v1589_v17 = vmul.f32 %v1587_v11, %v3845_v21  ;;  %v5569_v40 = vld [vmem:[#allocation37_spill] sm:$0xff] }
 0x428   : > { %2989 = vmatmul.mubr.msk.bf16.vlgmr.msra.gmra.mxu0 %vm851_vm9, %v3123_v45  ;;  %v1569_v55 = vsel %vm669_vm6, %v1566_v39, %v1568_v18  ;;  %v1591_v51 = vmul.f32 %v1585_v31, %v3856_v26  ;;  %v1554_v49 = vsel %vm636_vm5, %v5562_v43, %v5567_v15  ;;  %v5568_v27 = vmov 0   ;;  %v3124_v43 = vld [vmem:[%s5440_s7 + $0x8] ss:$0 sps:$4 sm:$0xff]  }
 0x429   : > { %2992 = vmatmul.mubr.msk.bf16.vlgmr.msra.gmra.mxu1 %vm851_vm9, %v3123_v45  ;;  %1688 = vmatpush1.bf16.msra.mxu0 %v1670_v33  ;;  %v1518_v53 = vpop.permute.xlu1 %1517  ;;  %v1676_v5 = vsel %vm855_vm1, %v5566_v62, 0  ;;  %v1558_v45 = vmul.f32 %v1555_v29, %v3877_v2  ;;  %v1553_v46 = vsel %vm636_vm5, %v5567_v15, %v5569_v40  ;;  %v1574_v36 = vmul.f32 %v1571_v28, %v3880_v0  ;;  %v5570_v33 = vld [vmem:[#allocation26_spill] sm:$0xff]  ;;  %v5572_v62 = vld [vmem:[#allocation27_spill] sm:$0xff] }
 0x42a   : > { %1689 = vmatprep.subr.bf16.mxu0 %v1654_v48  ;;  %1731 = vmatpush1.bf16.msra.mxu1 %v1676_v5  ;;  %v1572_v11 = vsel %vm669_vm6, %v1568_v18, %v5565_v4  ;;  %v1650_v31 = vpack.c.bf16 %v1590_v30, %v5570_v33  ;;  %v1556_v29 = vsel %vm636_vm5, %v5569_v40, %v5563_v13  ;;  %v5571_v30 = vld [vmem:[#allocation28_spill] sm:$0xff]  ;;  %v5573_v13 = vld [vmem:[#allocation29_spill] sm:$0xff] }
 0x42b   : > { %v1520_v22 = vpop.permute.xlu0 %1519  ;;  %1732 = vmatprep.subr.bf16.mxu1 %v1656_v37  ;;  %1447 = vmatprep.mubr.bf16.mxu0 %v5568_v27  ;;  %v1570_v48 = vsel %vm669_vm6, %v5564_v44, %v1566_v39  ;;  %v1576_v28 = vmul.f32 %v1569_v55, %v3908_v16  ;;  %v1652_v4 = vpack.c.bf16 %v1592_v63, %v5571_v30 }
 0x42c   : > { %1498 = vmatprep.mubr.bf16.mxu1 %v5568_v27  ;;  %v1649_v5 = vpack.c.bf16 %v1589_v17, %v5572_v62  ;;  %v1523_v37 = vsel %vm570_vm7, %v4554_v38, %v4568_v54  ;;  %v1651_v15 = vpack.c.bf16 %v1591_v51, %v5573_v13  ;;  %v1559_v40 = vmul.f32 %v1554_v49, %v3888_v59 }
 0x42d   : > { %1690 = vmatpush1.bf16.msra.mxu0 %v1653_v10  ;;  %v1530_v18 = vpop.permute.xlu1 %1529  ;;  %v1560_v39 = vmul.f32 %v1553_v46, %v3891_v60  ;;  %v1573_v10 = vmul.f32 %v1572_v11, %v3898_v6  ;;  %v1557_v63 = vmul.f32 %v1556_v29, %v3885_v3  ;;  %v1575_v17 = vmul.f32 %v1570_v48, %v3901_v8 }
 0x42e   : > { %1691 = vmatprep.subr.bf16.mxu0 %v1650_v31  ;;  %1733 = vmatpush1.bf16.msra.mxu1 %v1655_v58  ;;  %v1646_v58 = vpack.c.bf16 %v1574_v36, %v1558_v45  ;;  %v1526_v51 = vmul.f32 %v1523_v37, %v3929_v56  ;;  %v1521_v33 = vsel %vm570_vm7, %v1518_v53, %v1520_v22 }
 0x42f   : > { %v1532_v44 = vpop.permute.xlu0 %1531  ;;  %1734 = vmatprep.subr.bf16.mxu1 %v1652_v4  ;;  %v1648_v11 = vpack.c.bf16 %v1576_v28, %v1560_v39  ;;  %v1524_v31 = vsel %vm570_vm7, %v1520_v22, %v4554_v38  ;;  %v1645_v45 = vpack.c.bf16 %v1573_v10, %v1557_v63  ;;  %v1522_v36 = vsel %vm570_vm7, %v4568_v54, %v1518_v53 }
 0x430   : > { %v1539_v55 = vsel %vm603_vm8, %v1530_v18, %v1532_v44  ;;  %2990 = vmatmul.mubr.msk.bf16.gmra.mxu0 %vm851_vm9, %v3124_v43  ;;  %v1647_v28 = vpack.c.bf16 %v1575_v17, %v1559_v40  ;;  %v1525_v4 = vmul.f32 %v1524_v31, %v3937_v1  ;;  %v1528_v54 = vmul.f32 %v1521_v33, %v3943_v61 }
 0x431   : > { %v1542_v49 = vmul.f32 %v1539_v55, %v3932_v57  ;;  %1692 = vmatpush1.bf16.msra.mxu0 %v1649_v5  ;;  %v1534_v46 = vpop.permute.xlu1 %1533  ;;  %2993 = vmatmul.mubr.msk.bf16.gmra.mxu1 %vm851_vm9, %v3124_v43  ;;  %v1527_v5 = vmul.f32 %v1522_v36, %v5556_v35 }
 0x432   : > { %v1538_v29 = vsel %vm603_vm8, %v1532_v44, %v1534_v46  ;;  %1693 = vmatprep.subr.bf16.mxu0 %v1646_v58  ;;  %1735 = vmatpush1.bf16.msra.mxu1 %v1651_v15 }
 0x433   : > { %v1536_v48 = vpop.permute.xlu0 %1535  ;;  %1736 = vmatprep.subr.bf16.mxu1 %v1648_v11  ;;  %v1642_v43 = vpack.c.bf16 %v1542_v49, %v1526_v51  ;;  %1713 = vmatprep.mubr.bf16.mxu0 %v5568_v27  ;;  %v1543_v30 = vmul.f32 %v1538_v29, %v3953_v14 }
 0x434   : > { %v1537_v38 = vsel %vm603_vm8, %v1534_v46, %v1536_v48  ;;  %v1540_v22 = vsel %vm603_vm8, %v1536_v48, %v1530_v18  ;;  %1756 = vmatprep.mubr.bf16.mxu1 %v5568_v27  ;;  %v4666_v18 = vld [vmem:[%s5442_s9] sm:$0xff]  }
 0x435   : > { %v1541_v53 = vmul.f32 %v1540_v22, %v3950_v9  ;;  %v1544_v62 = vmul.f32 %v1537_v38, %v3960_v19  ;;  %1694 = vmatpush1.bf16.msra.mxu0 %v1645_v45  ;;  %v1643_v15 = vpack.c.bf16 %v1543_v30, %v1527_v5  ;;  %5574 = vst [vmem:[#allocation25_spill] sm:$0xff] %v4666_v18 }
 0x436   : > { %1695 = vmatprep.subr.bf16.mxu0 %v1642_v43  ;;  %1737 = vmatpush1.bf16.msra.mxu1 %v1647_v28 }
 0x437   : > { %v1641_v37 = vpack.c.bf16 %v1541_v53, %v1525_v4  ;;  %v1644_v13 = vpack.c.bf16 %v1544_v62, %v1528_v54 }
 0x439   : > { %1696 = vmatpush1.bf16.msra.mxu0 %v1641_v37  ;;  %1738 = vmatprep.subr.bf16.mxu1 %v1644_v13 }
 0x43a   : > { %1739 = vmatpush1.bf16.msra.mxu1 %v1643_v15 }
 0x43c   : > { %2996 = vmatmul.mubr.msk.bf16.vlgmr.msra.gmra.mxu0 %vm851_vm9, %v4666_v18 }
 0x43d   : > { %2998 = vmatmul.mubr.msk.bf16.vlgmr.msra.gmra.mxu1 %vm851_vm9, %v4666_v18  ;;  %2023 = vmatprep.mubr.bf16.mxu0 %v5568_v27 }
 0x43e   : > { %2064 = vmatprep.mubr.bf16.mxu1 %v5568_v27  ;;  %v1372_v36 = vpop.permute.xlu1 %1371 }
 0x4e8   : > { %v4674_v40 = vpop.f32.mrf.mxu0 }
 0x4e9   : > { %v4676_v39 = vpop.f32.mrf.mxu1 }
 0x4ea   : > { %v4678_v10 = vpop.f32.mrf.mxu0 }
 0x4eb   : > { %v4680_v44 = vpop.f32.mrf.mxu1 }
 0x4ec   : > { %v1443_v63 = vpop.f32.mrf.mxu0 }
 0x4ed   : > { %v1494_v17 = vpop.f32.mrf.mxu1  ;;  %v4698_v38 = vadd.f32 %v1443_v63, %v1372_v36 }
 0x4ee   : > { %v1445_v55 = vpop.f32.mrf.mxu0  ;;  %v4700_v22 = vadd.f32 %v1494_v17, %v1372_v36 }
 0x4ef   : > { %v1496_v58 = vpop.f32.mrf.mxu1  ;;  %5575 = vst [vmem:[#allocation32_spill] sm:$0xff] %v4698_v38  ;;  %v4702_v54 = vadd.f32 %v1445_v55, %v1372_v36 }
 0x4f0   : > { %v4682_v51 = vpop.f32.mrf.mxu0  ;;  %5576 = vst [vmem:[#allocation31_spill] sm:$0xff] %v4700_v22  ;;  %v4705_v5 = vadd.f32 %v1496_v58, %v1372_v36 }
 0x4f1   : > { %v4684_v49 = vpop.f32.mrf.mxu1  ;;  %5577 = vst [vmem:[#allocation30_spill] sm:$0xff] %v4702_v54 }
 0x4f2   : > { %v4686_v46 = vpop.f32.mrf.mxu0  ;;  %5578 = vst [vmem:[#allocation33_spill] sm:$0xff] %v4705_v5 }
 0x4f3   : > { %v4688_v11 = vpop.f32.mrf.mxu1 }
 0x4f4   : > { %v1453_v33 = vpop.f32.mrf.mxu0 }
 0x4f5   : > { %v1504_v31 = vpop.f32.mrf.mxu1 }
 0x4f6   : > { %v1454_v29 = vpop.f32.mrf.mxu0 }
 0x4f7   : > { %v1505_v45 = vpop.f32.mrf.mxu1 }
 0x4fc   : > { %v4690_v48 = vpop.f32.mrf.mxu0 }
 0x4fd   : > { %v4692_v43 = vpop.f32.mrf.mxu1 }
 0x4fe   : > { %v4694_v28 = vpop.f32.mrf.mxu0 }
 0x4ff   : > { %v4696_v30 = vpop.f32.mrf.mxu1 }
 0x500   : > { %v1719_v4 = vpop.f32.mrf.mxu0 }
 0x501   : > { %v1771_v53 = vadd.f32 %v1719_v4, %v4698_v38  ;;  %v1762_v62 = vpop.f32.mrf.mxu1 }
 0x502   : > { %v1773_v37 = vadd.f32 %v1762_v62, %v4700_v22  ;;  %v1721_v13 = vpop.f32.mrf.mxu0 }
 0x503   : > { %v3003_v15 = vmul.f32 -1.442695, %v1771_v53  ;;  %v1772_v33 = vadd.f32 %v1721_v13, %v4702_v54  ;;  %v1764_v31 = vpop.f32.mrf.mxu1 }
 0x504   : > { %v3005_v29 = vmul.f32 -1.442695, %v1773_v37  ;;  %v1774_v63 = vadd.f32 %v1764_v31, %v4705_v5  ;;  %v4711_v31 = vld [vmem:[%s4057_s14] sm:$0xff] }
 0x505   : > { %3126 = vpow2.f32 %v3003_v15  ;;  %v3004_v17 = vmul.f32 -1.442695, %v1772_v33  ;;  %5579 = vst [vmem:[#allocation35_spill] sm:$0xff] %v4711_v31 }
 0x506   : > { %3128 = vpow2.f32 %v3005_v29  ;;  %v3006_v55 = vmul.f32 -1.442695, %v1774_v63 }
 0x507   : > { %3130 = vpow2.f32 %v3004_v17  ;;  %v4717_v17 = vld [vmem:[%s4057_s14 + $0x8] sm:$0xff] }
 0x508   : > { %3132 = vpow2.f32 %v3006_v55  ;;  %5580 = vst [vmem:[#allocation34_spill] sm:$0xff] %v4717_v17 }
 0x512   : > { %v3127_v45 = vpop.eup %3126 }
 0x513   : > { %v3129_v58 = vpop.eup %3128  ;;  %v1803_v36 = vadd.f32 1.0, %v3127_v45 }
 0x514   : > { %v3131_v4 = vpop.eup %3130  ;;  %v1805_v62 = vadd.f32 1.0, %v3129_v58  ;;  %v4725_v58 = vld [vmem:[%s4057_s14 + $0x10] sm:$0xff] }
 0x515   : > { %v3133_v53 = vpop.eup %3132  ;;  %3134 = vrcp.f32 %v1803_v36  ;;  %v1804_v13 = vadd.f32 1.0, %v3131_v4  ;;  %5581 = vst [vmem:[#allocation39_spill] sm:$0xff] %v4725_v58  ;;  %v4733_v4 = vld [vmem:[%s4057_s14 + $0x18] sm:$0xff]  ;;  %s5615_s14 = sld [smem:[#allocation46_spill]] }
 0x516   : > { %3136 = vrcp.f32 %v1805_v62  ;;  %v1806_v37 = vadd.f32 1.0, %v3133_v53  ;;  %5582 = vst [vmem:[#allocation38_spill] sm:$0xff] %v4733_v4  ;;  %v1210_v53 = vld [vmem:[%s5441_s8] sm:$0xff] }
 0x517   : > { %3138 = vrcp.f32 %v1804_v13  ;;  %v1212_v13 = vld [vmem:[%s5441_s8 + $0x10] sm:$0xff] }
 0x518   : > { %3140 = vrcp.f32 %v1806_v37 }
 0x522   : > { %v3135_v15 = vpop.eup %3134 }
 0x523   : > { %v3137_v33 = vpop.eup %3136  ;;  %v4714_v29 = vmul.f32 %v4711_v31, %v3135_v15 }
 0x524   : > { %v3139_v63 = vpop.eup %3138  ;;  %v4728_v36 = vmul.f32 %v4725_v58, %v3137_v33 }
 0x525   : > { %v4720_v55 = vmul.f32 %v4717_v17, %v3139_v63  ;;  %1940 = vrot.lane.b32.xlu0 %v4714_v29, %s3413_s27  ;;  %v3141_v45 = vpop.eup %3140 }
 0x526   : > { %v4736_v62 = vmul.f32 %v4733_v4, %v3141_v45 }
 0x527   : > { %1942 = vrot.lane.b32.xlu1 %v4720_v55, %s3413_s27 }
 0x529   : > { %1944 = vrot.lane.b32.xlu0 %v4728_v36, %s3413_s27 }
 0x52b   : > { %1946 = vrot.lane.b32.xlu1 %v4736_v62, %s3413_s27 }
 0x52d   : > { %1908 = vrot.lane.b32.xlu0 %v4714_v29, %s3414_s17 }
 0x52f   : > { %1910 = vrot.lane.b32.xlu1 %v4720_v55, %s3414_s17 }
 0x531   : > { %1912 = vrot.lane.b32.xlu0 %v4728_v36, %s3414_s17 }
 0x533   : > { %1914 = vrot.lane.b32.xlu1 %v4736_v62, %s3414_s17 }
 0x535   : > { %1924 = vrot.lane.b32.xlu0 %v4714_v29, %s3415_s21 }
 0x537   : > { %1926 = vrot.lane.b32.xlu1 %v4720_v55, %s3415_s21 }
 0x539   : > { %1928 = vrot.lane.b32.xlu0 %v4728_v36, %s3415_s21 }
 0x53b   : > { %1930 = vrot.lane.b32.xlu1 %v4736_v62, %s3415_s21 }
 0x53d   : > { %1892 = vrot.lane.b32.xlu0 %v4714_v29, %s3416_s25 }
 0x53f   : > { %1894 = vrot.lane.b32.xlu1 %v4720_v55, %s3416_s25 }
 0x541   : > { %1896 = vrot.lane.b32.xlu0 %v4728_v36, %s3416_s25 }
 0x543   : > { %1898 = vrot.lane.b32.xlu1 %v4736_v62, %s3416_s25 }
 0x545   : > { %1860 = vrot.lane.b32.xlu0 %v4714_v29, %s3417_s23 }
 0x547   : > { %1862 = vrot.lane.b32.xlu1 %v4720_v55, %s3417_s23 }
 0x549   : > { %1864 = vrot.lane.b32.xlu0 %v4728_v36, %s3417_s23 }
 0x54b   : > { %1866 = vrot.lane.b32.xlu1 %v4736_v62, %s3417_s23 }
 0x54d   : > { %1876 = vrot.lane.b32.xlu0 %v4714_v29, %s3418_s1 }
 0x54f   : > { %1878 = vrot.lane.b32.xlu1 %v4720_v55, %s3418_s1 }
 0x551   : > { %1880 = vrot.lane.b32.xlu0 %v4728_v36, %s3418_s1 }
 0x553   : > { %1882 = vrot.lane.b32.xlu1 %v4736_v62, %s3418_s1 }
 0x555   : > { %1828 = vrot.lane.b32.xlu0 %v4714_v29, %s3419_s28 }
 0x557   : > { %1830 = vrot.lane.b32.xlu1 %v4720_v55, %s3419_s28 }
 0x559   : > { %1832 = vrot.lane.b32.xlu0 %v4728_v36, %s3419_s28 }
 0x55b   : > { %1834 = vrot.lane.b32.xlu1 %v4736_v62, %s3419_s28 }
 0x55d   : > { %1844 = vrot.lane.b32.xlu0 %v4714_v29, %s3421_s18 }
 0x55f   : > { %1846 = vrot.lane.b32.xlu1 %v4720_v55, %s3421_s18 }
 0x561   : > { %1848 = vrot.lane.b32.xlu0 %v4728_v36, %s3421_s18 }
 0x563   : > { %1850 = vrot.lane.b32.xlu1 %v4736_v62, %s3421_s18 }
 0x565   : > { %1366 = vperm.xlu0 %3121, %v1210_v53  }
 0x567   : > { %1376 = vperm.xlu1 %3122, %v1212_v13  }
 0x597   : > { %v1941_v37 = vpop.permute.xlu0 %1940 }
 0x599   : > { %v1943_v15 = vpop.permute.xlu1 %1942 }
 0x59a   : > { %v1950_v33 = vsel %vm801_vm0, %v1941_v37, %v1943_v15 }
 0x59b   : > { %v1952_v63 = vmul.f32 %v4459_v24, %v1950_v33  ;;  %v1945_v45 = vpop.permute.xlu0 %1944 }
 0x59c   : > { %v1949_v5 = vsel %vm801_vm0, %v1943_v15, %v1945_v45 }
 0x59d   : > { %v1972_v54 = vpack.c.bf16 %v1952_v63, %v1952_v63  ;;  %v1953_v22 = vmul.f32 %v4464_v32, %v1949_v5  ;;  %v1947_v38 = vpop.permute.xlu1 %1946 }
 0x59e   : > { %v1948_v18 = vsel %vm801_vm0, %v1945_v45, %v1947_v38  ;;  %v1951_v53 = vsel %vm801_vm0, %v1947_v38, %v1941_v37  ;;  %v5583_v37 = vld [vmem:[#allocation22_spill] sm:$0xff] }
 0x59f   : > { %v1973_v13 = vpack.c.bf16 %v1953_v22, %v1953_v22  ;;  %v1954_v4 = vmul.f32 %v4467_v34, %v1948_v18  ;;  %v1955_v58 = vmul.f32 %v4486_v12, %v1951_v53  ;;  %v1909_v33 = vpop.permute.xlu0 %1908  ;;  %v1980_v5 = vsel %vm855_vm1, %v1972_v54, 0  ;;  %v5584_v12 = vld [vmem:[#allocation24_spill] sm:$0xff] }
 0x5a1   : > { %v1974_v24 = vpack.c.bf16 %v1954_v4, %v1954_v4  ;;  %v1975_v17 = vpack.c.bf16 %v1955_v58, %v1955_v58  ;;  %v1911_v31 = vpop.permute.xlu1 %1910  ;;  %3007 = vmatprep.subr.msk.bf16.mxu0 %vm855_vm1, %v1973_v13 }
 0x5a2   : > { %1998 = vmatpush1.bf16.msra.mxu0 %v1980_v5  ;;  %v1918_v4 = vsel %vm735_vm3, %v1909_v33, %v1911_v31 }
 0x5a3   : > { %3009 = vmatprep.subr.msk.bf16.mxu1 %vm855_vm1, %v1975_v17  ;;  %v1913_v15 = vpop.permute.xlu0 %1912  ;;  %v1986_v63 = vsel %vm855_vm1, %v1974_v24, 0  ;;  %v1920_v32 = vmul.f32 %v1918_v4, %v5584_v12 }
 0x5a4   : > { %2039 = vmatpush1.bf16.msra.mxu1 %v1986_v63  ;;  %v1917_v18 = vsel %vm735_vm3, %v1911_v31, %v1913_v15 }
 0x5a5   : > { %v1915_v38 = vpop.permute.xlu1 %1914  ;;  %v1921_v13 = vmul.f32 %v1917_v18, %v3798_v42 }
 0x5a6   : > { %v1916_v54 = vsel %vm735_vm3, %v1913_v15, %v1915_v38  ;;  %v1919_v24 = vsel %vm735_vm3, %v1915_v38, %v1909_v33 }
 0x5a7   : > { %v1925_v22 = vpop.permute.xlu0 %1924  ;;  %v1922_v31 = vmul.f32 %v1916_v54, %v3805_v47  ;;  %v1923_v38 = vmul.f32 %v1919_v24, %v3795_v41 }
 0x5a9   : > { %v1927_v34 = vpop.permute.xlu1 %1926 }
 0x5aa   : > { %v1934_v58 = vsel %vm768_vm2, %v1925_v22, %v1927_v34 }
 0x5ab   : > { %v1929_v17 = vpop.permute.xlu0 %1928  ;;  %v1936_v45 = vmul.f32 %v1934_v58, %v5583_v37 }
 0x5ac   : > { %v1933_v53 = vsel %vm768_vm2, %v1927_v34, %v1929_v17 }
 0x5ad   : > { %v1937_v5 = vmul.f32 %v1933_v53, %v5557_v20  ;;  %v1931_v63 = vpop.permute.xlu1 %1930  ;;  %v1968_v53 = vpack.c.bf16 %v1936_v45, %v1920_v32 }
 0x5ae   : > { %v1932_v15 = vsel %vm768_vm2, %v1929_v17, %v1931_v63  ;;  %v1935_v33 = vsel %vm768_vm2, %v1931_v63, %v1925_v22 }
 0x5af   : > { %v1938_v58 = vmul.f32 %v1932_v15, %v3819_v52  ;;  %v1939_v34 = vmul.f32 %v1935_v33, %v3813_v50  ;;  %v1893_v18 = vpop.permute.xlu0 %1892  ;;  %v1969_v42 = vpack.c.bf16 %v1937_v5, %v1921_v13 }
 0x5b1   : > { %v1970_v20 = vpack.c.bf16 %v1938_v58, %v1922_v31  ;;  %v1895_v37 = vpop.permute.xlu1 %1894  ;;  %1999 = vmatprep.subr.bf16.mxu0 %v1969_v42  ;;  %v1971_v4 = vpack.c.bf16 %v1939_v34, %v1923_v38 }
 0x5b2   : > { %v1902_v54 = vsel %vm702_vm4, %v1893_v18, %v1895_v37  ;;  %2000 = vmatpush1.bf16.msra.mxu0 %v1968_v53 }
 0x5b3   : > { %2040 = vmatprep.subr.bf16.mxu1 %v1971_v4  ;;  %v1897_v17 = vpop.permute.xlu0 %1896  ;;  %v1904_v22 = vmul.f32 %v1902_v54, %v3845_v21 }
 0x5b4   : > { %v1901_v24 = vsel %vm702_vm4, %v1895_v37, %v1897_v17  ;;  %2041 = vmatpush1.bf16.msra.mxu1 %v1970_v20 }
 0x5b5   : > { %v1905_v63 = vmul.f32 %v1901_v24, %v3853_v25  ;;  %v1899_v13 = vpop.permute.xlu1 %1898  ;;  %v1964_v33 = vpack.c.bf16 %v1904_v22, %v4714_v29 }
 0x5b6   : > { %v1900_v32 = vsel %vm702_vm4, %v1897_v17, %v1899_v13  ;;  %v1903_v42 = vsel %vm702_vm4, %v1899_v13, %v1893_v18 }
 0x5b7   : > { %v1906_v45 = vmul.f32 %v1900_v32, %v3856_v26  ;;  %v1907_v5 = vmul.f32 %v1903_v42, %v3848_v23  ;;  %v1861_v31 = vpop.permute.xlu0 %1860  ;;  %v1965_v15 = vpack.c.bf16 %v1905_v63, %v4720_v55 }
 0x5b9   : > { %v1966_v20 = vpack.c.bf16 %v1906_v45, %v4728_v36  ;;  %v1863_v37 = vpop.permute.xlu1 %1862  ;;  %2001 = vmatprep.subr.bf16.mxu0 %v1965_v15  ;;  %v1967_v38 = vpack.c.bf16 %v1907_v5, %v4736_v62 }
 0x5ba   : > { %2002 = vmatpush1.bf16.msra.mxu0 %v1964_v33  ;;  %v1870_v53 = vsel %vm636_vm5, %v1861_v31, %v1863_v37 }
 0x5bb   : > { %2042 = vmatprep.subr.bf16.mxu1 %v1967_v38  ;;  %v1865_v58 = vpop.permute.xlu0 %1864  ;;  %v1873_v29 = vmul.f32 %v1870_v53, %v3877_v2 }
 0x5bc   : > { %2043 = vmatpush1.bf16.msra.mxu1 %v1966_v20  ;;  %v1869_v24 = vsel %vm636_vm5, %v1863_v37, %v1865_v58 }
 0x5bd   : > { %v1867_v34 = vpop.permute.xlu1 %1866  ;;  %v1874_v37 = vmul.f32 %v1869_v24, %v3888_v59 }
 0x5be   : > { %v1868_v62 = vsel %vm636_vm5, %v1865_v58, %v1867_v34  ;;  %v1871_v17 = vsel %vm636_vm5, %v1867_v34, %v1861_v31 }
 0x5bf   : > { %v1877_v18 = vpop.permute.xlu0 %1876  ;;  %v1872_v5 = vmul.f32 %v1871_v17, %v3885_v3  ;;  %v1875_v31 = vmul.f32 %v1868_v62, %v3891_v60 }
 0x5c1   : > { %v1879_v4 = vpop.permute.xlu1 %1878 }
 0x5c2   : > { %v1886_v55 = vsel %vm669_vm6, %v1877_v18, %v1879_v4 }
 0x5c3   : > { %v1889_v36 = vmul.f32 %v1886_v55, %v3880_v0  ;;  %v1881_v54 = vpop.permute.xlu0 %1880 }
 0x5c4   : > { %v1885_v22 = vsel %vm669_vm6, %v1879_v4, %v1881_v54 }
 0x5c5   : > { %v1883_v63 = vpop.permute.xlu1 %1882  ;;  %v1961_v13 = vpack.c.bf16 %v1889_v36, %v1873_v29  ;;  %v1890_v32 = vmul.f32 %v1885_v22, %v3901_v8 }
 0x5c6   : > { %v1884_v42 = vsel %vm669_vm6, %v1881_v54, %v1883_v63  ;;  %v1887_v45 = vsel %vm669_vm6, %v1883_v63, %v1877_v18 }
 0x5c7   : > { %v1888_v15 = vmul.f32 %v1887_v45, %v3898_v6  ;;  %v1891_v33 = vmul.f32 %v1884_v42, %v3908_v16  ;;  %2003 = vmatprep.subr.bf16.mxu0 %v1961_v13  ;;  %v1829_v20 = vpop.permute.xlu0 %1828  ;;  %v1962_v53 = vpack.c.bf16 %v1890_v32, %v1874_v37 }
 0x5c9   : > { %v1960_v38 = vpack.c.bf16 %v1888_v15, %v1872_v5  ;;  %v1831_v58 = vpop.permute.xlu1 %1830  ;;  %v1963_v34 = vpack.c.bf16 %v1891_v33, %v1875_v31 }
 0x5ca   : > { %v1838_v29 = vsel %vm570_vm7, %v1829_v20, %v1831_v58 }
 0x5cb   : > { %2004 = vmatpush1.bf16.msra.mxu0 %v1960_v38  ;;  %2044 = vmatprep.subr.bf16.mxu1 %v1963_v34  ;;  %v1833_v4 = vpop.permute.xlu0 %1832  ;;  %v1841_v62 = vmul.f32 %v1838_v29, %v3929_v56 }
 0x5cc   : > { %2045 = vmatpush1.bf16.msra.mxu1 %v1962_v53  ;;  %v1837_v32 = vsel %vm570_vm7, %v1831_v58, %v1833_v4 }
 0x5cd   : > { %v1835_v18 = vpop.permute.xlu1 %1834  ;;  %v1842_v58 = vmul.f32 %v1837_v32, %v5556_v35 }
 0x5ce   : > { %v1836_v24 = vsel %vm570_vm7, %v1833_v4, %v1835_v18  ;;  %v1839_v63 = vsel %vm570_vm7, %v1835_v18, %v1829_v20  ;;  %v4911_v18 = vld [vmem:[%s5443_s10] sm:$0xf] }
 0x5cf   : > { %v1845_v55 = vpop.permute.xlu0 %1844  ;;  %v1840_v33 = vmul.f32 %v1839_v63, %v3937_v1  ;;  %v1843_v20 = vmul.f32 %v1836_v24, %v3943_v61 }
 0x5d1   : > { %v1847_v36 = vpop.permute.xlu1 %1846 }
 0x5d2   : > { %v1854_v54 = vsel %vm603_vm8, %v1845_v55, %v1847_v36 }
 0x5d3   : > { %v1857_v17 = vmul.f32 %v1854_v54, %v3932_v57  ;;  %v1849_v22 = vpop.permute.xlu0 %1848 }
 0x5d4   : > { %v1853_v13 = vsel %vm603_vm8, %v1847_v36, %v1849_v22 }
 0x5d5   : > { %v1851_v42 = vpop.permute.xlu1 %1850  ;;  %v1957_v45 = vpack.c.bf16 %v1857_v17, %v1841_v62  ;;  %v1858_v5 = vmul.f32 %v1853_v13, %v3953_v14 }
 0x5d6   : > { %v1852_v31 = vsel %vm603_vm8, %v1849_v22, %v1851_v42  ;;  %v1855_v15 = vsel %vm603_vm8, %v1851_v42, %v1845_v55 }
 0x5d7   : > { %v1856_v37 = vmul.f32 %v1855_v15, %v3950_v9  ;;  %v1859_v38 = vmul.f32 %v1852_v31, %v3960_v19  ;;  %2005 = vmatprep.subr.bf16.mxu0 %v1957_v45  ;;  %v1958_v4 = vpack.c.bf16 %v1858_v5, %v1842_v58 }
 0x5d9   : > { %v1956_v34 = vpack.c.bf16 %v1856_v37, %v1840_v33  ;;  %v1959_v53 = vpack.c.bf16 %v1859_v38, %v1843_v20 }
 0x5db   : > { %2006 = vmatpush1.bf16.msra.mxu0 %v1956_v34  ;;  %2046 = vmatprep.subr.bf16.mxu1 %v1959_v53 }
 0x5dc   : > { %2047 = vmatpush1.bf16.msra.mxu1 %v1958_v4 }
 0x5de   : > { %3008 = vmatmul.mubr.msk.bf16.vlgmr.msra.gmra.mxu0 %vm851_vm9, %v4911_v18 }
 0x5df   : > { %3010 = vmatmul.mubr.msk.bf16.vlgmr.msra.gmra.mxu1 %vm851_vm9, %v4911_v18  ;;  %2289 = vmatprep.mubr.bf16.mxu0 %v5568_v27 }
 0x5e0   : > { %2332 = vmatprep.mubr.bf16.mxu1 %v5568_v27  ;;  %v1367_v55 = vpop.permute.xlu0 %1366 }
 0x5e1   : > { %v4920_v29 = vadd.f32 %v4674_v40, %v1367_v55  ;;  %v4923_v36 = vadd.f32 %v4678_v10, %v1367_v55  ;;  %v4926_v54 = vadd.f32 %v4676_v39, %v1367_v55  ;;  %v4931_v17 = vadd.f32 %v4680_v44, %v1367_v55 }
 0x5e2   : > { %v1377_v5 = vpop.permute.xlu1 %1376 }
 0x5e3   : > { %v1767_v62 = vadd.f32 %v4690_v48, %v4920_v29  ;;  %v1768_v22 = vadd.f32 %v4694_v28, %v4923_v36  ;;  %v1769_v24 = vadd.f32 %v4692_v43, %v4926_v54  ;;  %v1770_v10 = vadd.f32 %v4696_v30, %v4931_v17 }
 0x5e4   : > { %v4940_v30 = vadd.f32 %v4682_v51, %v1377_v5  ;;  %v4943_v33 = vadd.f32 %v4684_v49, %v1377_v5  ;;  %v4947_v38 = vadd.f32 %v4686_v46, %v1377_v5  ;;  %v4951_v53 = vadd.f32 %v4688_v11, %v1377_v5  ;;  %v5589_v5 = vld [vmem:[#allocation34_spill] sm:$0xff] }
 0x5e5   : > { %v2999_v40 = vmul.f32 -1.442695, %v1767_v62  ;;  %v3000_v63 = vmul.f32 -1.442695, %v1768_v22  ;;  %v3001_v39 = vmul.f32 -1.442695, %v1769_v24 }
 0x5e6   : > { %v3002_v13 = vmul.f32 -1.442695, %v1770_v10  ;;  %5585 = vst [vmem:[#allocation36_spill] sm:$0xff] %v4943_v33  ;;  %5586 = vst [vmem:[#allocation37_spill] sm:$0xff] %v4947_v38 }
 0x5e7   : > { %3142 = vpow2.f32 %v2999_v40  ;;  %5587 = vst [vmem:[#allocation26_spill] sm:$0xff] %v4951_v53 }
 0x5e8   : > { %3144 = vpow2.f32 %v3000_v63 }
 0x5e9   : > { %3146 = vpow2.f32 %v3001_v39 }
 0x5ea   : > { %3148 = vpow2.f32 %v3002_v13 }
 0x5f4   : > { %v3143_v48 = vpop.eup %3142 }
 0x5f5   : > { %v3145_v44 = vpop.eup %3144  ;;  %v1799_v32 = vadd.f32 1.0, %v3143_v48 }
 0x5f6   : > { %v3147_v42 = vpop.eup %3146  ;;  %v1800_v45 = vadd.f32 1.0, %v3145_v44  ;;  %v5588_v44 = vld [vmem:[#allocation35_spill] sm:$0xff] }
 0x5f7   : > { %v3149_v28 = vpop.eup %3148  ;;  %v1801_v31 = vadd.f32 1.0, %v3147_v42  ;;  %3150 = vrcp.f32 %v1799_v32 }
 0x5f8   : > { %v1802_v43 = vadd.f32 1.0, %v3149_v28  ;;  %3152 = vrcp.f32 %v1800_v45 }
 0x5f9   : > { %3154 = vrcp.f32 %v1801_v31 }
 0x5fa   : > { %3156 = vrcp.f32 %v1802_v43 }
 0x604   : > { %v3151_v24 = vpop.eup %3150 }
 0x605   : > { %v3153_v40 = vpop.eup %3152  ;;  %v2081_v10 = vsub.f32 1.0, %v3151_v24 }
 0x606   : > { %v3155_v63 = vpop.eup %3154  ;;  %v2082_v39 = vsub.f32 1.0, %v3153_v40 }
 0x607   : > { %v3157_v11 = vpop.eup %3156  ;;  %v2085_v32 = vmul.f32 %v5588_v44, %v2081_v10  ;;  %v2083_v45 = vsub.f32 1.0, %v3155_v63  ;;  %v5597_v44 = vld [vmem:[#allocation41_spill] sm:$0xff] }
 0x608   : > { %v2086_v31 = vmul.f32 %v5589_v5, %v2082_v39 }
 0x69e   : > { %v2025_v15 = vpop.f32.mrf.mxu0 }
 0x69f   : > { %v2073_v20 = vadd.f32 %v2025_v15, %v4940_v30  ;;  %v2066_v37 = vpop.f32.mrf.mxu1 }
 0x6a0   : > { %v2075_v58 = vadd.f32 %v2066_v37, %v4943_v33  ;;  %v2027_v34 = vpop.f32.mrf.mxu0 }
 0x6a1   : > { %3158 = vtanh.f32 %v2073_v20  ;;  %v2074_v51 = vadd.f32 %v2027_v34, %v4947_v38  ;;  %v2068_v4 = vpop.f32.mrf.mxu1  ;;  %v5591_v34 = vld [vmem:[#allocation39_spill] sm:$0xff] }
 0x6a2   : > { %3160 = vtanh.f32 %v2075_v58  ;;  %v2076_v49 = vadd.f32 %v2068_v4, %v4951_v53  ;;  %v2029_v55 = vpop.f32.mrf.mxu0  ;;  %v2084_v58 = vsub.f32 1.0, %v3157_v11 }
 0x6a3   : > { %3162 = vtanh.f32 %v2074_v51  ;;  %v2070_v62 = vpop.f32.mrf.mxu1  ;;  %v2087_v51 = vmul.f32 %v5591_v34, %v2083_v45 }
 0x6a4   : > { %3164 = vtanh.f32 %v2076_v49  ;;  %v2030_v46 = vpop.f32.mrf.mxu0  ;;  %v5594_v62 = vld [vmem:[#allocation38_spill] sm:$0xff] }
 0x6a5   : > { %v2071_v22 = vpop.f32.mrf.mxu1  ;;  %v2088_v46 = vmul.f32 %v5594_v62, %v2084_v58 }
 0x6ae   : > { %v3159_v13 = vpop.eup %3158 }
 0x6af   : > { %v3161_v48 = vpop.eup %3160  ;;  %v2089_v42 = vmul.f32 %v3159_v13, %v3151_v24 }
 0x6b0   : > { %v3163_v28 = vpop.eup %3162  ;;  %v2091_v20 = vmul.f32 %v3161_v48, %v3155_v63  ;;  %v5596_v63 = vld [vmem:[#allocation40_spill] sm:$0xff] }
 0x6b1   : > { %v3165_v43 = vpop.eup %3164  ;;  %v4957_v15 = vadd.f32 %v2089_v42, %v2085_v32  ;;  %v2090_v37 = vmul.f32 %v3163_v28, %v3153_v40 }
 0x6b2   : > { %v2092_v49 = vmul.f32 %v3165_v43, %v3157_v11  ;;  %v4964_v55 = vadd.f32 %v2091_v20, %v2087_v51  ;;  %v5598_v20 = vld [vmem:[#allocation42_spill] sm:$0xff] }
 0x6b3   : > { %5590 = vst [vmem:[#allocation28_spill] sm:$0xff] %v4957_v15  ;;  %v4960_v4 = vadd.f32 %v2090_v37, %v2086_v31  ;;  %2209 = vrot.lane.b32.xlu0 %v4957_v15, %s3413_s27  ;;  %v5041_v31 = vld [vmem:[#allocation2 + $0x30] ss:$0 sm:$0xff] }
 0x6b4   : > { %5593 = vst [vmem:[#allocation29_spill] sm:$0xff] %v4964_v55  ;;  %v4969_v22 = vadd.f32 %v2092_v49, %v2088_v46 }
 0x6b5   : > { %5592 = vst [vmem:[#allocation27_spill] sm:$0xff] %v4960_v4  ;;  %2211 = vrot.lane.b32.xlu1 %v4960_v4, %s3413_s27 }
 0x6b6   : > { %5595 = vst [vmem:[#allocation24_spill] sm:$0xff] %v4969_v22 }
 0x6b7   : > { %2213 = vrot.lane.b32.xlu0 %v4964_v55, %s3413_s27 }
 0x6b9   : > { %2215 = vrot.lane.b32.xlu1 %v4969_v22, %s3413_s27 }
 0x6bb   : > { %2177 = vrot.lane.b32.xlu0 %v4957_v15, %s3414_s17 }
 0x6bd   : > { %2179 = vrot.lane.b32.xlu1 %v4960_v4, %s3414_s17 }
 0x6bf   : > { %2181 = vrot.lane.b32.xlu0 %v4964_v55, %s3414_s17 }
 0x6c1   : > { %2183 = vrot.lane.b32.xlu1 %v4969_v22, %s3414_s17 }
 0x6c3   : > { %2193 = vrot.lane.b32.xlu0 %v4957_v15, %s3415_s21 }
 0x6c5   : > { %2195 = vrot.lane.b32.xlu1 %v4960_v4, %s3415_s21 }
 0x6c7   : > { %2197 = vrot.lane.b32.xlu0 %v4964_v55, %s3415_s21 }
 0x6c9   : > { %2199 = vrot.lane.b32.xlu1 %v4969_v22, %s3415_s21 }
 0x6cb   : > { %2161 = vrot.lane.b32.xlu0 %v4957_v15, %s3416_s25 }
 0x6cd   : > { %2163 = vrot.lane.b32.xlu1 %v4960_v4, %s3416_s25 }
 0x6cf   : > { %2165 = vrot.lane.b32.xlu0 %v4964_v55, %s3416_s25 }
 0x6d1   : > { %2167 = vrot.lane.b32.xlu1 %v4969_v22, %s3416_s25 }
 0x6d3   : > { %2129 = vrot.lane.b32.xlu0 %v4957_v15, %s3417_s23 }
 0x6d5   : > { %2131 = vrot.lane.b32.xlu1 %v4960_v4, %s3417_s23 }
 0x6d7   : > { %2133 = vrot.lane.b32.xlu0 %v4964_v55, %s3417_s23 }
 0x6d9   : > { %2135 = vrot.lane.b32.xlu1 %v4969_v22, %s3417_s23 }
 0x6db   : > { %2145 = vrot.lane.b32.xlu0 %v4957_v15, %s3418_s1 }
 0x6dd   : > { %2147 = vrot.lane.b32.xlu1 %v4960_v4, %s3418_s1 }
 0x6df   : > { %2149 = vrot.lane.b32.xlu0 %v4964_v55, %s3418_s1 }
 0x6e1   : > { %2151 = vrot.lane.b32.xlu1 %v4969_v22, %s3418_s1 }
 0x6e3   : > { %2097 = vrot.lane.b32.xlu0 %v4957_v15, %s3419_s28 }
 0x6e5   : > { %2099 = vrot.lane.b32.xlu1 %v4960_v4, %s3419_s28 }
 0x6e7   : > { %2101 = vrot.lane.b32.xlu0 %v4964_v55, %s3419_s28 }
 0x6e9   : > { %2103 = vrot.lane.b32.xlu1 %v4969_v22, %s3419_s28 }
 0x6eb   : > { %2113 = vrot.lane.b32.xlu0 %v4957_v15, %s3421_s18 }
 0x6ed   : > { %2115 = vrot.lane.b32.xlu1 %v4960_v4, %s3421_s18 }
 0x6ef   : > { %2117 = vrot.lane.b32.xlu0 %v4964_v55, %s3421_s18 }
 0x6f1   : > { %2119 = vrot.lane.b32.xlu1 %v4969_v22, %s3421_s18 }
 0x725   : > { %v2210_v24 = vpop.permute.xlu0 %2209 }
 0x727   : > { %v2212_v40 = vpop.permute.xlu1 %2211 }
 0x728   : > { %v2219_v10 = vsel %vm801_vm0, %v2210_v24, %v2212_v40 }
 0x729   : > { %v2221_v39 = vmul.f32 %v5596_v63, %v2219_v10  ;;  %v2214_v11 = vpop.permute.xlu0 %2213 }
 0x72a   : > { %v2218_v13 = vsel %vm801_vm0, %v2212_v40, %v2214_v11 }
 0x72b   : > { %v2241_v48 = vpack.c.bf16 %v2221_v39, %v2221_v39  ;;  %v2222_v32 = vmul.f32 %v5597_v44, %v2218_v13  ;;  %v2216_v42 = vpop.permute.xlu1 %2215 }
 0x72c   : > { %v2217_v45 = vsel %vm801_vm0, %v2214_v11, %v2216_v42  ;;  %v2220_v28 = vsel %vm801_vm0, %v2216_v42, %v2210_v24  ;;  %v5599_v42 = vld [vmem:[#allocation22_spill] sm:$0xff] }
 0x72d   : > { %v2242_v5 = vpack.c.bf16 %v2222_v32, %v2222_v32  ;;  %v2223_v43 = vmul.f32 %v5041_v31, %v2217_v45  ;;  %v2224_v37 = vmul.f32 %v5598_v20, %v2220_v28  ;;  %v2178_v58 = vpop.permute.xlu0 %2177  ;;  %v2246_v62 = vsel %vm855_vm1, %v2241_v48, 0  ;;  %v5601_v20 = vld [vmem:[#allocation23_spill] sm:$0xff] }
 0x72f   : > { %v2243_v34 = vpack.c.bf16 %v2223_v43, %v2223_v43  ;;  %v2244_v51 = vpack.c.bf16 %v2224_v37, %v2224_v37  ;;  %v2180_v49 = vpop.permute.xlu1 %2179  ;;  %3011 = vmatprep.subr.msk.bf16.mxu0 %vm855_vm1, %v2242_v5  ;;  %v5600_v5 = vld [vmem:[#allocation21_spill] sm:$0xff] }
 0x730   : > { %2264 = vmatpush1.bf16.msra.mxu0 %v2246_v62  ;;  %v2187_v13 = vsel %vm735_vm3, %v2178_v58, %v2180_v49 }
 0x731   : > { %3013 = vmatprep.subr.msk.bf16.mxu1 %vm855_vm1, %v2244_v51  ;;  %v2182_v46 = vpop.permute.xlu0 %2181  ;;  %v2252_v24 = vsel %vm855_vm1, %v2243_v34, 0  ;;  %v2189_v51 = vmul.f32 %v2187_v13, %v5584_v12 }
 0x732   : > { %2307 = vmatpush1.bf16.msra.mxu1 %v2252_v24  ;;  %v2186_v39 = vsel %vm735_vm3, %v2180_v49, %v2182_v46 }
 0x733   : > { %v2184_v40 = vpop.permute.xlu1 %2183  ;;  %v2190_v43 = vmul.f32 %v2186_v39, %v5600_v5 }
 0x734   : > { %v2185_v48 = vsel %vm735_vm3, %v2182_v46, %v2184_v40  ;;  %v2188_v32 = vsel %vm735_vm3, %v2184_v40, %v2178_v58 }
 0x735   : > { %v2194_v10 = vpop.permute.xlu0 %2193  ;;  %v2191_v49 = vmul.f32 %v2185_v48, %v3805_v47  ;;  %v2192_v46 = vmul.f32 %v2188_v32, %v3795_v41 }
 0x737   : > { %v2196_v63 = vpop.permute.xlu1 %2195 }
 0x738   : > { %v2203_v11 = vsel %vm768_vm2, %v2194_v10, %v2196_v63 }
 0x739   : > { %v2198_v44 = vpop.permute.xlu0 %2197  ;;  %v2205_v45 = vmul.f32 %v2203_v11, %v5599_v42 }
 0x73a   : > { %v2202_v28 = vsel %vm768_vm2, %v2196_v63, %v2198_v44 }
 0x73b   : > { %v2206_v37 = vmul.f32 %v2202_v28, %v5601_v20  ;;  %v2200_v34 = vpop.permute.xlu1 %2199  ;;  %v2237_v11 = vpack.c.bf16 %v2205_v45, %v2189_v51 }
 0x73c   : > { %v2201_v62 = vsel %vm768_vm2, %v2198_v44, %v2200_v34  ;;  %v2204_v58 = vsel %vm768_vm2, %v2200_v34, %v2194_v10 }
 0x73d   : > { %v2207_v24 = vmul.f32 %v2201_v62, %v3819_v52  ;;  %v2208_v40 = vmul.f32 %v2204_v58, %v3813_v50  ;;  %v2162_v63 = vpop.permute.xlu0 %2161  ;;  %v2238_v39 = vpack.c.bf16 %v2206_v37, %v2190_v43 }
 0x73f   : > { %v2239_v28 = vpack.c.bf16 %v2207_v24, %v2191_v49  ;;  %v2164_v53 = vpop.permute.xlu1 %2163  ;;  %2265 = vmatprep.subr.bf16.mxu0 %v2238_v39  ;;  %v2240_v13 = vpack.c.bf16 %v2208_v40, %v2192_v46 }
 0x740   : > { %v2171_v48 = vsel %vm702_vm4, %v2162_v63, %v2164_v53  ;;  %2266 = vmatpush1.bf16.msra.mxu0 %v2237_v11 }
 0x741   : > { %2308 = vmatprep.subr.bf16.mxu1 %v2240_v13  ;;  %v2166_v44 = vpop.permute.xlu0 %2165  ;;  %v2173_v10 = vmul.f32 %v2171_v48, %v3845_v21 }
 0x742   : > { %v2170_v32 = vsel %vm702_vm4, %v2164_v53, %v2166_v44  ;;  %2309 = vmatpush1.bf16.msra.mxu1 %v2239_v28 }
 0x743   : > { %v2174_v34 = vmul.f32 %v2170_v32, %v3853_v25  ;;  %v2168_v43 = vpop.permute.xlu1 %2167  ;;  %v2233_v46 = vpack.c.bf16 %v2173_v10, %v4957_v15 }
 0x744   : > { %v2169_v45 = vsel %vm702_vm4, %v2166_v44, %v2168_v43  ;;  %v2172_v37 = vsel %vm702_vm4, %v2168_v43, %v2162_v63 }
 0x745   : > { %v2175_v51 = vmul.f32 %v2169_v45, %v3856_v26  ;;  %v2176_v49 = vmul.f32 %v2172_v37, %v3848_v23  ;;  %v2130_v62 = vpop.permute.xlu0 %2129  ;;  %v2234_v58 = vpack.c.bf16 %v2174_v34, %v4960_v4 }
 0x747   : > { %v2235_v53 = vpack.c.bf16 %v2175_v51, %v4964_v55  ;;  %v2132_v24 = vpop.permute.xlu1 %2131  ;;  %2267 = vmatprep.subr.bf16.mxu0 %v2234_v58  ;;  %v2236_v40 = vpack.c.bf16 %v2176_v49, %v4969_v22 }
 0x748   : > { %2268 = vmatpush1.bf16.msra.mxu0 %v2233_v46  ;;  %v2139_v28 = vsel %vm636_vm5, %v2130_v62, %v2132_v24 }
 0x749   : > { %2310 = vmatprep.subr.bf16.mxu1 %v2236_v40  ;;  %v2134_v39 = vpop.permute.xlu0 %2133  ;;  %v2142_v44 = vmul.f32 %v2139_v28, %v3877_v2 }
 0x74a   : > { %2311 = vmatpush1.bf16.msra.mxu1 %v2235_v53  ;;  %v2138_v37 = vsel %vm636_vm5, %v2132_v24, %v2134_v39 }
 0x74b   : > { %v2136_v63 = vpop.permute.xlu1 %2135 }
 0x74c   : > { %v2137_v34 = vsel %vm636_vm5, %v2134_v39, %v2136_v63  ;;  %v2140_v43 = vsel %vm636_vm5, %v2136_v63, %v2130_v62  ;;  %v2143_v39 = vmul.f32 %v2138_v37, %v3888_v59 }
 0x74d   : > { %v2146_v11 = vpop.permute.xlu0 %2145  ;;  %v2141_v40 = vmul.f32 %v2140_v43, %v3885_v3  ;;  %v2144_v62 = vmul.f32 %v2137_v34, %v3891_v60 }
 0x74f   : > { %v2148_v13 = vpop.permute.xlu1 %2147 }
 0x750   : > { %v2155_v48 = vsel %vm669_vm6, %v2146_v11, %v2148_v13 }
 0x751   : > { %v2158_v10 = vmul.f32 %v2155_v48, %v3880_v0  ;;  %v2150_v32 = vpop.permute.xlu0 %2149 }
 0x752   : > { %v2154_v45 = vsel %vm669_vm6, %v2148_v13, %v2150_v32 }
 0x753   : > { %v2152_v51 = vpop.permute.xlu1 %2151  ;;  %v2230_v49 = vpack.c.bf16 %v2158_v10, %v2142_v44  ;;  %v2159_v58 = vmul.f32 %v2154_v45, %v3901_v8 }
 0x754   : > { %v2153_v46 = vsel %vm669_vm6, %v2150_v32, %v2152_v51  ;;  %v2156_v53 = vsel %vm669_vm6, %v2152_v51, %v2146_v11 }
 0x755   : > { %v2157_v63 = vmul.f32 %v2156_v53, %v3898_v6  ;;  %v2160_v28 = vmul.f32 %v2153_v46, %v3908_v16  ;;  %2269 = vmatprep.subr.bf16.mxu0 %v2230_v49  ;;  %v2098_v24 = vpop.permute.xlu0 %2097  ;;  %v2231_v10 = vpack.c.bf16 %v2159_v58, %v2143_v39 }
 0x757   : > { %v2229_v13 = vpack.c.bf16 %v2157_v63, %v2141_v40  ;;  %v2100_v48 = vpop.permute.xlu1 %2099  ;;  %v2232_v44 = vpack.c.bf16 %v2160_v28, %v2144_v62 }
 0x758   : > { %v2107_v34 = vsel %vm570_vm7, %v2098_v24, %v2100_v48 }
 0x759   : > { %2270 = vmatpush1.bf16.msra.mxu0 %v2229_v13  ;;  %2312 = vmatprep.subr.bf16.mxu1 %v2232_v44  ;;  %v2102_v32 = vpop.permute.xlu0 %2101  ;;  %v2110_v49 = vmul.f32 %v2107_v34, %v3929_v56 }
 0x75a   : > { %2313 = vmatpush1.bf16.msra.mxu1 %v2231_v10  ;;  %v2106_v62 = vsel %vm570_vm7, %v2100_v48, %v2102_v32 }
 0x75b   : > { %v2104_v11 = vpop.permute.xlu1 %2103  ;;  %v2111_v48 = vmul.f32 %v2106_v62, %v5556_v35 }
 0x75c   : > { %v2105_v58 = vsel %vm570_vm7, %v2102_v32, %v2104_v11  ;;  %v2108_v53 = vsel %vm570_vm7, %v2104_v11, %v2098_v24 }
 0x75d   : > { %v2114_v43 = vpop.permute.xlu0 %2113  ;;  %v2109_v10 = vmul.f32 %v2108_v53, %v3937_v1  ;;  %v2112_v24 = vmul.f32 %v2105_v58, %v3943_v61 }
 0x75f   : > { %v2116_v45 = vpop.permute.xlu1 %2115 }
 0x760   : > { %v2123_v51 = vsel %vm603_vm8, %v2114_v43, %v2116_v45 }
 0x761   : > { %v2126_v37 = vmul.f32 %v2123_v51, %v3932_v57  ;;  %v2118_v46 = vpop.permute.xlu0 %2117 }
 0x762   : > { %v2122_v40 = vsel %vm603_vm8, %v2116_v45, %v2118_v46 }
 0x763   : > { %v2120_v63 = vpop.permute.xlu1 %2119  ;;  %v2226_v28 = vpack.c.bf16 %v2126_v37, %v2110_v49  ;;  %v2127_v39 = vmul.f32 %v2122_v40, %v3953_v14  ;;  %v5602_v49 = vld [vmem:[#allocation25_spill] sm:$0xff]  ;;  %v5603_v40 = vld [vmem:[#allocation32_spill] sm:$0xff] }
 0x764   : > { %v2121_v13 = vsel %vm603_vm8, %v2118_v46, %v2120_v63  ;;  %v2124_v44 = vsel %vm603_vm8, %v2120_v63, %v2114_v43 }
 0x765   : > { %v2125_v11 = vmul.f32 %v2124_v44, %v3950_v9  ;;  %v2128_v34 = vmul.f32 %v2121_v13, %v3960_v19  ;;  %2271 = vmatprep.subr.bf16.mxu0 %v2226_v28  ;;  %v2227_v51 = vpack.c.bf16 %v2127_v39, %v2111_v48  ;;  %v5604_v28 = vld [vmem:[#allocation31_spill] sm:$0xff]  ;;  %v5606_v48 = vld [vmem:[#allocation33_spill] sm:$0xff] }
 0x767   : > { %v2225_v32 = vpack.c.bf16 %v2125_v11, %v2109_v10  ;;  %v2228_v45 = vpack.c.bf16 %v2128_v34, %v2112_v24  ;;  %v5605_v10 = vld [vmem:[#allocation30_spill] sm:$0xff] }
 0x769   : > { %2272 = vmatpush1.bf16.msra.mxu0 %v2225_v32  ;;  %2314 = vmatprep.subr.bf16.mxu1 %v2228_v45 }
 0x76a   : > { %2315 = vmatpush1.bf16.msra.mxu1 %v2227_v51 }
 0x76c   : > { %3012 = vmatmul.mubr.msk.bf16.vlgmr.msra.gmra.mxu0 %vm851_vm9, %v5602_v49 }
 0x76d   : > { %3014 = vmatmul.mubr.msk.bf16.vlgmr.msra.gmra.mxu1 %vm851_vm9, %v5602_v49  ;;  %2595 = vmatprep.mubr.bf16.mxu0 %v5568_v27 }
 0x76e   : > { %2636 = vmatprep.mubr.bf16.mxu1 %v5568_v27 }
 0x82c   : > { %v5143_v43 = vpop.f32.mrf.mxu0 }
 0x82d   : > { %v5145_v37 = vpop.f32.mrf.mxu1  ;;  %v2343_v7 = vadd.f32 %v5143_v43, %v4920_v29 }
 0x82e   : > { %v5147_v46 = vpop.f32.mrf.mxu0 }
 0x82f   : > { %v5149_v58 = vpop.f32.mrf.mxu1 }
 0x830   : > { %v2295_v53 = vpop.f32.mrf.mxu0 }
 0x831   : > { %v2347_v62 = vadd.f32 %v2295_v53, %v5603_v40  ;;  %v2338_v63 = vpop.f32.mrf.mxu1 }
 0x832   : > { %v2349_v39 = vadd.f32 %v2338_v63, %v5604_v28  ;;  %v2297_v13 = vpop.f32.mrf.mxu0 }
 0x833   : > { %v3019_v44 = vmul.f32 -1.442695, %v2347_v62  ;;  %v2348_v24 = vadd.f32 %v2297_v13, %v5605_v10  ;;  %v2340_v11 = vpop.f32.mrf.mxu1 }
 0x834   : > { %v3021_v34 = vmul.f32 -1.442695, %v2349_v39  ;;  %v2350_v32 = vadd.f32 %v2340_v11, %v5606_v48 }
 0x835   : > { %3166 = vpow2.f32 %v3019_v44  ;;  %v3020_v45 = vmul.f32 -1.442695, %v2348_v24 }
 0x836   : > { %3168 = vpow2.f32 %v3021_v34  ;;  %v3022_v51 = vmul.f32 -1.442695, %v2350_v32  ;;  %v2678_v34 = vld [vmem:[%s5445_s12] sm:$0xff] }
 0x837   : > { %3170 = vpow2.f32 %v3020_v45 }
 0x838   : > { %3172 = vpow2.f32 %v3022_v51  ;;  %v3223_v51 = vld [vmem:[#allocation2 + $0x20] ss:$0 sm:$0xff] }
 0x842   : > { %v3167_v49 = vpop.eup %3166 }
 0x843   : > { %v3169_v38 = vpop.eup %3168  ;;  %v2379_v53 = vadd.f32 1.0, %v3167_v49 }
 0x844   : > { %v3171_v40 = vpop.eup %3170  ;;  %v2381_v33 = vadd.f32 1.0, %v3169_v38 }
 0x845   : > { %v3173_v63 = vpop.eup %3172  ;;  %3174 = vrcp.f32 %v2379_v53  ;;  %v2380_v62 = vadd.f32 1.0, %v3171_v40 }
 0x846   : > { %3176 = vrcp.f32 %v2381_v33  ;;  %v2382_v28 = vadd.f32 1.0, %v3173_v63 }
 0x847   : > { %3178 = vrcp.f32 %v2380_v62  ;;  %v3224_v62 = vld [vmem:[#allocation2 + $0x28] ss:$0 sm:$0xff] }
 0x848   : > { %3180 = vrcp.f32 %v2382_v28 }
 0x852   : > { %v3175_v39 = vpop.eup %3174 }
 0x853   : > { %v3177_v13 = vpop.eup %3176  ;;  %v5156_v44 = vmul.f32 %v3175_v39, %v4957_v15 }
 0x854   : > { %v3179_v10 = vpop.eup %3178  ;;  %v5164_v11 = vmul.f32 %v3177_v13, %v4964_v55 }
 0x855   : > { %v5159_v24 = vmul.f32 %v3179_v10, %v4960_v4  ;;  %2515 = vrot.lane.b32.xlu0 %v5156_v44, %s3413_s27  ;;  %v3181_v38 = vpop.eup %3180 }
 0x856   : > { %v5169_v33 = vmul.f32 %v3181_v38, %v4969_v22  ;;  %v3225_v22 = vld [vmem:[#allocation2 + $0x38] ss:$0 sm:$0xff] }
 0x857   : > { %2517 = vrot.lane.b32.xlu1 %v5159_v24, %s3413_s27 }
 0x859   : > { %2519 = vrot.lane.b32.xlu0 %v5164_v11, %s3413_s27 }
 0x85b   : > { %2521 = vrot.lane.b32.xlu1 %v5169_v33, %s3413_s27  ;;  %s3312_s27 = sshll.u32 %s3422_s16, 4  ;;  %s3313_s27 = int_to_ptr.vmem [resolvable:$false] %s3312_s27 }
 0x85d   : > { %2483 = vrot.lane.b32.xlu0 %v5156_v44, %s3414_s17 }
 0x85f   : > { %2485 = vrot.lane.b32.xlu1 %v5159_v24, %s3414_s17 }
 0x861   : > { %2487 = vrot.lane.b32.xlu0 %v5164_v11, %s3414_s17 }
 0x863   : > { %2489 = vrot.lane.b32.xlu1 %v5169_v33, %s3414_s17  ;;  %s3314_s17 = scalar_lea.vmem %s3313_s27, 1024 }
 0x865   : > { %2499 = vrot.lane.b32.xlu0 %v5156_v44, %s3415_s21 }
 0x867   : > { %2501 = vrot.lane.b32.xlu1 %v5159_v24, %s3415_s21 }
 0x869   : > { %2503 = vrot.lane.b32.xlu0 %v5164_v11, %s3415_s21 }
 0x86b   : > { %2505 = vrot.lane.b32.xlu1 %v5169_v33, %s3415_s21  ;;  %s544_s21 = scalar_lea.vmem [#allocation9], %s3667_s24 }
 0x86c   : > { %s2824_s26 = sshll.u32 %s544_s21, 4  ;;  %s2825_s26 = int_to_ptr.vmem [resolvable:$true] %s2824_s26 }
 0x86d   : > { %2467 = vrot.lane.b32.xlu0 %v5156_v44, %s3416_s25  ;;  %s3308_s29 = scalar_lea.vmem %s2825_s26, 512  ;;  %p3315_p4 = scmp.lt.s32.totalorder %s2825_s26, %s3313_s27 }
 0x86e   : > { %p3309_p11 = scmp.ne.s32.totalorder %s2825_s26, %s3308_s29  ;;  %p3316_p13 = scmp.lt.s32.totalorder %s3314_s17, %s3308_s29 }
 0x86f   : > { %2469 = vrot.lane.b32.xlu1 %v5159_v24, %s3416_s25 }
 0x870   : > { %p3310_p3 = pnand %p3309_p11, %p5616_p8  ;;  %p3317_p1 = por %p3316_p13, %p3315_p4 }
 0x871   : > { %2471 = vrot.lane.b32.xlu0 %v5164_v11, %s3416_s25 }
 0x872   : > { %p3311_p2 = pneg %p3310_p3 }
 0x873   : > { %2473 = vrot.lane.b32.xlu1 %v5169_v33, %s3416_s25 }
 0x874   : > { %p3318_p12 = pnand %p3317_p1, %p3311_p2 }
 0x875   : > { %2435 = vrot.lane.b32.xlu0 %v5156_v44, %s3417_s23 }
 0x877   : > { %2437 = vrot.lane.b32.xlu1 %v5159_v24, %s3417_s23 }
 0x879   : > { %2439 = vrot.lane.b32.xlu0 %v5164_v11, %s3417_s23 }
 0x87b   : > { %2441 = vrot.lane.b32.xlu1 %v5169_v33, %s3417_s23 }
 0x87d   : > { %2451 = vrot.lane.b32.xlu0 %v5156_v44, %s3418_s1 }
 0x87f   : > { %2453 = vrot.lane.b32.xlu1 %v5159_v24, %s3418_s1 }
 0x881   : > { %2455 = vrot.lane.b32.xlu0 %v5164_v11, %s3418_s1 }
 0x883   : > { %2457 = vrot.lane.b32.xlu1 %v5169_v33, %s3418_s1  ;;  %s5614_s1 = sld [smem:[#allocation44_spill]] }
 0x885   : > { %2403 = vrot.lane.b32.xlu0 %v5156_v44, %s3419_s28 }
 0x887   : > { %2405 = vrot.lane.b32.xlu1 %v5159_v24, %s3419_s28 }
 0x889   : > { %2407 = vrot.lane.b32.xlu0 %v5164_v11, %s3419_s28 }
 0x88b   : > { %2409 = vrot.lane.b32.xlu1 %v5169_v33, %s3419_s28  ;;  %s3041_s28 = sshll.u32 %s3577_s13, 9 }
 0x88c   : > { %s2822_s15 = scalar_lea.hbm %s5615_s14, %s3041_s28 }
 0x88d   : > { %2419 = vrot.lane.b32.xlu0 %v5156_v44, %s3421_s18 }
 0x88f   : > { %2421 = vrot.lane.b32.xlu1 %v5159_v24, %s3421_s18 }
 0x891   : > { %2423 = vrot.lane.b32.xlu0 %v5164_v11, %s3421_s18 }
 0x893   : > { %2425 = vrot.lane.b32.xlu1 %v5169_v33, %s3421_s18 }
 0x895   : > { %2681 = vperm.xlu0 %3121, %v2678_v34  }
 0x8c7   : > { %v2516_v48 = vpop.permute.xlu0 %2515 }
 0x8c9   : > { %v2518_v32 = vpop.permute.xlu1 %2517 }
 0x8ca   : > { %v2525_v45 = vsel %vm801_vm0, %v2516_v48, %v2518_v32 }
 0x8cb   : > { %v2527_v49 = vmul.f32 %v3223_v51, %v2525_v45  ;;  %v2520_v53 = vpop.permute.xlu0 %2519 }
 0x8cc   : > { %v2524_v40 = vsel %vm801_vm0, %v2518_v32, %v2520_v53 }
 0x8cd   : > { %v2547_v63 = vpack.c.bf16 %v2527_v49, %v2527_v49  ;;  %v2528_v28 = vmul.f32 %v3224_v62, %v2524_v40  ;;  %v2522_v39 = vpop.permute.xlu1 %2521 }
 0x8ce   : > { %v2523_v13 = vsel %vm801_vm0, %v2520_v53, %v2522_v39  ;;  %v2526_v10 = vsel %vm801_vm0, %v2522_v39, %v2516_v48 }
 0x8cf   : > { %v2548_v38 = vpack.c.bf16 %v2528_v28, %v2528_v28  ;;  %v2529_v34 = vmul.f32 %v5041_v31, %v2523_v13  ;;  %v2530_v4 = vmul.f32 %v3225_v22, %v2526_v10  ;;  %v2484_v45 = vpop.permute.xlu0 %2483  ;;  %v2552_v32 = vsel %vm855_vm1, %v2547_v63, 0 }
 0x8d1   : > { %v2549_v51 = vpack.c.bf16 %v2529_v34, %v2529_v34  ;;  %v2550_v55 = vpack.c.bf16 %v2530_v4, %v2530_v4  ;;  %v2486_v15 = vpop.permute.xlu1 %2485  ;;  %3023 = vmatprep.subr.msk.bf16.mxu0 %vm855_vm1, %v2548_v38 }
 0x8d2   : > { %2570 = vmatpush1.bf16.msra.mxu0 %v2552_v32  ;;  %v2493_v62 = vsel %vm735_vm3, %v2484_v45, %v2486_v15 }
 0x8d3   : > { %3025 = vmatprep.subr.msk.bf16.mxu1 %vm855_vm1, %v2550_v55  ;;  %v2488_v49 = vpop.permute.xlu0 %2487  ;;  %v2558_v53 = vsel %vm855_vm1, %v2549_v51, 0  ;;  %v2495_v51 = vmul.f32 %v2493_v62, %v5584_v12 }
 0x8d4   : > { %2611 = vmatpush1.bf16.msra.mxu1 %v2558_v53  ;;  %v2492_v22 = vsel %vm735_vm3, %v2486_v15, %v2488_v49 }
 0x8d5   : > { %v2490_v48 = vpop.permute.xlu1 %2489  ;;  %v2496_v10 = vmul.f32 %v2492_v22, %v5600_v5 }
 0x8d6   : > { %v2491_v63 = vsel %vm735_vm3, %v2488_v49, %v2490_v48  ;;  %v2494_v28 = vsel %vm735_vm3, %v2490_v48, %v2484_v45 }
 0x8d7   : > { %v2500_v40 = vpop.permute.xlu0 %2499  ;;  %v2497_v15 = vmul.f32 %v2491_v63, %v3805_v47 }
 0x8d9   : > { %v2502_v31 = vpop.permute.xlu1 %2501 }
 0x8da   : > { %v2509_v4 = vsel %vm768_vm2, %v2500_v40, %v2502_v31 }
 0x8db   : > { %v2504_v55 = vpop.permute.xlu0 %2503  ;;  %v2511_v39 = vmul.f32 %v2509_v4, %v5599_v42  ;;  %v2498_v42 = vmul.f32 %v2494_v28, %v3795_v41 }
 0x8dc   : > { %v2508_v13 = vsel %vm768_vm2, %v2502_v31, %v2504_v55 }
 0x8dd   : > { %v2512_v38 = vmul.f32 %v2508_v13, %v5601_v20  ;;  %v2506_v34 = vpop.permute.xlu1 %2505  ;;  %v2543_v20 = vpack.c.bf16 %v2511_v39, %v2495_v51 }
 0x8de   : > { %v2507_v32 = vsel %vm768_vm2, %v2504_v55, %v2506_v34  ;;  %v2510_v45 = vsel %vm768_vm2, %v2506_v34, %v2500_v40 }
 0x8df   : > { %v2513_v49 = vmul.f32 %v2507_v32, %v3819_v52  ;;  %v2514_v53 = vmul.f32 %v2510_v45, %v3813_v50  ;;  %v2468_v5 = vpop.permute.xlu0 %2467  ;;  %v2544_v48 = vpack.c.bf16 %v2512_v38, %v2496_v10 }
 0x8e1   : > { %v2545_v31 = vpack.c.bf16 %v2513_v49, %v2497_v15  ;;  %v2470_v22 = vpop.permute.xlu1 %2469  ;;  %2571 = vmatprep.subr.bf16.mxu0 %v2544_v48  ;;  %v2546_v12 = vpack.c.bf16 %v2514_v53, %v2498_v42 }
 0x8e2   : > { %v2477_v47 = vsel %vm702_vm4, %v2468_v5, %v2470_v22  ;;  %2572 = vmatpush1.bf16.msra.mxu0 %v2543_v20 }
 0x8e3   : > { %2612 = vmatprep.subr.bf16.mxu1 %v2546_v12  ;;  %v2472_v4 = vpop.permute.xlu0 %2471  ;;  %v2479_v40 = vmul.f32 %v2477_v47, %v3845_v21 }
 0x8e4   : > { %v2476_v41 = vsel %vm702_vm4, %v2470_v22, %v2472_v4  ;;  %2613 = vmatpush1.bf16.msra.mxu1 %v2545_v31 }
 0x8e5   : > { %v2480_v50 = vmul.f32 %v2476_v41, %v3853_v25  ;;  %v2474_v52 = vpop.permute.xlu1 %2473  ;;  %v2539_v13 = vpack.c.bf16 %v2479_v40, %v5156_v44 }
 0x8e6   : > { %v2475_v62 = vsel %vm702_vm4, %v2472_v4, %v2474_v52  ;;  %v2478_v63 = vsel %vm702_vm4, %v2474_v52, %v2468_v5 }
 0x8e7   : > { %v2481_v55 = vmul.f32 %v2475_v62, %v3856_v26  ;;  %v2482_v28 = vmul.f32 %v2478_v63, %v3848_v23  ;;  %v2436_v39 = vpop.permute.xlu0 %2435  ;;  %v2540_v21 = vpack.c.bf16 %v2480_v50, %v5159_v24 }
 0x8e9   : > { %v2541_v10 = vpack.c.bf16 %v2481_v55, %v5164_v11  ;;  %v2438_v38 = vpop.permute.xlu1 %2437  ;;  %2573 = vmatprep.subr.bf16.mxu0 %v2540_v21  ;;  %v2542_v25 = vpack.c.bf16 %v2482_v28, %v5169_v33 }
 0x8ea   : > { %2574 = vmatpush1.bf16.msra.mxu0 %v2539_v13  ;;  %v2445_v23 = vsel %vm636_vm5, %v2436_v39, %v2438_v38 }
 0x8eb   : > { %2614 = vmatprep.subr.bf16.mxu1 %v2542_v25  ;;  %v2440_v34 = vpop.permute.xlu0 %2439  ;;  %v2448_v44 = vmul.f32 %v2445_v23, %v3877_v2 }
 0x8ec   : > { %2615 = vmatpush1.bf16.msra.mxu1 %v2541_v10  ;;  %v2444_v49 = vsel %vm636_vm5, %v2438_v38, %v2440_v34 }
 0x8ed   : > { %v2442_v51 = vpop.permute.xlu1 %2441  ;;  %v2449_v4 = vmul.f32 %v2444_v49, %v3888_v59 }
 0x8ee   : > { %v2443_v33 = vsel %vm636_vm5, %v2440_v34, %v2442_v51  ;;  %v2446_v45 = vsel %vm636_vm5, %v2442_v51, %v2436_v39 }
 0x8ef   : > { %v2452_v15 = vpop.permute.xlu0 %2451  ;;  %v2447_v20 = vmul.f32 %v2446_v45, %v3885_v3  ;;  %v2450_v31 = vmul.f32 %v2443_v33, %v3891_v60 }
 0x8f1   : > { %v2454_v26 = vpop.permute.xlu1 %2453 }
 0x8f2   : > { %v2461_v24 = vsel %vm669_vm6, %v2452_v15, %v2454_v26 }
 0x8f3   : > { %v2464_v11 = vmul.f32 %v2461_v24, %v3880_v0  ;;  %v2456_v32 = vpop.permute.xlu0 %2455 }
 0x8f4   : > { %v2460_v42 = vsel %vm669_vm6, %v2454_v26, %v2456_v32 }
 0x8f5   : > { %v2458_v53 = vpop.permute.xlu1 %2457  ;;  %v2536_v5 = vpack.c.bf16 %v2464_v11, %v2448_v44  ;;  %v2465_v48 = vmul.f32 %v2460_v42, %v3901_v8 }
 0x8f6   : > { %v2459_v2 = vsel %vm669_vm6, %v2456_v32, %v2458_v53  ;;  %v2462_v0 = vsel %vm669_vm6, %v2458_v53, %v2452_v15  ;;  %v5608_v53 = vld [vmem:[#allocation37_spill] sm:$0xff] }
 0x8f7   : > { %v2463_v22 = vmul.f32 %v2462_v0, %v3898_v6  ;;  %v2466_v12 = vmul.f32 %v2459_v2, %v3908_v16  ;;  %2575 = vmatprep.subr.bf16.mxu0 %v2536_v5  ;;  %v2404_v47 = vpop.permute.xlu0 %2403  ;;  %v2537_v50 = vpack.c.bf16 %v2465_v48, %v2449_v4  ;;  %v5609_v2 = vld [vmem:[#allocation26_spill] sm:$0xff] }
 0x8f9   : > { %v2535_v40 = vpack.c.bf16 %v2463_v22, %v2447_v20  ;;  %v2406_v8 = vpop.permute.xlu1 %2405  ;;  %v2538_v41 = vpack.c.bf16 %v2466_v12, %v2450_v31 }
 0x8fa   : > { %v2413_v60 = vsel %vm570_vm7, %v2404_v47, %v2406_v8 }
 0x8fb   : > { %2576 = vmatpush1.bf16.msra.mxu0 %v2535_v40  ;;  %2616 = vmatprep.subr.bf16.mxu1 %v2538_v41  ;;  %v2408_v52 = vpop.permute.xlu0 %2407  ;;  %v2416_v63 = vmul.f32 %v2413_v60, %v3929_v56  ;;  %v5610_v60 = vld [vmem:[#allocation28_spill] sm:$0xff] }
 0x8fc   : > { %2617 = vmatpush1.bf16.msra.mxu1 %v2537_v50  ;;  %v2412_v13 = vsel %vm570_vm7, %v2406_v8, %v2408_v52 }
 0x8fd   : > { %v2410_v62 = vpop.permute.xlu1 %2409  ;;  %v2417_v26 = vmul.f32 %v2412_v13, %v5556_v35 }
 0x8fe   : > { %v2411_v28 = vsel %vm570_vm7, %v2408_v52, %v2410_v62  ;;  %v2414_v39 = vsel %vm570_vm7, %v2410_v62, %v2404_v47 }
 0x8ff   : > { %v2420_v3 = vpop.permute.xlu0 %2419  ;;  %v2415_v34 = vmul.f32 %v2414_v39, %v3937_v1  ;;  %v2418_v51 = vmul.f32 %v2411_v28, %v3943_v61  ;;  %v2345_v1 = vadd.f32 %v5145_v37, %v4926_v54  ;;  %v2344_v61 = vadd.f32 %v5147_v46, %v4923_v36 }
 0x901   : > { %v2422_v6 = vpop.permute.xlu1 %2421  ;;  %v3017_v35 = vmul.f32 -1.442695, %v2345_v1  ;;  %v3016_v11 = vmul.f32 -1.442695, %v2344_v61  ;;  %v2673_v1 = vld [vmem:[%s5614_s1] sm:$0xf] }
 0x902   : > { %v2429_v16 = vsel %vm603_vm8, %v2420_v3, %v2422_v6 }
 0x903   : > { %v2432_v59 = vmul.f32 %v2429_v16, %v3932_v57  ;;  %v2424_v55 = vpop.permute.xlu0 %2423 }
 0x904   : > { %v2428_v21 = vsel %vm603_vm8, %v2422_v6, %v2424_v55 }
 0x905   : > { %v2426_v10 = vpop.permute.xlu1 %2425  ;;  %v2532_v38 = vpack.c.bf16 %v2432_v59, %v2416_v63  ;;  %v2433_v25 = vmul.f32 %v2428_v21, %v3953_v14  ;;  %v5611_v59 = vld [vmem:[#allocation29_spill] sm:$0xff]  ;;  %v5612_v21 = vld [vmem:[#allocation27_spill] sm:$0xff] }
 0x906   : > { %v2427_v56 = vsel %vm603_vm8, %v2424_v55, %v2426_v10  ;;  %v2430_v57 = vsel %vm603_vm8, %v2426_v10, %v2420_v3 }
 0x907   : > { %v2431_v15 = vmul.f32 %v2430_v57, %v3950_v9  ;;  %v2434_v23 = vmul.f32 %v2427_v56, %v3960_v19  ;;  %2577 = vmatprep.subr.bf16.mxu0 %v2532_v38  ;;  %v2533_v14 = vpack.c.bf16 %v2433_v25, %v2417_v26  ;;  %v2346_v9 = vadd.f32 %v5149_v58, %v4931_v17  ;;  %v5607_v58 = vld [vmem:[#allocation36_spill] sm:$0xff] }
 0x908   : > { %v3015_v19 = vmul.f32 -1.442695, %v2343_v7  ;;  %v5613_v25 = vld [vmem:[#allocation24_spill] sm:$0xff] }
 0x909   : > { %v2531_v24 = vpack.c.bf16 %v2431_v15, %v2415_v34  ;;  %v2534_v44 = vpack.c.bf16 %v2434_v23, %v2418_v51 }
 0x90a   : > { %3182 = vpow2.f32 %v3015_v19 }
 0x90b   : > { %2578 = vmatpush1.bf16.msra.mxu0 %v2531_v24  ;;  %2618 = vmatprep.subr.bf16.mxu1 %v2534_v44  ;;  %3184 = vpow2.f32 %v3017_v35 }
 0x90c   : > { %2619 = vmatpush1.bf16.msra.mxu1 %v2533_v14  ;;  %3186 = vpow2.f32 %v3016_v11 }
 0x90e   : > { %3024 = vmatmul.mubr.msk.bf16.vlgmr.msra.gmra.mxu0 %vm851_vm9, %v4911_v18 }
 0x90f   : > { %3026 = vmatmul.mubr.msk.bf16.vlgmr.msra.gmra.mxu1 %vm851_vm9, %v4911_v18  ;;  %2732 = vmatprep.mubr.bf16.mxu0 %v5568_v27  ;;  %v3018_v18 = vmul.f32 -1.442695, %v2346_v9 }
 0x910   : > { %2773 = vmatprep.mubr.bf16.mxu1 %v5568_v27 }
 0x911   : > { %3188 = vpow2.f32 %v3018_v18 }
 0x917   : > { %v3183_v27 = vpop.eup %3182 }
 0x918   : > { %v3185_v32 = vpop.eup %3184  ;;  %v2375_v33 = vadd.f32 1.0, %v3183_v27 }
 0x919   : > { %v3187_v29 = vpop.eup %3186  ;;  %v2377_v54 = vadd.f32 1.0, %v3185_v32 }
 0x91a   : > { %v2376_v37 = vadd.f32 1.0, %v3187_v29  ;;  %3190 = vrcp.f32 %v2375_v33 }
 0x91b   : > { %3192 = vrcp.f32 %v2377_v54 }
 0x91c   : > { %3194 = vrcp.f32 %v2376_v37 }
 0x91e   : > { %v3189_v43 = vpop.eup %3188 }
 0x91f   : > { %v2378_v45 = vadd.f32 1.0, %v3189_v43 }
 0x921   : > { %3196 = vrcp.f32 %v2378_v45 }
 0x927   : > { %v3191_v47 = vpop.eup %3190 }
 0x928   : > { %v3193_v4 = vpop.eup %3192  ;;  %v2653_v8 = vsub.f32 1.0, %v3191_v47 }
 0x929   : > { %v2655_v41 = vsub.f32 1.0, %v3193_v4 }
 0x92a   : > { %v2657_v6 = vmul.f32 %v2653_v8, %v5610_v60 }
 0x92b   : > { %v2659_v55 = vmul.f32 %v2655_v41, %v5611_v59 }
 0x9ce   : > { %v2597_v36 = vpop.f32.mrf.mxu0 }
 0x9cf   : > { %v2645_v17 = vadd.f32 %v2597_v36, %v4940_v30  ;;  %v2638_v46 = vpop.f32.mrf.mxu1  ;;  %v3195_v30 = vpop.eup %3194 }
 0x9d0   : > { %v2647_v42 = vadd.f32 %v2638_v46, %v5607_v58  ;;  %v2599_v49 = vpop.f32.mrf.mxu0  ;;  %v3197_v40 = vpop.eup %3196  ;;  %v2654_v50 = vsub.f32 1.0, %v3195_v30 }
 0x9d1   : > { %3198 = vtanh.f32 %v2645_v17  ;;  %v2646_v5 = vadd.f32 %v2599_v49, %v5608_v53  ;;  %v2640_v48 = vpop.f32.mrf.mxu1  ;;  %v2656_v62 = vsub.f32 1.0, %v3197_v40 }
 0x9d2   : > { %3200 = vtanh.f32 %v2647_v42  ;;  %v2648_v0 = vadd.f32 %v2640_v48, %v5609_v2  ;;  %v2601_v20 = vpop.f32.mrf.mxu0  ;;  %v2658_v13 = vmul.f32 %v2654_v50, %v5612_v21 }
 0x9d3   : > { %3202 = vtanh.f32 %v2646_v5  ;;  %v2642_v31 = vpop.f32.mrf.mxu1  ;;  %v2660_v56 = vmul.f32 %v2656_v62, %v5613_v25 }
 0x9d4   : > { %3204 = vtanh.f32 %v2648_v0  ;;  %v2602_v22 = vpop.f32.mrf.mxu0 }
 0x9d5   : > { %v2643_v12 = vpop.f32.mrf.mxu1 }
 0x9de   : > { %v3199_v52 = vpop.eup %3198 }
 0x9df   : > { %v3201_v3 = vpop.eup %3200  ;;  %v2661_v16 = vmul.f32 %v3199_v52, %v3191_v47 }
 0x9e0   : > { %v3203_v63 = vpop.eup %3202  ;;  %v2663_v28 = vmul.f32 %v3201_v3, %v3193_v4 }
 0x9e1   : > { %v3205_v39 = vpop.eup %3204  ;;  %v2662_v10 = vmul.f32 %v3203_v63, %v3195_v30  ;;  %v2665_v38 = vadd.f32 %v2661_v16, %v2657_v6 }
 0x9e2   : > { %v2664_v57 = vmul.f32 %v3205_v39, %v3197_v40  ;;  %v2667_v34 = vadd.f32 %v2663_v28, %v2659_v55 }
 0x9e3   : > { %v2666_v51 = vadd.f32 %v2662_v10, %v2658_v13  ;;  %2669 = vst [vmem:[%s544_s21] sm:$0xff] %v2665_v38  ;;  %v2674_v15 = vpack.c.bf16 %v2665_v38, %v2665_v38 }
 0x9e4   : > { %v2668_v23 = vadd.f32 %v2664_v57, %v2660_v56  ;;  %2671 = vst [vmem:[%s544_s21 + $0x10] sm:$0xff] %v2667_v34  ;;  %v2676_v26 = vpack.c.bf16 %v2667_v34, %v2667_v34 }
 0x9e5   : > { %2670 = vst [vmem:[%s544_s21 + $0x8] sm:$0xff] %v2666_v51  ;;  %v2675_v24 = vpack.c.bf16 %v2666_v51, %v2666_v51  ;;  %v2689_v14 = vsel %vm855_vm1, %v2674_v15, 0 }
 0x9e6   : > { %2672 = vst [vmem:[%s544_s21 + $0x18] sm:$0xff] %v2668_v23  ;;  %v2677_v44 = vpack.c.bf16 %v2668_v23, %v2668_v23  ;;  %v2695_v7 = vsel %vm855_vm1, %v2676_v26, 0 }
 0x9e7   : > { %3027 = vmatprep.subr.msk.bf16.mxu0 %vm855_vm1, %v2675_v24 }
 0x9e8   : > { %2715 = vmatpush1.bf16.msra.mxu0 %v2689_v14  ;;  %3029 = vmatprep.subr.msk.bf16.mxu1 %vm855_vm1, %v2677_v44 }
 0x9e9   : > { %2756 = vmatpush1.bf16.msra.mxu1 %v2695_v7 }
 0x9eb   : > { %3028 = vmatmul.mubr.msk.bf16.vlgmr.msra.gmra.mxu0 %vm2684_vm10, %v2673_v1 }
 0x9ec   : > { %3030 = vmatmul.mubr.msk.bf16.vlgmr.msra.gmra.mxu1 %vm2684_vm10, %v2673_v1 }
 0x9ed   : > { %3321 = shalt.err (!%p3318_p12)
}
 0x9ee   : > { %s3322_s25 = scalar_lea.hbm %s2822_s15, 512  ;;  %s3326_s1 = scalar_lea.hbm %s5615_s14, 1024 }
 0x9ef   : > { %p3323_p7 = scmp.ne.s32.totalorder %s2822_s15, %s3322_s25  ;;  %p3327_p5 = scmp.lt.s32.totalorder %s2822_s15, %s5615_s14 }
 0x9f0   : > { %p3328_p9 = scmp.lt.s32.totalorder %s3326_s1, %s3322_s25 }
 0x9f1   : > { %p3324_p0 = pnand %p3323_p7, %p5616_p8 }
 0x9f2   : > { %p3329_p10 = por %p3328_p9, %p3327_p5 }
 0x9f3   : > { %p3325_p6 = pneg %p3324_p0 }
 0x9f5   : > { %p3330_p11 = pnand %p3329_p10, %p3325_p6 }
 0x9f7   : > { %3333 = shalt.err (!%p3330_p11)
}
 0x9f8   : > { %3052 = dma.vmem_to_hbm [thread:$0]  (%p5616_p8), %s2825_s26, 512, %s2822_s15, %s2796_s11   ;;  %v2682_v61 = vpop.permute.xlu0 %2681 }
 0x9f9   : > { %s537_s15 = scalar_lea.vmem [#allocation8], %s3667_s24  ;;  %s5617_s16 = sld [smem:[#allocation45_spill]] }
 0x9fa   : > { %s2810_s26 = sshll.u32 %s537_s15, 4  ;;  %s2791_s24 = scalar_lea.sflag [#allocation4], %s3664_s22  ;;  %s5392_s26 = int_to_ptr.vmem [resolvable:$true] %s2810_s26 }
 0x9fb   : > { %s3334_s25 = scalar_lea.vmem %s5392_s26, 512  ;;  %s3423_s13 = smov [#allocation8]  }
 0x9fc   : > { %p3335_p3 = scmp.ne.s32.totalorder %s5392_s26, %s3334_s25  ;;  %s3338_s21 = sshll.u32 %s3423_s13, 4  ;;  %s3339_s21 = int_to_ptr.vmem [resolvable:$false] %s3338_s21 }
 0x9fd   : > { %s3340_s23 = scalar_lea.vmem %s3339_s21, 1024  ;;  %p3341_p13 = scmp.lt.s32.totalorder %s5392_s26, %s3339_s21 }
 0x9fe   : > { %p3336_p2 = pnand %p3335_p3, %p5616_p8  ;;  %p3342_p1 = scmp.lt.s32.totalorder %s3340_s23, %s3334_s25 }
 0x9ff   : > { %s5618_s27 = smov %s5617_s16  ;;  %s5390_s17 = scalar_lea.hbm %s5617_s16, %s3041_s28 }
 0xa00   : > { %p3337_p4 = pneg %p3336_p2  ;;  %p3343_p12 = por %p3342_p1, %p3341_p13 }
 0xa02   : > { %p3344_p7 = pnand %p3343_p12, %p3337_p4 }
 0xaab   : > { %v2734_v9 = vpop.f32.mrf.mxu0 }
 0xaac   : > { %v2735_v19 = vadd.f32 %v2734_v9, %v2682_v61  ;;  %v2775_v35 = vpop.f32.mrf.mxu1 }
 0xaad   : > { %v2776_v11 = vadd.f32 %v2775_v35, %v2682_v61  ;;  %v2736_v18 = vpop.f32.mrf.mxu0 }
 0xaae   : > { %3206 = vtanh.f32 %v2735_v19  ;;  %v2737_v27 = vadd.f32 %v2736_v18, %v2682_v61  ;;  %v2777_v32 = vpop.f32.mrf.mxu1 }
 0xaaf   : > { %3208 = vtanh.f32 %v2776_v11  ;;  %v2778_v29 = vadd.f32 %v2777_v32, %v2682_v61  ;;  %v2738_v43 = vpop.f32.mrf.mxu0 }
 0xab0   : > { %3210 = vtanh.f32 %v2737_v27  ;;  %v2779_v33 = vpop.f32.mrf.mxu1 }
 0xab1   : > { %3212 = vtanh.f32 %v2778_v29  ;;  %v2739_v54 = vpop.f32.mrf.mxu0 }
 0xab2   : > { %v2780_v37 = vpop.f32.mrf.mxu1 }
 0xabb   : > { %v3207_v45 = vpop.eup %3206 }
 0xabc   : > { %v3209_v36 = vpop.eup %3208  ;;  %2786 = vst [vmem:[%s537_s15] sm:$0xff] %v3207_v45 }
 0xabd   : > { %v3211_v17 = vpop.eup %3210  ;;  %2788 = vst [vmem:[%s537_s15 + $0x10] sm:$0xff] %v3209_v36 }
 0xabe   : > { %v3213_v46 = vpop.eup %3212  ;;  %2787 = vst [vmem:[%s537_s15 + $0x8] sm:$0xff] %v3211_v17 }
 0xabf   : > { %2789 = vst [vmem:[%s537_s15 + $0x18] sm:$0xff] %v3213_v46 }
 0xac0   : > { %3347 = shalt.err (!%p3344_p7)
}
 0xac1   : > { %s3348_s28 = scalar_lea.hbm %s5390_s17, 512  ;;  %s3352_s18 = scalar_lea.hbm %s5618_s27, 1024 }
 0xac2   : > { %p3349_p0 = scmp.ne.s32.totalorder %s5390_s17, %s3348_s28  ;;  %p3353_p9 = scmp.lt.s32.totalorder %s5390_s17, %s5618_s27 }
 0xac3   : > { %p3354_p10 = scmp.lt.s32.totalorder %s3352_s18, %s3348_s28 }
 0xac4   : > { %p3350_p6 = pnand %p3349_p0, %p5616_p8 }
 0xac5   : > { %p3355_p11 = por %p3354_p10, %p3353_p9 }
 0xac6   : > { %p3351_p5 = pneg %p3350_p6 }
 0xac8   : > { %p3356_p3 = pnand %p3355_p11, %p3351_p5 }
 0xaca   : > { %3359 = shalt.err (!%p3356_p3)
}
 0xacb   : > { %3051 = dma.vmem_to_hbm [thread:$0]  (%p5616_p8), %s5392_s26, 512, %s5390_s17, %s2791_s24  }
 0xacc PF: > { %s5619_s11 = sld [smem:[#allocation15_spill]] }
 0xacd   : > { %s5620_s29 = sld [smem:[#allocation20_spill]] }
 0xace   : > { %s5621_s16 = sld [smem:[#allocation17_spill]] }
 0xad2   : > { %s2836_s25 = sand.u32 1, %s5619_s11  }
 0xad3   : > { %p5622_p2 = scmp.ne.s32.totalorder %s5620_s29, 0  ;;  %s2837_s13 = scalar_lea.sflag [#allocation4], %s2836_s25 }
 0xad4   : > { %p5623_p4 = scmp.ge.s32.totalorder %s5621_s16, 2 }
 0xad6   : > { %p3067_p13 = pnand %p5623_p4, %p5622_p2 }
 0xad8   : > { %p3068_p1 = pneg %p3067_p13 }
 0xada   : > { %3385 = dma.done.wait (%p3068_p1), %s2837_s13, 512  }
 0xadb   : > { %3387 = vsyncadd (%p3068_p1), %s2837_s13, 4294966784  ;;  %s2846_s21 = scalar_lea.sflag [#allocation10], %s2836_s25 }
 0xadc   : > { %3389 = dma.done.wait (%p3068_p1), %s2846_s21, 512  }
 0xadd   : > { %3391 = vsyncadd (%p3068_p1), %s2846_s21, 4294966784  ;;  %s5624_s16 = sld [smem:[#allocation18_spill]]  ;;  %s5627_s29 = smov %s3398_s30 }
 0xade   : > { %s5625_s20 = sld [smem:[#allocation16_spill]] }
 0xadf   : > { %s5626_s15 = sld [smem:[#allocation19_spill]] }
 0xae3   : > { %p32_p8 = scmp.ge.s32.totalorder %s5624_s16, 4  }
 0xae4   : > { %s5628_s30 = smov %s5625_s20 }
 0xae5   :  { %34 = sbr.rel (!%p32_p8) target bundleno = 13 (0xd), region = 150 }
 0xaea   :  { %2851 = vsyncpa [#allocation3], 1 }
 0xaeb   :  { %2853 = vsyncpa [#allocation3 + $0x1], 1 }
 0xaec   :  { %2854 = vsyncpa [#allocation6], 1 }
 0xaed   :  { %2856 = vsyncpa [#allocation6 + $0x1], 1 }
 0xaee   :  { %2857 = vsyncpa [#allocation4], 1 }
 0xaef   :  { %2859 = vsyncpa [#allocation4 + $0x1], 1 }
 0xaf0   :  { %2860 = vsyncpa [#allocation10], 1 }
 0xaf1   :  { %2862 = vsyncpa [#allocation10 + $0x1], 1 }

</bundles_post_ra>
